<compile_context>
chip_gen: v6e
topology: v6e:2x2x1
jax: 0.10.0
libtpu: 0.0.40
codegen_flags: <defaults>
</compile_context>

<pallas_src>
import math

import jax
import jax.numpy as jnp
from jax.experimental import pallas as pl
from jax.experimental.pallas import tpu as pltpu

# ----------------------------- configuration ------------------------------
F_FEATURE = 32     # embedding size
N_HEADS = 4        # attention heads
FFN_DIM = 64       # feed-forward hidden dim
N_ENC = 2          # encoder layer count
N_DEC = 2          # decoder layer count
N_LAYERS = N_ENC + N_DEC
LN_EPS = 1e-5
NEG_INF = -1e30    # finite "-inf" (avoids NaNs for fully-masked rows)

APPROX_RECIPROCAL = True   # pl.reciprocal(approx=True) for softmax denom (EUP slot)
GELU_TANH = True           # tanh-approx GELU (EUP); False -> exact erf polynomial


# ----------------------------- in-kernel math ------------------------------
def _erf(x):
    # Abramowitz & Stegun 7.1.26, |err| < 1.5e-7; only mul/add/exp/abs.
    p = 0.3275911
    a1, a2, a3, a4, a5 = (0.254829592, -0.284496736, 1.421413741,
                          -1.453152027, 1.061405429)
    ax = jnp.abs(x)
    t = 1.0 / (1.0 + p * ax)
    poly = ((((a5 * t + a4) * t + a3) * t + a2) * t + a1) * t
    r = 1.0 - poly * jnp.exp(-ax * ax)
    return jnp.where(x >= 0.0, r, -r)


def _gelu(x):
    if GELU_TANH:
        c = math.sqrt(2.0 / math.pi)
        return 0.5 * x * (1.0 + jnp.tanh(c * (x + 0.044715 * x * x * x)))
    return 0.5 * x * (1.0 + _erf(x * (1.0 / math.sqrt(2.0))))


def _recip(x):
    if APPROX_RECIPROCAL:
        return pl.reciprocal(x, approx=True)
    return 1.0 / x


def _layer_norm(x, gamma, beta):
    mean = jnp.mean(x, axis=-1, keepdims=True)
    var = jnp.mean((x - mean) ** 2, axis=-1, keepdims=True)
    return (x - mean) * jax.lax.rsqrt(var + LN_EPS) * gamma + beta


# ------------------------------- fused kernel -------------------------------
def _model_kernel(steps_ref,                       # SMEM scalar prefetch: (B,) int32
                  emb_ref,                         # (B*S, F)      stacked embedding
                  wa_ref,                          # (L, F, 4F+FF) [wq|wk|wv|wo|w1]
                  w2_ref,                          # (L, FF, F)
                  sm_ref,                          # (L, 4, 4F)    biases / LN / ptr
                  o_ref):                          # (1, B*S*S)    lane-dense output
    f32 = jnp.float32
    i32 = jnp.int32

    x0 = emb_ref[...].astype(f32)                  # (B*S, F)
    BS, F = x0.shape
    B = steps_ref.shape[0]
    S = BS // B
    H = N_HEADS
    dh = F // H
    HBS = H * BS
    FLAT = B * S * S
    CONTRACT_LAST = (((1,), (1,)), ((), ()))       # contract last dim of both operands

    # ======== hoisted constants (iota + compare/where only; no vector div/mod) ========
    # (a) head block mask for the block-diagonal K/V slabs: (HBS, F)
    rr = jax.lax.broadcasted_iota(i32, (HBS, F), 0)
    ff = jax.lax.broadcasted_iota(i32, (HBS, F), 1)
    h_of_row = sum(((rr >= h * BS)).astype(i32) for h in range(1, H))
    head_mask = ((ff >= h_of_row * dh) & (ff < (h_of_row + 1) * dh)).astype(f32)

    # (b) per-head lane selectors over the fused score lanes: (1, HBS) each
    lane1 = jax.lax.broadcasted_iota(i32, (1, HBS), 1)
    head_sel = [((lane1 >= h * BS) & (lane1 < (h + 1) * BS)).astype(f32)
                for h in range(H)]

    # (c) full-width additive score masks (BS, HBS); lane block id = h*B + b_key
    qr = jax.lax.broadcasted_iota(i32, (BS, HBS), 0)
    lc = jax.lax.broadcasted_iota(i32, (BS, HBS), 1)
    bq = sum(((qr >= b * S)).astype(i32) for b in range(1, B))       # query batch
    t_q = qr - bq * S                                                # query timestep
    blk = sum(((lc >= m * S)).astype(i32) for m in range(1, H * B))  # lane block id
    j_k = lc - blk * S                                               # key index in block
    bk = jnp.zeros_like(lc)
    for m in range(H * B):
        bk = jnp.where((lc >= m * S) & (lc < (m + 1) * S), m % B, bk)  # key batch
    n_k = jnp.zeros_like(lc)
    for b in range(B):
        n_k = jnp.where(bk == b, steps_ref[b], n_k)                  # per-key valid count
    base_bad = (bk != bq) | (j_k >= n_k)          # cross-batch | key padding
    enc_neg = jnp.where(base_bad, NEG_INF, 0.0)
    dec_neg = jnp.where(base_bad | (j_k >= t_q), NEG_INF, 0.0)       # + strict causal

    # (d) pointer-head scatter matrices (BS, FLAT); flat lane l = b*S*S + t*S + j
    r_l = jax.lax.broadcasted_iota(i32, (BS, FLAT), 0)
    l_l = jax.lax.broadcasted_iota(i32, (BS, FLAT), 1)
    #   query part: value r=(b*S+t) goes to lanes [r*S, r*S+S)
    rep_q = ((l_l >= r_l * S) & (l_l < r_l * S + S)).astype(f32)
    #   key part: value r=(b*S+j) goes to lanes {r + b*S*(S-1) + t*S : t}
    b_r = sum(((r_l >= b * S)).astype(i32) for b in range(1, B))
    c_r = r_l + b_r * (S * (S - 1))
    rep_k = sum(((l_l == c_r + tt * S)).astype(f32) for tt in range(S))
    #   zero the t==0 query column: first S lanes of each batch block
    lane_f = jax.lax.broadcasted_iota(i32, (1, FLAT), 1)
    t0 = jnp.zeros_like(lane_f)
    for b in range(B):
        t0 = jnp.where((lane_f >= b * S * S) & (lane_f < b * S * S + S), 1, t0)
    not_t0 = (t0 == 0).astype(f32)                                   # (1, FLAT)

    inv_sqrt_dh = 1.0 / math.sqrt(dh)

    # ======== one encoder/decoder block (all batches + heads fused) ========
    def block(l, x, mem, neg, fused_qkv):
        w = wa_ref[l]                          # (F, 4F+FF)
        sm = sm_ref[l]                         # (4, 4F)
        b_att = sm[0:1, :]                     # bq|bk|bv|bo
        b_ffn = sm[1:2, :]                     # b1|b2|pad
        lnp = sm[2:3, :]                       # g1|be1|g2|be2

        if fused_qkv:                          # encoder: queries == keys/values source
            qkv = jnp.dot(x, w[:, 0:3 * F], preferred_element_type=f32) + b_att[:, 0:3 * F]
            q, k, v = qkv[:, 0:F], qkv[:, F:2 * F], qkv[:, 2 * F:3 * F]
        else:                                  # decoder: q from x, k/v from memory
            q = jnp.dot(x, w[:, 0:F], preferred_element_type=f32) + b_att[:, 0:F]
            kv = jnp.dot(mem, w[:, F:3 * F], preferred_element_type=f32) + b_att[:, F:3 * F]
            k, v = kv[:, 0:F], kv[:, F:2 * F]
        q = q * inv_sqrt_dh                    # pre-scale once (1/sqrt(head_dim))

        # block-diagonal K / V slabs: all heads & batches in ONE score + ONE PV matmul
        kbd = jnp.concatenate([k] * H, axis=0) * head_mask          # (HBS, F)
        vbd = jnp.concatenate([v] * H, axis=0) * head_mask          # (HBS, F)

        s_all = jax.lax.dot_general(q, kbd, CONTRACT_LAST,
                                    preferred_element_type=f32) + neg   # (BS, HBS)
        # per-head softmax via static lane slices + selector broadcast (no reshapes)
        m_hs = [jnp.max(s_all[:, h * BS:(h + 1) * BS], axis=-1, keepdims=True)
                for h in range(H)]
        m_all = sum(m_hs[h] * head_sel[h] for h in range(H))            # (BS, HBS)
        e_all = jnp.exp(s_all - m_all)
        d_hs = [jnp.sum(e_all[:, h * BS:(h + 1) * BS], axis=-1, keepdims=True)
                for h in range(H)]
        d_all = sum(d_hs[h] * head_sel[h] for h in range(H))
        p_all = e_all * _recip(d_all)

        cat = jnp.dot(p_all, vbd, preferred_element_type=f32)           # (BS, F) = concat(heads)
        attn = (jnp.dot(cat, w[:, 3 * F:4 * F], preferred_element_type=f32)
                + b_att[:, 3 * F:4 * F])

        h1 = _layer_norm(x + attn, lnp[:, 0:F], lnp[:, F:2 * F])
        ffh = (jnp.dot(h1, w[:, 4 * F:4 * F + FFN_DIM], preferred_element_type=f32)
               + b_ffn[:, 0:FFN_DIM])
        ffh = _gelu(ffh)
        ffo = (jnp.dot(ffh, w2_ref[l], preferred_element_type=f32)
               + b_ffn[:, FFN_DIM:FFN_DIM + F])
        return _layer_norm(h1 + ffo, lnp[:, 2 * F:3 * F], lnp[:, 3 * F:4 * F])

    # encoder: self-attention with key-padding mask
    mem = x0
    for l in range(N_ENC):
        mem = block(l, mem, mem, enc_neg, fused_qkv=True)

    # decoder: all timesteps as independent parallel queries over encoder memory
    x = x0
    for l in range(N_DEC):
        x = block(N_ENC + l, x, mem, dec_neg, fused_qkv=False)

    # pointer head: out[b, j, t] = sigmoid((x[b,t].wq + mem[b,j].wk) / sqrt(F)); t==0 -> 0
    sm0 = sm_ref[0]                                # ptr vectors live in layer-0 row 3
    wq_vec = sm0[3:4, 0:F]
    wk_vec = sm0[3:4, F:2 * F]
    qv = jax.lax.dot_general(wq_vec, x, CONTRACT_LAST, preferred_element_type=f32)    # (1, BS)
    kv = jax.lax.dot_general(wk_vec, mem, CONTRACT_LAST, preferred_element_type=f32)  # (1, BS)
    a_flat = jnp.dot(qv, rep_q, preferred_element_type=f32)          # (1, FLAT)
    b_flat = jnp.dot(kv, rep_k, preferred_element_type=f32)          # (1, FLAT)
    logits = (a_flat + b_flat) * (1.0 / math.sqrt(F))
    o_ref[...] = (jax.nn.sigmoid(logits) * not_t0).astype(o_ref.dtype)


# -------------------------------- wrapper ------------------------------------
def model_pointer_forward(embedding, original_steps, params):
    """embedding: (B, S, F) = embedder(input); original_steps: (B,) int32."""
    B, S, F = embedding.shape
    L, FF = N_LAYERS, FFN_DIM
    BS = B * S
    FLAT = B * S * S
    emb2 = embedding.reshape(BS, F)

    grid_spec = pltpu.PrefetchScalarGridSpec(
        num_scalar_prefetch=1,
        grid=(1,),                                  # single step: batch folded into sublanes
        in_specs=[
            pl.BlockSpec((BS, F), lambda i, steps: (0, 0)),
            pl.BlockSpec((L, F, 4 * F + FF), lambda i, steps: (0, 0, 0)),
            pl.BlockSpec((L, FF, F), lambda i, steps: (0, 0, 0)),
            pl.BlockSpec((L, 4, 4 * F), lambda i, steps: (0, 0, 0)),
        ],
        out_specs=pl.BlockSpec((1, FLAT), lambda i, steps: (0, 0)),
    )
    flat = pl.pallas_call(
        _model_kernel,
        out_shape=jax.ShapeDtypeStruct((1, FLAT), jnp.float32),
        grid_spec=grid_spec,
        compiler_params=pltpu.CompilerParams(dimension_semantics=("arbitrary",)),
    )(original_steps.astype(jnp.int32), emb2,
      params["wa"], params["w2"], params["small"])
    # kernel lane layout: l = b*S*S + t*S + j  ->  (B, t, j)  ->  (B, step_key, step_query)
    return jnp.transpose(flat.reshape(B, S, S), (0, 2, 1))


# ----------------------- deterministic parameter init -----------------------
def _xavier(key, shape):
    std = math.sqrt(2.0 / (shape[0] + shape[1]))
    return std * jax.random.normal(key, shape, dtype=jnp.float32)


def _normal(key, shape):
    return jax.random.normal(key, shape, dtype=jnp.float32)


def init_model_params(key):
    F, FF, L = F_FEATURE, FFN_DIM, N_LAYERS
    LANES = 4 * F
    keys = jax.random.split(key, L * 16 + 2)
    ptr_wq = _normal(keys[-2], (F,))
    ptr_wk = _normal(keys[-1], (F,))
    wa, w2s, small = [], [], []
    for l in range(L):
        k = keys[l * 16:(l + 1) * 16]
        wq, wk, wv, wo = (_xavier(k[i], (F, F)) for i in range(4))
        bq, bk, bv, bo = (_normal(k[4 + i], (F,)) for i in range(4))
        w1 = _xavier(k[8], (F, FF)); b1 = _normal(k[9], (FF,))
        w2 = _xavier(k[10], (FF, F)); b2 = _normal(k[11], (F,))
        g1, be1, g2, be2 = (_normal(k[12 + i], (F,)) for i in range(4))
        wa.append(jnp.concatenate([wq, wk, wv, wo, w1], axis=1))       # (F, 4F+FF)
        w2s.append(w2)                                                 # (FF, F)
        row0 = jnp.concatenate([bq, bk, bv, bo])                       # (4F,)
        row1 = jnp.concatenate([b1, b2, jnp.zeros((LANES - FF - F,), jnp.float32)])
        row2 = jnp.concatenate([g1, be1, g2, be2])
        if l == 0:
            row3 = jnp.concatenate([ptr_wq, ptr_wk,
                                    jnp.zeros((LANES - 2 * F,), jnp.float32)])
        else:
            row3 = jnp.zeros((LANES,), jnp.float32)
        small.append(jnp.stack([row0, row1, row2, row3]))              # (4, 4F)
    return {
        "wa": jnp.stack(wa),          # (L, F, 4F+FF)
        "w2": jnp.stack(w2s),         # (L, FF, F)
        "small": jnp.stack(small),    # (L, 4, 4F)
    }


# --------------------------------- main --------------------------------------
if __name__ == "__main__":
    B, S = 2, 8
    key = jax.random.PRNGKey(0)
    k_emb, k_par = jax.random.split(key)

    embedding = jax.random.normal(k_emb, (B, S, F_FEATURE), dtype=jnp.float32)
    original_steps = jnp.array([8, 5], dtype=jnp.int32)   # DataBatchPointer.original_size[:, 0]
    params = init_model_params(k_par)

    out = model_pointer_forward(embedding, original_steps, params)
    out = jax.block_until_ready(out)

    assert out.shape == (B, S, S), out.shape
    assert bool(jnp.all(jnp.isfinite(out)))
    assert bool(jnp.all(out[:, :, 0] == 0.0))   # timestep 0 column is zeros
    print("KERNEL_OK")
</pallas_src>

<mosaic_0001>
module attributes {stable_mosaic.version = 11 : i64} {
  func.func @_model_kernel(%arg0: i32, %arg1: memref<2xi32, #tpu.memory_space<smem>>, %arg2: memref<16x32xf32, #tpu.memory_space<vmem>>, %arg3: memref<4x32x192xf32, #tpu.memory_space<vmem>>, %arg4: memref<4x64x32xf32, #tpu.memory_space<vmem>>, %arg5: memref<4x4x128xf32, #tpu.memory_space<vmem>>, %arg6: memref<1x128xf32, #tpu.memory_space<vmem>>) attributes {dimension_semantics = [#tpu.dimension_semantics<arbitrary>], iteration_bounds = array<i64: 1>, scalar_prefetch = 1 : i64, scratch_operands = 0 : i64, tpu.core_type = #tpu.core_type<tc>, window_params = [{pipeline_mode = #tpu.pipeline_mode<synchronous>, transform_indices = @transform_0, window_bounds = array<i64: 16, 32>}, {pipeline_mode = #tpu.pipeline_mode<synchronous>, transform_indices = @transform_1, window_bounds = array<i64: 4, 32, 192>}, {pipeline_mode = #tpu.pipeline_mode<synchronous>, transform_indices = @transform_2, window_bounds = array<i64: 4, 64, 32>}, {pipeline_mode = #tpu.pipeline_mode<synchronous>, transform_indices = @transform_3, window_bounds = array<i64: 4, 4, 128>}, {pipeline_mode = #tpu.pipeline_mode<synchronous>, transform_indices = @transform_4, window_bounds = array<i64: 1, 128>}]} {
    %c0 = arith.constant 0 : index
    %c0_0 = arith.constant 0 : index
    %0 = vector.load %arg2[%c0, %c0_0] : memref<16x32xf32, #tpu.memory_space<vmem>>, vector<16x32xf32>
    %1 = tpu.iota {dimensions = array<i32: 0>} : vector<64x32xi32>
    %2 = tpu.iota {dimensions = array<i32: 1>} : vector<64x32xi32>
    %c16_i32 = arith.constant 16 : i32
    %3 = vector.broadcast %c16_i32 : i32 to vector<64x32xi32>
    %4 = arith.cmpi sge, %1, %3 : vector<64x32xi32>
    %5 = arith.extui %4 : vector<64x32xi1> to vector<64x32xi32>
    %c0_i32 = arith.constant 0 : i32
    %6 = vector.broadcast %c0_i32 : i32 to vector<64x32xi32>
    %7 = arith.addi %6, %5 : vector<64x32xi32>
    %c32_i32 = arith.constant 32 : i32
    %8 = vector.broadcast %c32_i32 : i32 to vector<64x32xi32>
    %9 = arith.cmpi sge, %1, %8 : vector<64x32xi32>
    %10 = arith.extui %9 : vector<64x32xi1> to vector<64x32xi32>
    %11 = arith.addi %7, %10 : vector<64x32xi32>
    %c48_i32 = arith.constant 48 : i32
    %12 = vector.broadcast %c48_i32 : i32 to vector<64x32xi32>
    %13 = arith.cmpi sge, %1, %12 : vector<64x32xi32>
    %14 = arith.extui %13 : vector<64x32xi1> to vector<64x32xi32>
    %15 = arith.addi %11, %14 : vector<64x32xi32>
    %c8_i32 = arith.constant 8 : i32
    %16 = vector.broadcast %c8_i32 : i32 to vector<64x32xi32>
    %17 = arith.muli %15, %16 : vector<64x32xi32>
    %18 = arith.cmpi sge, %2, %17 : vector<64x32xi32>
    %c1_i32 = arith.constant 1 : i32
    %19 = vector.broadcast %c1_i32 : i32 to vector<64x32xi32>
    %20 = arith.addi %15, %19 : vector<64x32xi32>
    %c8_i32_1 = arith.constant 8 : i32
    %21 = vector.broadcast %c8_i32_1 : i32 to vector<64x32xi32>
    %22 = arith.muli %20, %21 : vector<64x32xi32>
    %23 = arith.cmpi slt, %2, %22 : vector<64x32xi32>
    %24 = arith.andi %18, %23 : vector<64x32xi1>
    %25 = arith.extui %24 : vector<64x32xi1> to vector<64x32xi32>
    %26 = arith.sitofp %25 : vector<64x32xi32> to vector<64x32xf32>
    %27 = tpu.iota {dimensions = array<i32: 1>} : vector<1x64xi32>
    %c0_i32_2 = arith.constant 0 : i32
    %28 = vector.broadcast %c0_i32_2 : i32 to vector<1x64xi32>
    %29 = arith.cmpi sge, %27, %28 : vector<1x64xi32>
    %c16_i32_3 = arith.constant 16 : i32
    %30 = vector.broadcast %c16_i32_3 : i32 to vector<1x64xi32>
    %31 = arith.cmpi slt, %27, %30 : vector<1x64xi32>
    %32 = arith.andi %29, %31 : vector<1x64xi1>
    %33 = arith.extui %32 : vector<1x64xi1> to vector<1x64xi32>
    %34 = arith.sitofp %33 : vector<1x64xi32> to vector<1x64xf32>
    %c16_i32_4 = arith.constant 16 : i32
    %35 = vector.broadcast %c16_i32_4 : i32 to vector<1x64xi32>
    %36 = arith.cmpi sge, %27, %35 : vector<1x64xi32>
    %c32_i32_5 = arith.constant 32 : i32
    %37 = vector.broadcast %c32_i32_5 : i32 to vector<1x64xi32>
    %38 = arith.cmpi slt, %27, %37 : vector<1x64xi32>
    %39 = arith.andi %36, %38 : vector<1x64xi1>
    %40 = arith.extui %39 : vector<1x64xi1> to vector<1x64xi32>
    %41 = arith.sitofp %40 : vector<1x64xi32> to vector<1x64xf32>
    %c32_i32_6 = arith.constant 32 : i32
    %42 = vector.broadcast %c32_i32_6 : i32 to vector<1x64xi32>
    %43 = arith.cmpi sge, %27, %42 : vector<1x64xi32>
    %c48_i32_7 = arith.constant 48 : i32
    %44 = vector.broadcast %c48_i32_7 : i32 to vector<1x64xi32>
    %45 = arith.cmpi slt, %27, %44 : vector<1x64xi32>
    %46 = arith.andi %43, %45 : vector<1x64xi1>
    %47 = arith.extui %46 : vector<1x64xi1> to vector<1x64xi32>
    %48 = arith.sitofp %47 : vector<1x64xi32> to vector<1x64xf32>
    %c48_i32_8 = arith.constant 48 : i32
    %49 = vector.broadcast %c48_i32_8 : i32 to vector<1x64xi32>
    %50 = arith.cmpi sge, %27, %49 : vector<1x64xi32>
    %c64_i32 = arith.constant 64 : i32
    %51 = vector.broadcast %c64_i32 : i32 to vector<1x64xi32>
    %52 = arith.cmpi slt, %27, %51 : vector<1x64xi32>
    %53 = arith.andi %50, %52 : vector<1x64xi1>
    %54 = arith.extui %53 : vector<1x64xi1> to vector<1x64xi32>
    %55 = arith.sitofp %54 : vector<1x64xi32> to vector<1x64xf32>
    %56 = tpu.iota {dimensions = array<i32: 0>} : vector<16x64xi32>
    %57 = tpu.iota {dimensions = array<i32: 1>} : vector<16x64xi32>
    %c8_i32_9 = arith.constant 8 : i32
    %58 = vector.broadcast %c8_i32_9 : i32 to vector<16x64xi32>
    %59 = arith.cmpi sge, %56, %58 : vector<16x64xi32>
    %60 = arith.extui %59 : vector<16x64xi1> to vector<16x64xi32>
    %c0_i32_10 = arith.constant 0 : i32
    %61 = vector.broadcast %c0_i32_10 : i32 to vector<16x64xi32>
    %62 = arith.addi %61, %60 : vector<16x64xi32>
    %c8_i32_11 = arith.constant 8 : i32
    %63 = vector.broadcast %c8_i32_11 : i32 to vector<16x64xi32>
    %64 = arith.muli %62, %63 : vector<16x64xi32>
    %65 = arith.subi %56, %64 : vector<16x64xi32>
    %c8_i32_12 = arith.constant 8 : i32
    %66 = vector.broadcast %c8_i32_12 : i32 to vector<16x64xi32>
    %67 = arith.cmpi sge, %57, %66 : vector<16x64xi32>
    %68 = arith.extui %67 : vector<16x64xi1> to vector<16x64xi32>
    %c0_i32_13 = arith.constant 0 : i32
    %69 = vector.broadcast %c0_i32_13 : i32 to vector<16x64xi32>
    %70 = arith.addi %69, %68 : vector<16x64xi32>
    %c16_i32_14 = arith.constant 16 : i32
    %71 = vector.broadcast %c16_i32_14 : i32 to vector<16x64xi32>
    %72 = arith.cmpi sge, %57, %71 : vector<16x64xi32>
    %73 = arith.extui %72 : vector<16x64xi1> to vector<16x64xi32>
    %74 = arith.addi %70, %73 : vector<16x64xi32>
    %c24_i32 = arith.constant 24 : i32
    %75 = vector.broadcast %c24_i32 : i32 to vector<16x64xi32>
    %76 = arith.cmpi sge, %57, %75 : vector<16x64xi32>
    %77 = arith.extui %76 : vector<16x64xi1> to vector<16x64xi32>
    %78 = arith.addi %74, %77 : vector<16x64xi32>
    %c32_i32_15 = arith.constant 32 : i32
    %79 = vector.broadcast %c32_i32_15 : i32 to vector<16x64xi32>
    %80 = arith.cmpi sge, %57, %79 : vector<16x64xi32>
    %81 = arith.extui %80 : vector<16x64xi1> to vector<16x64xi32>
    %82 = arith.addi %78, %81 : vector<16x64xi32>
    %c40_i32 = arith.constant 40 : i32
    %83 = vector.broadcast %c40_i32 : i32 to vector<16x64xi32>
    %84 = arith.cmpi sge, %57, %83 : vector<16x64xi32>
    %85 = arith.extui %84 : vector<16x64xi1> to vector<16x64xi32>
    %86 = arith.addi %82, %85 : vector<16x64xi32>
    %c48_i32_16 = arith.constant 48 : i32
    %87 = vector.broadcast %c48_i32_16 : i32 to vector<16x64xi32>
    %88 = arith.cmpi sge, %57, %87 : vector<16x64xi32>
    %89 = arith.extui %88 : vector<16x64xi1> to vector<16x64xi32>
    %90 = arith.addi %86, %89 : vector<16x64xi32>
    %c56_i32 = arith.constant 56 : i32
    %91 = vector.broadcast %c56_i32 : i32 to vector<16x64xi32>
    %92 = arith.cmpi sge, %57, %91 : vector<16x64xi32>
    %93 = arith.extui %92 : vector<16x64xi1> to vector<16x64xi32>
    %94 = arith.addi %90, %93 : vector<16x64xi32>
    %c8_i32_17 = arith.constant 8 : i32
    %95 = vector.broadcast %c8_i32_17 : i32 to vector<16x64xi32>
    %96 = arith.muli %94, %95 : vector<16x64xi32>
    %97 = arith.subi %57, %96 : vector<16x64xi32>
    %c0_i32_18 = arith.constant 0 : i32
    %98 = vector.broadcast %c0_i32_18 : i32 to vector<16x64xi32>
    %c0_i32_19 = arith.constant 0 : i32
    %99 = vector.broadcast %c0_i32_19 : i32 to vector<16x64xi32>
    %100 = arith.cmpi sge, %57, %99 : vector<16x64xi32>
    %c8_i32_20 = arith.constant 8 : i32
    %101 = vector.broadcast %c8_i32_20 : i32 to vector<16x64xi32>
    %102 = arith.cmpi slt, %57, %101 : vector<16x64xi32>
    %103 = arith.andi %100, %102 : vector<16x64xi1>
    %c0_i32_21 = arith.constant 0 : i32
    %104 = vector.broadcast %c0_i32_21 : i32 to vector<16x64xi32>
    %105 = arith.select %103, %104, %98 : vector<16x64xi1>, vector<16x64xi32>
    %c8_i32_22 = arith.constant 8 : i32
    %106 = vector.broadcast %c8_i32_22 : i32 to vector<16x64xi32>
    %107 = arith.cmpi sge, %57, %106 : vector<16x64xi32>
    %c16_i32_23 = arith.constant 16 : i32
    %108 = vector.broadcast %c16_i32_23 : i32 to vector<16x64xi32>
    %109 = arith.cmpi slt, %57, %108 : vector<16x64xi32>
    %110 = arith.andi %107, %109 : vector<16x64xi1>
    %c1_i32_24 = arith.constant 1 : i32
    %111 = vector.broadcast %c1_i32_24 : i32 to vector<16x64xi32>
    %112 = arith.select %110, %111, %105 : vector<16x64xi1>, vector<16x64xi32>
    %c16_i32_25 = arith.constant 16 : i32
    %113 = vector.broadcast %c16_i32_25 : i32 to vector<16x64xi32>
    %114 = arith.cmpi sge, %57, %113 : vector<16x64xi32>
    %c24_i32_26 = arith.constant 24 : i32
    %115 = vector.broadcast %c24_i32_26 : i32 to vector<16x64xi32>
    %116 = arith.cmpi slt, %57, %115 : vector<16x64xi32>
    %117 = arith.andi %114, %116 : vector<16x64xi1>
    %c0_i32_27 = arith.constant 0 : i32
    %118 = vector.broadcast %c0_i32_27 : i32 to vector<16x64xi32>
    %119 = arith.select %117, %118, %112 : vector<16x64xi1>, vector<16x64xi32>
    %c24_i32_28 = arith.constant 24 : i32
    %120 = vector.broadcast %c24_i32_28 : i32 to vector<16x64xi32>
    %121 = arith.cmpi sge, %57, %120 : vector<16x64xi32>
    %c32_i32_29 = arith.constant 32 : i32
    %122 = vector.broadcast %c32_i32_29 : i32 to vector<16x64xi32>
    %123 = arith.cmpi slt, %57, %122 : vector<16x64xi32>
    %124 = arith.andi %121, %123 : vector<16x64xi1>
    %c1_i32_30 = arith.constant 1 : i32
    %125 = vector.broadcast %c1_i32_30 : i32 to vector<16x64xi32>
    %126 = arith.select %124, %125, %119 : vector<16x64xi1>, vector<16x64xi32>
    %c32_i32_31 = arith.constant 32 : i32
    %127 = vector.broadcast %c32_i32_31 : i32 to vector<16x64xi32>
    %128 = arith.cmpi sge, %57, %127 : vector<16x64xi32>
    %c40_i32_32 = arith.constant 40 : i32
    %129 = vector.broadcast %c40_i32_32 : i32 to vector<16x64xi32>
    %130 = arith.cmpi slt, %57, %129 : vector<16x64xi32>
    %131 = arith.andi %128, %130 : vector<16x64xi1>
    %c0_i32_33 = arith.constant 0 : i32
    %132 = vector.broadcast %c0_i32_33 : i32 to vector<16x64xi32>
    %133 = arith.select %131, %132, %126 : vector<16x64xi1>, vector<16x64xi32>
    %c40_i32_34 = arith.constant 40 : i32
    %134 = vector.broadcast %c40_i32_34 : i32 to vector<16x64xi32>
    %135 = arith.cmpi sge, %57, %134 : vector<16x64xi32>
    %c48_i32_35 = arith.constant 48 : i32
    %136 = vector.broadcast %c48_i32_35 : i32 to vector<16x64xi32>
    %137 = arith.cmpi slt, %57, %136 : vector<16x64xi32>
    %138 = arith.andi %135, %137 : vector<16x64xi1>
    %c1_i32_36 = arith.constant 1 : i32
    %139 = vector.broadcast %c1_i32_36 : i32 to vector<16x64xi32>
    %140 = arith.select %138, %139, %133 : vector<16x64xi1>, vector<16x64xi32>
    %c48_i32_37 = arith.constant 48 : i32
    %141 = vector.broadcast %c48_i32_37 : i32 to vector<16x64xi32>
    %142 = arith.cmpi sge, %57, %141 : vector<16x64xi32>
    %c56_i32_38 = arith.constant 56 : i32
    %143 = vector.broadcast %c56_i32_38 : i32 to vector<16x64xi32>
    %144 = arith.cmpi slt, %57, %143 : vector<16x64xi32>
    %145 = arith.andi %142, %144 : vector<16x64xi1>
    %c0_i32_39 = arith.constant 0 : i32
    %146 = vector.broadcast %c0_i32_39 : i32 to vector<16x64xi32>
    %147 = arith.select %145, %146, %140 : vector<16x64xi1>, vector<16x64xi32>
    %c56_i32_40 = arith.constant 56 : i32
    %148 = vector.broadcast %c56_i32_40 : i32 to vector<16x64xi32>
    %149 = arith.cmpi sge, %57, %148 : vector<16x64xi32>
    %c64_i32_41 = arith.constant 64 : i32
    %150 = vector.broadcast %c64_i32_41 : i32 to vector<16x64xi32>
    %151 = arith.cmpi slt, %57, %150 : vector<16x64xi32>
    %152 = arith.andi %149, %151 : vector<16x64xi1>
    %c1_i32_42 = arith.constant 1 : i32
    %153 = vector.broadcast %c1_i32_42 : i32 to vector<16x64xi32>
    %154 = arith.select %152, %153, %147 : vector<16x64xi1>, vector<16x64xi32>
    %c0_i32_43 = arith.constant 0 : i32
    %155 = vector.broadcast %c0_i32_43 : i32 to vector<16x64xi32>
    %c0_i32_44 = arith.constant 0 : i32
    %156 = vector.broadcast %c0_i32_44 : i32 to vector<16x64xi32>
    %157 = arith.cmpi eq, %154, %156 : vector<16x64xi32>
    %c0_45 = arith.constant 0 : index
    %158 = memref.load %arg1[%c0_45] : memref<2xi32, #tpu.memory_space<smem>>
    %159 = vector.broadcast %158 : i32 to vector<16x64xi32>
    %160 = arith.select %157, %159, %155 : vector<16x64xi1>, vector<16x64xi32>
    %c1_i32_46 = arith.constant 1 : i32
    %161 = vector.broadcast %c1_i32_46 : i32 to vector<16x64xi32>
    %162 = arith.cmpi eq, %154, %161 : vector<16x64xi32>
    %c1 = arith.constant 1 : index
    %163 = memref.load %arg1[%c1] : memref<2xi32, #tpu.memory_space<smem>>
    %164 = vector.broadcast %163 : i32 to vector<16x64xi32>
    %165 = arith.select %162, %164, %160 : vector<16x64xi1>, vector<16x64xi32>
    %166 = arith.cmpi ne, %154, %62 : vector<16x64xi32>
    %167 = arith.cmpi sge, %97, %165 : vector<16x64xi32>
    %168 = arith.ori %166, %167 : vector<16x64xi1>
    %cst = arith.constant -1.000000e+30 : f32
    %cst_47 = arith.constant 0.000000e+00 : f32
    %169 = vector.broadcast %cst : f32 to vector<16x64xf32>
    %170 = vector.broadcast %cst_47 : f32 to vector<16x64xf32>
    %171 = arith.select %168, %169, %170 : vector<16x64xi1>, vector<16x64xf32>
    %172 = arith.cmpi sge, %97, %65 : vector<16x64xi32>
    %173 = arith.ori %168, %172 : vector<16x64xi1>
    %cst_48 = arith.constant -1.000000e+30 : f32
    %cst_49 = arith.constant 0.000000e+00 : f32
    %174 = vector.broadcast %cst_48 : f32 to vector<16x64xf32>
    %175 = vector.broadcast %cst_49 : f32 to vector<16x64xf32>
    %176 = arith.select %173, %174, %175 : vector<16x64xi1>, vector<16x64xf32>
    %177 = tpu.iota {dimensions = array<i32: 0>} : vector<16x128xi32>
    %178 = tpu.iota {dimensions = array<i32: 1>} : vector<16x128xi32>
    %c8_i32_50 = arith.constant 8 : i32
    %179 = vector.broadcast %c8_i32_50 : i32 to vector<16x128xi32>
    %180 = arith.muli %177, %179 : vector<16x128xi32>
    %181 = arith.cmpi sge, %178, %180 : vector<16x128xi32>
    %c8_i32_51 = arith.constant 8 : i32
    %182 = vector.broadcast %c8_i32_51 : i32 to vector<16x128xi32>
    %183 = arith.muli %177, %182 : vector<16x128xi32>
    %c8_i32_52 = arith.constant 8 : i32
    %184 = vector.broadcast %c8_i32_52 : i32 to vector<16x128xi32>
    %185 = arith.addi %183, %184 : vector<16x128xi32>
    %186 = arith.cmpi slt, %178, %185 : vector<16x128xi32>
    %187 = arith.andi %181, %186 : vector<16x128xi1>
    %188 = arith.extui %187 : vector<16x128xi1> to vector<16x128xi32>
    %189 = arith.sitofp %188 : vector<16x128xi32> to vector<16x128xf32>
    %c8_i32_53 = arith.constant 8 : i32
    %190 = vector.broadcast %c8_i32_53 : i32 to vector<16x128xi32>
    %191 = arith.cmpi sge, %177, %190 : vector<16x128xi32>
    %192 = arith.extui %191 : vector<16x128xi1> to vector<16x128xi32>
    %c0_i32_54 = arith.constant 0 : i32
    %193 = vector.broadcast %c0_i32_54 : i32 to vector<16x128xi32>
    %194 = arith.addi %193, %192 : vector<16x128xi32>
    %c56_i32_55 = arith.constant 56 : i32
    %195 = vector.broadcast %c56_i32_55 : i32 to vector<16x128xi32>
    %196 = arith.muli %194, %195 : vector<16x128xi32>
    %197 = arith.addi %177, %196 : vector<16x128xi32>
    %c0_i32_56 = arith.constant 0 : i32
    %198 = vector.broadcast %c0_i32_56 : i32 to vector<16x128xi32>
    %199 = arith.addi %197, %198 : vector<16x128xi32>
    %200 = arith.cmpi eq, %178, %199 : vector<16x128xi32>
    %201 = arith.extui %200 : vector<16x128xi1> to vector<16x128xi32>
    %202 = arith.sitofp %201 : vector<16x128xi32> to vector<16x128xf32>
    %cst_57 = arith.constant 0.000000e+00 : f32
    %203 = vector.broadcast %cst_57 : f32 to vector<16x128xf32>
    %204 = arith.addf %203, %202 : vector<16x128xf32>
    %c8_i32_58 = arith.constant 8 : i32
    %205 = vector.broadcast %c8_i32_58 : i32 to vector<16x128xi32>
    %206 = arith.addi %197, %205 : vector<16x128xi32>
    %207 = arith.cmpi eq, %178, %206 : vector<16x128xi32>
    %208 = arith.extui %207 : vector<16x128xi1> to vector<16x128xi32>
    %209 = arith.sitofp %208 : vector<16x128xi32> to vector<16x128xf32>
    %210 = arith.addf %204, %209 : vector<16x128xf32>
    %c16_i32_59 = arith.constant 16 : i32
    %211 = vector.broadcast %c16_i32_59 : i32 to vector<16x128xi32>
    %212 = arith.addi %197, %211 : vector<16x128xi32>
    %213 = arith.cmpi eq, %178, %212 : vector<16x128xi32>
    %214 = arith.extui %213 : vector<16x128xi1> to vector<16x128xi32>
    %215 = arith.sitofp %214 : vector<16x128xi32> to vector<16x128xf32>
    %216 = arith.addf %210, %215 : vector<16x128xf32>
    %c24_i32_60 = arith.constant 24 : i32
    %217 = vector.broadcast %c24_i32_60 : i32 to vector<16x128xi32>
    %218 = arith.addi %197, %217 : vector<16x128xi32>
    %219 = arith.cmpi eq, %178, %218 : vector<16x128xi32>
    %220 = arith.extui %219 : vector<16x128xi1> to vector<16x128xi32>
    %221 = arith.sitofp %220 : vector<16x128xi32> to vector<16x128xf32>
    %222 = arith.addf %216, %221 : vector<16x128xf32>
    %c32_i32_61 = arith.constant 32 : i32
    %223 = vector.broadcast %c32_i32_61 : i32 to vector<16x128xi32>
    %224 = arith.addi %197, %223 : vector<16x128xi32>
    %225 = arith.cmpi eq, %178, %224 : vector<16x128xi32>
    %226 = arith.extui %225 : vector<16x128xi1> to vector<16x128xi32>
    %227 = arith.sitofp %226 : vector<16x128xi32> to vector<16x128xf32>
    %228 = arith.addf %222, %227 : vector<16x128xf32>
    %c40_i32_62 = arith.constant 40 : i32
    %229 = vector.broadcast %c40_i32_62 : i32 to vector<16x128xi32>
    %230 = arith.addi %197, %229 : vector<16x128xi32>
    %231 = arith.cmpi eq, %178, %230 : vector<16x128xi32>
    %232 = arith.extui %231 : vector<16x128xi1> to vector<16x128xi32>
    %233 = arith.sitofp %232 : vector<16x128xi32> to vector<16x128xf32>
    %234 = arith.addf %228, %233 : vector<16x128xf32>
    %c48_i32_63 = arith.constant 48 : i32
    %235 = vector.broadcast %c48_i32_63 : i32 to vector<16x128xi32>
    %236 = arith.addi %197, %235 : vector<16x128xi32>
    %237 = arith.cmpi eq, %178, %236 : vector<16x128xi32>
    %238 = arith.extui %237 : vector<16x128xi1> to vector<16x128xi32>
    %239 = arith.sitofp %238 : vector<16x128xi32> to vector<16x128xf32>
    %240 = arith.addf %234, %239 : vector<16x128xf32>
    %c56_i32_64 = arith.constant 56 : i32
    %241 = vector.broadcast %c56_i32_64 : i32 to vector<16x128xi32>
    %242 = arith.addi %197, %241 : vector<16x128xi32>
    %243 = arith.cmpi eq, %178, %242 : vector<16x128xi32>
    %244 = arith.extui %243 : vector<16x128xi1> to vector<16x128xi32>
    %245 = arith.sitofp %244 : vector<16x128xi32> to vector<16x128xf32>
    %246 = arith.addf %240, %245 : vector<16x128xf32>
    %247 = tpu.iota {dimensions = array<i32: 1>} : vector<1x128xi32>
    %c0_i32_65 = arith.constant 0 : i32
    %248 = vector.broadcast %c0_i32_65 : i32 to vector<1x128xi32>
    %c0_i32_66 = arith.constant 0 : i32
    %249 = vector.broadcast %c0_i32_66 : i32 to vector<1x128xi32>
    %250 = arith.cmpi sge, %247, %249 : vector<1x128xi32>
    %c8_i32_67 = arith.constant 8 : i32
    %251 = vector.broadcast %c8_i32_67 : i32 to vector<1x128xi32>
    %252 = arith.cmpi slt, %247, %251 : vector<1x128xi32>
    %253 = arith.andi %250, %252 : vector<1x128xi1>
    %c1_i32_68 = arith.constant 1 : i32
    %254 = vector.broadcast %c1_i32_68 : i32 to vector<1x128xi32>
    %255 = arith.select %253, %254, %248 : vector<1x128xi1>, vector<1x128xi32>
    %c64_i32_69 = arith.constant 64 : i32
    %256 = vector.broadcast %c64_i32_69 : i32 to vector<1x128xi32>
    %257 = arith.cmpi sge, %247, %256 : vector<1x128xi32>
    %c72_i32 = arith.constant 72 : i32
    %258 = vector.broadcast %c72_i32 : i32 to vector<1x128xi32>
    %259 = arith.cmpi slt, %247, %258 : vector<1x128xi32>
    %260 = arith.andi %257, %259 : vector<1x128xi1>
    %c1_i32_70 = arith.constant 1 : i32
    %261 = vector.broadcast %c1_i32_70 : i32 to vector<1x128xi32>
    %262 = arith.select %260, %261, %255 : vector<1x128xi1>, vector<1x128xi32>
    %c0_i32_71 = arith.constant 0 : i32
    %263 = vector.broadcast %c0_i32_71 : i32 to vector<1x128xi32>
    %264 = arith.cmpi eq, %262, %263 : vector<1x128xi32>
    %265 = arith.extui %264 : vector<1x128xi1> to vector<1x128xi32>
    %266 = arith.sitofp %265 : vector<1x128xi32> to vector<1x128xf32>
    %c0_72 = arith.constant 0 : index
    %c0_73 = arith.constant 0 : index
    %c0_74 = arith.constant 0 : index
    %267 = vector.load %arg3[%c0_72, %c0_73, %c0_74] : memref<4x32x192xf32, #tpu.memory_space<vmem>>, vector<1x32x192xf32>
    %268 = vector.shape_cast %267 : vector<1x32x192xf32> to vector<32x192xf32>
    %c0_75 = arith.constant 0 : index
    %c0_76 = arith.constant 0 : index
    %c0_77 = arith.constant 0 : index
    %269 = vector.load %arg5[%c0_75, %c0_76, %c0_77] : memref<4x4x128xf32, #tpu.memory_space<vmem>>, vector<1x4x128xf32>
    %270 = vector.shape_cast %269 : vector<1x4x128xf32> to vector<4x128xf32>
    %271 = vector.extract_strided_slice %270 {offsets = [0, 0], sizes = [1, 128], strides = [1, 1]} : vector<4x128xf32> to vector<1x128xf32>
    %272 = vector.extract_strided_slice %270 {offsets = [1, 0], sizes = [1, 128], strides = [1, 1]} : vector<4x128xf32> to vector<1x128xf32>
    %273 = vector.extract_strided_slice %270 {offsets = [2, 0], sizes = [1, 128], strides = [1, 1]} : vector<4x128xf32> to vector<1x128xf32>
    %274 = vector.extract_strided_slice %268 {offsets = [0, 0], sizes = [32, 96], strides = [1, 1]} : vector<32x192xf32> to vector<32x96xf32>
    %cst_78 = arith.constant dense<0.000000e+00> : vector<16x96xf32>
    %275 = tpu.matmul %0, %274, %cst_78 {dimension_numbers = #tpu.dot_dimension_numbers<[1], [0], [0], [1], [0, 0, 1, 1], [], []>} : vector<16x32xf32>, vector<32x96xf32>, vector<16x96xf32> -> vector<16x96xf32>
    %276 = vector.extract_strided_slice %271 {offsets = [0, 0], sizes = [1, 96], strides = [1, 1]} : vector<1x128xf32> to vector<1x96xf32>
    %277 = vector.broadcast %276 : vector<1x96xf32> to vector<16x96xf32>
    %278 = arith.addf %275, %277 : vector<16x96xf32>
    %279 = vector.extract_strided_slice %278 {offsets = [0, 0], sizes = [16, 32], strides = [1, 1]} : vector<16x96xf32> to vector<16x32xf32>
    %280 = vector.extract_strided_slice %278 {offsets = [0, 32], sizes = [16, 32], strides = [1, 1]} : vector<16x96xf32> to vector<16x32xf32>
    %281 = vector.extract_strided_slice %278 {offsets = [0, 64], sizes = [16, 32], strides = [1, 1]} : vector<16x96xf32> to vector<16x32xf32>
    %cst_79 = arith.constant 0.353553385 : f32
    %282 = vector.broadcast %cst_79 : f32 to vector<16x32xf32>
    %283 = arith.mulf %279, %282 : vector<16x32xf32>
    %284 = tpu.concatenate %280, %280, %280, %280 in 0 : vector<16x32xf32>, vector<16x32xf32>, vector<16x32xf32>, vector<16x32xf32> -> vector<64x32xf32>
    %285 = arith.mulf %284, %26 : vector<64x32xf32>
    %286 = tpu.concatenate %281, %281, %281, %281 in 0 : vector<16x32xf32>, vector<16x32xf32>, vector<16x32xf32>, vector<16x32xf32> -> vector<64x32xf32>
    %287 = arith.mulf %286, %26 : vector<64x32xf32>
    %cst_80 = arith.constant dense<0.000000e+00> : vector<16x64xf32>
    %288 = tpu.matmul %283, %285, %cst_80 {dimension_numbers = #tpu.dot_dimension_numbers<[1], [1], [0], [0], [0, 0, 1, 0], [], []>} : vector<16x32xf32>, vector<64x32xf32>, vector<16x64xf32> -> vector<16x64xf32>
    %289 = arith.addf %288, %171 : vector<16x64xf32>
    %290 = vector.extract_strided_slice %289 {offsets = [0, 0], sizes = [16, 16], strides = [1, 1]} : vector<16x64xf32> to vector<16x16xf32>
    %cst_81 = arith.constant dense<0xFF800000> : vector<16xf32>
    %291 = vector.multi_reduction <maximumf>, %290, %cst_81 [1] : vector<16x16xf32> to vector<16xf32>
    %292 = vector.shape_cast %291 : vector<16xf32> to vector<16x1xf32>
    %293 = vector.extract_strided_slice %289 {offsets = [0, 16], sizes = [16, 16], strides = [1, 1]} : vector<16x64xf32> to vector<16x16xf32>
    %cst_82 = arith.constant dense<0xFF800000> : vector<16xf32>
    %294 = vector.multi_reduction <maximumf>, %293, %cst_82 [1] : vector<16x16xf32> to vector<16xf32>
    %295 = vector.shape_cast %294 : vector<16xf32> to vector<16x1xf32>
    %296 = vector.extract_strided_slice %289 {offsets = [0, 32], sizes = [16, 16], strides = [1, 1]} : vector<16x64xf32> to vector<16x16xf32>
    %cst_83 = arith.constant dense<0xFF800000> : vector<16xf32>
    %297 = vector.multi_reduction <maximumf>, %296, %cst_83 [1] : vector<16x16xf32> to vector<16xf32>
    %298 = vector.shape_cast %297 : vector<16xf32> to vector<16x1xf32>
    %299 = vector.extract_strided_slice %289 {offsets = [0, 48], sizes = [16, 16], strides = [1, 1]} : vector<16x64xf32> to vector<16x16xf32>
    %cst_84 = arith.constant dense<0xFF800000> : vector<16xf32>
    %300 = vector.multi_reduction <maximumf>, %299, %cst_84 [1] : vector<16x16xf32> to vector<16xf32>
    %301 = vector.shape_cast %300 : vector<16xf32> to vector<16x1xf32>
    %302 = vector.broadcast %292 : vector<16x1xf32> to vector<16x64xf32>
    %303 = vector.broadcast %34 : vector<1x64xf32> to vector<16x64xf32>
    %304 = arith.mulf %302, %303 : vector<16x64xf32>
    %cst_85 = arith.constant 0.000000e+00 : f32
    %305 = vector.broadcast %cst_85 : f32 to vector<16x64xf32>
    %306 = arith.addf %305, %304 : vector<16x64xf32>
    %307 = vector.broadcast %295 : vector<16x1xf32> to vector<16x64xf32>
    %308 = vector.broadcast %41 : vector<1x64xf32> to vector<16x64xf32>
    %309 = arith.mulf %307, %308 : vector<16x64xf32>
    %310 = arith.addf %306, %309 : vector<16x64xf32>
    %311 = vector.broadcast %298 : vector<16x1xf32> to vector<16x64xf32>
    %312 = vector.broadcast %48 : vector<1x64xf32> to vector<16x64xf32>
    %313 = arith.mulf %311, %312 : vector<16x64xf32>
    %314 = arith.addf %310, %313 : vector<16x64xf32>
    %315 = vector.broadcast %301 : vector<16x1xf32> to vector<16x64xf32>
    %316 = vector.broadcast %55 : vector<1x64xf32> to vector<16x64xf32>
    %317 = arith.mulf %315, %316 : vector<16x64xf32>
    %318 = arith.addf %314, %317 : vector<16x64xf32>
    %319 = arith.subf %289, %318 : vector<16x64xf32>
    %320 = math.exp %319 : vector<16x64xf32>
    %321 = vector.extract_strided_slice %320 {offsets = [0, 0], sizes = [16, 16], strides = [1, 1]} : vector<16x64xf32> to vector<16x16xf32>
    %cst_86 = arith.constant dense<0.000000e+00> : vector<16xf32>
    %322 = vector.multi_reduction <add>, %321, %cst_86 [1] : vector<16x16xf32> to vector<16xf32>
    %323 = vector.shape_cast %322 : vector<16xf32> to vector<16x1xf32>
    %324 = vector.extract_strided_slice %320 {offsets = [0, 16], sizes = [16, 16], strides = [1, 1]} : vector<16x64xf32> to vector<16x16xf32>
    %cst_87 = arith.constant dense<0.000000e+00> : vector<16xf32>
    %325 = vector.multi_reduction <add>, %324, %cst_87 [1] : vector<16x16xf32> to vector<16xf32>
    %326 = vector.shape_cast %325 : vector<16xf32> to vector<16x1xf32>
    %327 = vector.extract_strided_slice %320 {offsets = [0, 32], sizes = [16, 16], strides = [1, 1]} : vector<16x64xf32> to vector<16x16xf32>
    %cst_88 = arith.constant dense<0.000000e+00> : vector<16xf32>
    %328 = vector.multi_reduction <add>, %327, %cst_88 [1] : vector<16x16xf32> to vector<16xf32>
    %329 = vector.shape_cast %328 : vector<16xf32> to vector<16x1xf32>
    %330 = vector.extract_strided_slice %320 {offsets = [0, 48], sizes = [16, 16], strides = [1, 1]} : vector<16x64xf32> to vector<16x16xf32>
    %cst_89 = arith.constant dense<0.000000e+00> : vector<16xf32>
    %331 = vector.multi_reduction <add>, %330, %cst_89 [1] : vector<16x16xf32> to vector<16xf32>
    %332 = vector.shape_cast %331 : vector<16xf32> to vector<16x1xf32>
    %333 = vector.broadcast %323 : vector<16x1xf32> to vector<16x64xf32>
    %334 = vector.broadcast %34 : vector<1x64xf32> to vector<16x64xf32>
    %335 = arith.mulf %333, %334 : vector<16x64xf32>
    %cst_90 = arith.constant 0.000000e+00 : f32
    %336 = vector.broadcast %cst_90 : f32 to vector<16x64xf32>
    %337 = arith.addf %336, %335 : vector<16x64xf32>
    %338 = vector.broadcast %326 : vector<16x1xf32> to vector<16x64xf32>
    %339 = vector.broadcast %41 : vector<1x64xf32> to vector<16x64xf32>
    %340 = arith.mulf %338, %339 : vector<16x64xf32>
    %341 = arith.addf %337, %340 : vector<16x64xf32>
    %342 = vector.broadcast %329 : vector<16x1xf32> to vector<16x64xf32>
    %343 = vector.broadcast %48 : vector<1x64xf32> to vector<16x64xf32>
    %344 = arith.mulf %342, %343 : vector<16x64xf32>
    %345 = arith.addf %341, %344 : vector<16x64xf32>
    %346 = vector.broadcast %332 : vector<16x1xf32> to vector<16x64xf32>
    %347 = vector.broadcast %55 : vector<1x64xf32> to vector<16x64xf32>
    %348 = arith.mulf %346, %347 : vector<16x64xf32>
    %349 = arith.addf %345, %348 : vector<16x64xf32>
    %350 = tpu.reciprocal %349 {approx = true} : vector<16x64xf32> -> vector<16x64xf32>
    %351 = arith.mulf %320, %350 : vector<16x64xf32>
    %cst_91 = arith.constant dense<0.000000e+00> : vector<16x32xf32>
    %352 = tpu.matmul %351, %287, %cst_91 {dimension_numbers = #tpu.dot_dimension_numbers<[1], [0], [0], [1], [0, 0, 1, 1], [], []>} : vector<16x64xf32>, vector<64x32xf32>, vector<16x32xf32> -> vector<16x32xf32>
    %353 = vector.extract_strided_slice %268 {offsets = [0, 96], sizes = [32, 32], strides = [1, 1]} : vector<32x192xf32> to vector<32x32xf32>
    %cst_92 = arith.constant dense<0.000000e+00> : vector<16x32xf32>
    %354 = tpu.matmul %352, %353, %cst_92 {dimension_numbers = #tpu.dot_dimension_numbers<[1], [0], [0], [1], [0, 0, 1, 1], [], []>} : vector<16x32xf32>, vector<32x32xf32>, vector<16x32xf32> -> vector<16x32xf32>
    %355 = vector.extract_strided_slice %271 {offsets = [0, 96], sizes = [1, 32], strides = [1, 1]} : vector<1x128xf32> to vector<1x32xf32>
    %356 = vector.broadcast %355 : vector<1x32xf32> to vector<16x32xf32>
    %357 = arith.addf %354, %356 : vector<16x32xf32>
    %358 = arith.addf %0, %357 : vector<16x32xf32>
    %359 = vector.extract_strided_slice %273 {offsets = [0, 0], sizes = [1, 32], strides = [1, 1]} : vector<1x128xf32> to vector<1x32xf32>
    %360 = vector.extract_strided_slice %273 {offsets = [0, 32], sizes = [1, 32], strides = [1, 1]} : vector<1x128xf32> to vector<1x32xf32>
    %cst_93 = arith.constant dense<0.000000e+00> : vector<16xf32>
    %361 = vector.multi_reduction <add>, %358, %cst_93 [1] : vector<16x32xf32> to vector<16xf32>
    %362 = vector.shape_cast %361 : vector<16xf32> to vector<16x1xf32>
    %cst_94 = arith.constant 3.200000e+01 : f32
    %363 = vector.broadcast %cst_94 : f32 to vector<16x1xf32>
    %364 = arith.divf %362, %363 : vector<16x1xf32>
    %365 = vector.broadcast %364 : vector<16x1xf32> to vector<16x32xf32>
    %366 = arith.subf %358, %365 : vector<16x32xf32>
    %367 = arith.mulf %366, %366 : vector<16x32xf32>
    %cst_95 = arith.constant dense<0.000000e+00> : vector<16xf32>
    %368 = vector.multi_reduction <add>, %367, %cst_95 [1] : vector<16x32xf32> to vector<16xf32>
    %369 = vector.shape_cast %368 : vector<16xf32> to vector<16x1xf32>
    %cst_96 = arith.constant 3.200000e+01 : f32
    %370 = vector.broadcast %cst_96 : f32 to vector<16x1xf32>
    %371 = arith.divf %369, %370 : vector<16x1xf32>
    %372 = vector.broadcast %364 : vector<16x1xf32> to vector<16x32xf32>
    %373 = arith.subf %358, %372 : vector<16x32xf32>
    %cst_97 = arith.constant 9.99999974E-6 : f32
    %374 = vector.broadcast %cst_97 : f32 to vector<16x1xf32>
    %375 = arith.addf %371, %374 : vector<16x1xf32>
    %376 = math.rsqrt %375 : vector<16x1xf32>
    %377 = vector.broadcast %376 : vector<16x1xf32> to vector<16x32xf32>
    %378 = arith.mulf %373, %377 : vector<16x32xf32>
    %379 = vector.broadcast %359 : vector<1x32xf32> to vector<16x32xf32>
    %380 = arith.mulf %378, %379 : vector<16x32xf32>
    %381 = vector.broadcast %360 : vector<1x32xf32> to vector<16x32xf32>
    %382 = arith.addf %380, %381 : vector<16x32xf32>
    %383 = vector.extract_strided_slice %268 {offsets = [0, 128], sizes = [32, 64], strides = [1, 1]} : vector<32x192xf32> to vector<32x64xf32>
    %cst_98 = arith.constant dense<0.000000e+00> : vector<16x64xf32>
    %384 = tpu.matmul %382, %383, %cst_98 {dimension_numbers = #tpu.dot_dimension_numbers<[1], [0], [0], [1], [0, 0, 1, 1], [], []>} : vector<16x32xf32>, vector<32x64xf32>, vector<16x64xf32> -> vector<16x64xf32>
    %385 = vector.extract_strided_slice %272 {offsets = [0, 0], sizes = [1, 64], strides = [1, 1]} : vector<1x128xf32> to vector<1x64xf32>
    %386 = vector.broadcast %385 : vector<1x64xf32> to vector<16x64xf32>
    %387 = arith.addf %384, %386 : vector<16x64xf32>
    %cst_99 = arith.constant 5.000000e-01 : f32
    %388 = vector.broadcast %cst_99 : f32 to vector<16x64xf32>
    %389 = arith.mulf %388, %387 : vector<16x64xf32>
    %cst_100 = arith.constant 4.471500e-02 : f32
    %390 = vector.broadcast %cst_100 : f32 to vector<16x64xf32>
    %391 = arith.mulf %390, %387 : vector<16x64xf32>
    %392 = arith.mulf %391, %387 : vector<16x64xf32>
    %393 = arith.mulf %392, %387 : vector<16x64xf32>
    %394 = arith.addf %387, %393 : vector<16x64xf32>
    %cst_101 = arith.constant 0.797884583 : f32
    %395 = vector.broadcast %cst_101 : f32 to vector<16x64xf32>
    %396 = arith.mulf %395, %394 : vector<16x64xf32>
    %397 = math.tanh %396 : vector<16x64xf32>
    %cst_102 = arith.constant 1.000000e+00 : f32
    %398 = vector.broadcast %cst_102 : f32 to vector<16x64xf32>
    %399 = arith.addf %398, %397 : vector<16x64xf32>
    %400 = arith.mulf %389, %399 : vector<16x64xf32>
    %c0_103 = arith.constant 0 : index
    %c0_104 = arith.constant 0 : index
    %c0_105 = arith.constant 0 : index
    %401 = vector.load %arg4[%c0_103, %c0_104, %c0_105] : memref<4x64x32xf32, #tpu.memory_space<vmem>>, vector<1x64x32xf32>
    %402 = vector.shape_cast %401 : vector<1x64x32xf32> to vector<64x32xf32>
    %cst_106 = arith.constant dense<0.000000e+00> : vector<16x32xf32>
    %403 = tpu.matmul %400, %402, %cst_106 {dimension_numbers = #tpu.dot_dimension_numbers<[1], [0], [0], [1], [0, 0, 1, 1], [], []>} : vector<16x64xf32>, vector<64x32xf32>, vector<16x32xf32> -> vector<16x32xf32>
    %404 = vector.extract_strided_slice %272 {offsets = [0, 64], sizes = [1, 32], strides = [1, 1]} : vector<1x128xf32> to vector<1x32xf32>
    %405 = vector.broadcast %404 : vector<1x32xf32> to vector<16x32xf32>
    %406 = arith.addf %403, %405 : vector<16x32xf32>
    %407 = arith.addf %382, %406 : vector<16x32xf32>
    %408 = vector.extract_strided_slice %273 {offsets = [0, 64], sizes = [1, 32], strides = [1, 1]} : vector<1x128xf32> to vector<1x32xf32>
    %409 = vector.extract_strided_slice %273 {offsets = [0, 96], sizes = [1, 32], strides = [1, 1]} : vector<1x128xf32> to vector<1x32xf32>
    %cst_107 = arith.constant dense<0.000000e+00> : vector<16xf32>
    %410 = vector.multi_reduction <add>, %407, %cst_107 [1] : vector<16x32xf32> to vector<16xf32>
    %411 = vector.shape_cast %410 : vector<16xf32> to vector<16x1xf32>
    %cst_108 = arith.constant 3.200000e+01 : f32
    %412 = vector.broadcast %cst_108 : f32 to vector<16x1xf32>
    %413 = arith.divf %411, %412 : vector<16x1xf32>
    %414 = vector.broadcast %413 : vector<16x1xf32> to vector<16x32xf32>
    %415 = arith.subf %407, %414 : vector<16x32xf32>
    %416 = arith.mulf %415, %415 : vector<16x32xf32>
    %cst_109 = arith.constant dense<0.000000e+00> : vector<16xf32>
    %417 = vector.multi_reduction <add>, %416, %cst_109 [1] : vector<16x32xf32> to vector<16xf32>
    %418 = vector.shape_cast %417 : vector<16xf32> to vector<16x1xf32>
    %cst_110 = arith.constant 3.200000e+01 : f32
    %419 = vector.broadcast %cst_110 : f32 to vector<16x1xf32>
    %420 = arith.divf %418, %419 : vector<16x1xf32>
    %421 = vector.broadcast %413 : vector<16x1xf32> to vector<16x32xf32>
    %422 = arith.subf %407, %421 : vector<16x32xf32>
    %cst_111 = arith.constant 9.99999974E-6 : f32
    %423 = vector.broadcast %cst_111 : f32 to vector<16x1xf32>
    %424 = arith.addf %420, %423 : vector<16x1xf32>
    %425 = math.rsqrt %424 : vector<16x1xf32>
    %426 = vector.broadcast %425 : vector<16x1xf32> to vector<16x32xf32>
    %427 = arith.mulf %422, %426 : vector<16x32xf32>
    %428 = vector.broadcast %408 : vector<1x32xf32> to vector<16x32xf32>
    %429 = arith.mulf %427, %428 : vector<16x32xf32>
    %430 = vector.broadcast %409 : vector<1x32xf32> to vector<16x32xf32>
    %431 = arith.addf %429, %430 : vector<16x32xf32>
    %c1_112 = arith.constant 1 : index
    %c0_113 = arith.constant 0 : index
    %c0_114 = arith.constant 0 : index
    %432 = vector.load %arg3[%c1_112, %c0_113, %c0_114] : memref<4x32x192xf32, #tpu.memory_space<vmem>>, vector<1x32x192xf32>
    %433 = vector.shape_cast %432 : vector<1x32x192xf32> to vector<32x192xf32>
    %c1_115 = arith.constant 1 : index
    %c0_116 = arith.constant 0 : index
    %c0_117 = arith.constant 0 : index
    %434 = vector.load %arg5[%c1_115, %c0_116, %c0_117] : memref<4x4x128xf32, #tpu.memory_space<vmem>>, vector<1x4x128xf32>
    %435 = vector.shape_cast %434 : vector<1x4x128xf32> to vector<4x128xf32>
    %436 = vector.extract_strided_slice %435 {offsets = [0, 0], sizes = [1, 128], strides = [1, 1]} : vector<4x128xf32> to vector<1x128xf32>
    %437 = vector.extract_strided_slice %435 {offsets = [1, 0], sizes = [1, 128], strides = [1, 1]} : vector<4x128xf32> to vector<1x128xf32>
    %438 = vector.extract_strided_slice %435 {offsets = [2, 0], sizes = [1, 128], strides = [1, 1]} : vector<4x128xf32> to vector<1x128xf32>
    %439 = vector.extract_strided_slice %433 {offsets = [0, 0], sizes = [32, 96], strides = [1, 1]} : vector<32x192xf32> to vector<32x96xf32>
    %cst_118 = arith.constant dense<0.000000e+00> : vector<16x96xf32>
    %440 = tpu.matmul %431, %439, %cst_118 {dimension_numbers = #tpu.dot_dimension_numbers<[1], [0], [0], [1], [0, 0, 1, 1], [], []>} : vector<16x32xf32>, vector<32x96xf32>, vector<16x96xf32> -> vector<16x96xf32>
    %441 = vector.extract_strided_slice %436 {offsets = [0, 0], sizes = [1, 96], strides = [1, 1]} : vector<1x128xf32> to vector<1x96xf32>
    %442 = vector.broadcast %441 : vector<1x96xf32> to vector<16x96xf32>
    %443 = arith.addf %440, %442 : vector<16x96xf32>
    %444 = vector.extract_strided_slice %443 {offsets = [0, 0], sizes = [16, 32], strides = [1, 1]} : vector<16x96xf32> to vector<16x32xf32>
    %445 = vector.extract_strided_slice %443 {offsets = [0, 32], sizes = [16, 32], strides = [1, 1]} : vector<16x96xf32> to vector<16x32xf32>
    %446 = vector.extract_strided_slice %443 {offsets = [0, 64], sizes = [16, 32], strides = [1, 1]} : vector<16x96xf32> to vector<16x32xf32>
    %cst_119 = arith.constant 0.353553385 : f32
    %447 = vector.broadcast %cst_119 : f32 to vector<16x32xf32>
    %448 = arith.mulf %444, %447 : vector<16x32xf32>
    %449 = tpu.concatenate %445, %445, %445, %445 in 0 : vector<16x32xf32>, vector<16x32xf32>, vector<16x32xf32>, vector<16x32xf32> -> vector<64x32xf32>
    %450 = arith.mulf %449, %26 : vector<64x32xf32>
    %451 = tpu.concatenate %446, %446, %446, %446 in 0 : vector<16x32xf32>, vector<16x32xf32>, vector<16x32xf32>, vector<16x32xf32> -> vector<64x32xf32>
    %452 = arith.mulf %451, %26 : vector<64x32xf32>
    %cst_120 = arith.constant dense<0.000000e+00> : vector<16x64xf32>
    %453 = tpu.matmul %448, %450, %cst_120 {dimension_numbers = #tpu.dot_dimension_numbers<[1], [1], [0], [0], [0, 0, 1, 0], [], []>} : vector<16x32xf32>, vector<64x32xf32>, vector<16x64xf32> -> vector<16x64xf32>
    %454 = arith.addf %453, %171 : vector<16x64xf32>
    %455 = vector.extract_strided_slice %454 {offsets = [0, 0], sizes = [16, 16], strides = [1, 1]} : vector<16x64xf32> to vector<16x16xf32>
    %cst_121 = arith.constant dense<0xFF800000> : vector<16xf32>
    %456 = vector.multi_reduction <maximumf>, %455, %cst_121 [1] : vector<16x16xf32> to vector<16xf32>
    %457 = vector.shape_cast %456 : vector<16xf32> to vector<16x1xf32>
    %458 = vector.extract_strided_slice %454 {offsets = [0, 16], sizes = [16, 16], strides = [1, 1]} : vector<16x64xf32> to vector<16x16xf32>
    %cst_122 = arith.constant dense<0xFF800000> : vector<16xf32>
    %459 = vector.multi_reduction <maximumf>, %458, %cst_122 [1] : vector<16x16xf32> to vector<16xf32>
    %460 = vector.shape_cast %459 : vector<16xf32> to vector<16x1xf32>
    %461 = vector.extract_strided_slice %454 {offsets = [0, 32], sizes = [16, 16], strides = [1, 1]} : vector<16x64xf32> to vector<16x16xf32>
    %cst_123 = arith.constant dense<0xFF800000> : vector<16xf32>
    %462 = vector.multi_reduction <maximumf>, %461, %cst_123 [1] : vector<16x16xf32> to vector<16xf32>
    %463 = vector.shape_cast %462 : vector<16xf32> to vector<16x1xf32>
    %464 = vector.extract_strided_slice %454 {offsets = [0, 48], sizes = [16, 16], strides = [1, 1]} : vector<16x64xf32> to vector<16x16xf32>
    %cst_124 = arith.constant dense<0xFF800000> : vector<16xf32>
    %465 = vector.multi_reduction <maximumf>, %464, %cst_124 [1] : vector<16x16xf32> to vector<16xf32>
    %466 = vector.shape_cast %465 : vector<16xf32> to vector<16x1xf32>
    %467 = vector.broadcast %457 : vector<16x1xf32> to vector<16x64xf32>
    %468 = vector.broadcast %34 : vector<1x64xf32> to vector<16x64xf32>
    %469 = arith.mulf %467, %468 : vector<16x64xf32>
    %cst_125 = arith.constant 0.000000e+00 : f32
    %470 = vector.broadcast %cst_125 : f32 to vector<16x64xf32>
    %471 = arith.addf %470, %469 : vector<16x64xf32>
    %472 = vector.broadcast %460 : vector<16x1xf32> to vector<16x64xf32>
    %473 = vector.broadcast %41 : vector<1x64xf32> to vector<16x64xf32>
    %474 = arith.mulf %472, %473 : vector<16x64xf32>
    %475 = arith.addf %471, %474 : vector<16x64xf32>
    %476 = vector.broadcast %463 : vector<16x1xf32> to vector<16x64xf32>
    %477 = vector.broadcast %48 : vector<1x64xf32> to vector<16x64xf32>
    %478 = arith.mulf %476, %477 : vector<16x64xf32>
    %479 = arith.addf %475, %478 : vector<16x64xf32>
    %480 = vector.broadcast %466 : vector<16x1xf32> to vector<16x64xf32>
    %481 = vector.broadcast %55 : vector<1x64xf32> to vector<16x64xf32>
    %482 = arith.mulf %480, %481 : vector<16x64xf32>
    %483 = arith.addf %479, %482 : vector<16x64xf32>
    %484 = arith.subf %454, %483 : vector<16x64xf32>
    %485 = math.exp %484 : vector<16x64xf32>
    %486 = vector.extract_strided_slice %485 {offsets = [0, 0], sizes = [16, 16], strides = [1, 1]} : vector<16x64xf32> to vector<16x16xf32>
    %cst_126 = arith.constant dense<0.000000e+00> : vector<16xf32>
    %487 = vector.multi_reduction <add>, %486, %cst_126 [1] : vector<16x16xf32> to vector<16xf32>
    %488 = vector.shape_cast %487 : vector<16xf32> to vector<16x1xf32>
    %489 = vector.extract_strided_slice %485 {offsets = [0, 16], sizes = [16, 16], strides = [1, 1]} : vector<16x64xf32> to vector<16x16xf32>
    %cst_127 = arith.constant dense<0.000000e+00> : vector<16xf32>
    %490 = vector.multi_reduction <add>, %489, %cst_127 [1] : vector<16x16xf32> to vector<16xf32>
    %491 = vector.shape_cast %490 : vector<16xf32> to vector<16x1xf32>
    %492 = vector.extract_strided_slice %485 {offsets = [0, 32], sizes = [16, 16], strides = [1, 1]} : vector<16x64xf32> to vector<16x16xf32>
    %cst_128 = arith.constant dense<0.000000e+00> : vector<16xf32>
    %493 = vector.multi_reduction <add>, %492, %cst_128 [1] : vector<16x16xf32> to vector<16xf32>
    %494 = vector.shape_cast %493 : vector<16xf32> to vector<16x1xf32>
    %495 = vector.extract_strided_slice %485 {offsets = [0, 48], sizes = [16, 16], strides = [1, 1]} : vector<16x64xf32> to vector<16x16xf32>
    %cst_129 = arith.constant dense<0.000000e+00> : vector<16xf32>
    %496 = vector.multi_reduction <add>, %495, %cst_129 [1] : vector<16x16xf32> to vector<16xf32>
    %497 = vector.shape_cast %496 : vector<16xf32> to vector<16x1xf32>
    %498 = vector.broadcast %488 : vector<16x1xf32> to vector<16x64xf32>
    %499 = vector.broadcast %34 : vector<1x64xf32> to vector<16x64xf32>
    %500 = arith.mulf %498, %499 : vector<16x64xf32>
    %cst_130 = arith.constant 0.000000e+00 : f32
    %501 = vector.broadcast %cst_130 : f32 to vector<16x64xf32>
    %502 = arith.addf %501, %500 : vector<16x64xf32>
    %503 = vector.broadcast %491 : vector<16x1xf32> to vector<16x64xf32>
    %504 = vector.broadcast %41 : vector<1x64xf32> to vector<16x64xf32>
    %505 = arith.mulf %503, %504 : vector<16x64xf32>
    %506 = arith.addf %502, %505 : vector<16x64xf32>
    %507 = vector.broadcast %494 : vector<16x1xf32> to vector<16x64xf32>
    %508 = vector.broadcast %48 : vector<1x64xf32> to vector<16x64xf32>
    %509 = arith.mulf %507, %508 : vector<16x64xf32>
    %510 = arith.addf %506, %509 : vector<16x64xf32>
    %511 = vector.broadcast %497 : vector<16x1xf32> to vector<16x64xf32>
    %512 = vector.broadcast %55 : vector<1x64xf32> to vector<16x64xf32>
    %513 = arith.mulf %511, %512 : vector<16x64xf32>
    %514 = arith.addf %510, %513 : vector<16x64xf32>
    %515 = tpu.reciprocal %514 {approx = true} : vector<16x64xf32> -> vector<16x64xf32>
    %516 = arith.mulf %485, %515 : vector<16x64xf32>
    %cst_131 = arith.constant dense<0.000000e+00> : vector<16x32xf32>
    %517 = tpu.matmul %516, %452, %cst_131 {dimension_numbers = #tpu.dot_dimension_numbers<[1], [0], [0], [1], [0, 0, 1, 1], [], []>} : vector<16x64xf32>, vector<64x32xf32>, vector<16x32xf32> -> vector<16x32xf32>
    %518 = vector.extract_strided_slice %433 {offsets = [0, 96], sizes = [32, 32], strides = [1, 1]} : vector<32x192xf32> to vector<32x32xf32>
    %cst_132 = arith.constant dense<0.000000e+00> : vector<16x32xf32>
    %519 = tpu.matmul %517, %518, %cst_132 {dimension_numbers = #tpu.dot_dimension_numbers<[1], [0], [0], [1], [0, 0, 1, 1], [], []>} : vector<16x32xf32>, vector<32x32xf32>, vector<16x32xf32> -> vector<16x32xf32>
    %520 = vector.extract_strided_slice %436 {offsets = [0, 96], sizes = [1, 32], strides = [1, 1]} : vector<1x128xf32> to vector<1x32xf32>
    %521 = vector.broadcast %520 : vector<1x32xf32> to vector<16x32xf32>
    %522 = arith.addf %519, %521 : vector<16x32xf32>
    %523 = arith.addf %431, %522 : vector<16x32xf32>
    %524 = vector.extract_strided_slice %438 {offsets = [0, 0], sizes = [1, 32], strides = [1, 1]} : vector<1x128xf32> to vector<1x32xf32>
    %525 = vector.extract_strided_slice %438 {offsets = [0, 32], sizes = [1, 32], strides = [1, 1]} : vector<1x128xf32> to vector<1x32xf32>
    %cst_133 = arith.constant dense<0.000000e+00> : vector<16xf32>
    %526 = vector.multi_reduction <add>, %523, %cst_133 [1] : vector<16x32xf32> to vector<16xf32>
    %527 = vector.shape_cast %526 : vector<16xf32> to vector<16x1xf32>
    %cst_134 = arith.constant 3.200000e+01 : f32
    %528 = vector.broadcast %cst_134 : f32 to vector<16x1xf32>
    %529 = arith.divf %527, %528 : vector<16x1xf32>
    %530 = vector.broadcast %529 : vector<16x1xf32> to vector<16x32xf32>
    %531 = arith.subf %523, %530 : vector<16x32xf32>
    %532 = arith.mulf %531, %531 : vector<16x32xf32>
    %cst_135 = arith.constant dense<0.000000e+00> : vector<16xf32>
    %533 = vector.multi_reduction <add>, %532, %cst_135 [1] : vector<16x32xf32> to vector<16xf32>
    %534 = vector.shape_cast %533 : vector<16xf32> to vector<16x1xf32>
    %cst_136 = arith.constant 3.200000e+01 : f32
    %535 = vector.broadcast %cst_136 : f32 to vector<16x1xf32>
    %536 = arith.divf %534, %535 : vector<16x1xf32>
    %537 = vector.broadcast %529 : vector<16x1xf32> to vector<16x32xf32>
    %538 = arith.subf %523, %537 : vector<16x32xf32>
    %cst_137 = arith.constant 9.99999974E-6 : f32
    %539 = vector.broadcast %cst_137 : f32 to vector<16x1xf32>
    %540 = arith.addf %536, %539 : vector<16x1xf32>
    %541 = math.rsqrt %540 : vector<16x1xf32>
    %542 = vector.broadcast %541 : vector<16x1xf32> to vector<16x32xf32>
    %543 = arith.mulf %538, %542 : vector<16x32xf32>
    %544 = vector.broadcast %524 : vector<1x32xf32> to vector<16x32xf32>
    %545 = arith.mulf %543, %544 : vector<16x32xf32>
    %546 = vector.broadcast %525 : vector<1x32xf32> to vector<16x32xf32>
    %547 = arith.addf %545, %546 : vector<16x32xf32>
    %548 = vector.extract_strided_slice %433 {offsets = [0, 128], sizes = [32, 64], strides = [1, 1]} : vector<32x192xf32> to vector<32x64xf32>
    %cst_138 = arith.constant dense<0.000000e+00> : vector<16x64xf32>
    %549 = tpu.matmul %547, %548, %cst_138 {dimension_numbers = #tpu.dot_dimension_numbers<[1], [0], [0], [1], [0, 0, 1, 1], [], []>} : vector<16x32xf32>, vector<32x64xf32>, vector<16x64xf32> -> vector<16x64xf32>
    %550 = vector.extract_strided_slice %437 {offsets = [0, 0], sizes = [1, 64], strides = [1, 1]} : vector<1x128xf32> to vector<1x64xf32>
    %551 = vector.broadcast %550 : vector<1x64xf32> to vector<16x64xf32>
    %552 = arith.addf %549, %551 : vector<16x64xf32>
    %cst_139 = arith.constant 5.000000e-01 : f32
    %553 = vector.broadcast %cst_139 : f32 to vector<16x64xf32>
    %554 = arith.mulf %553, %552 : vector<16x64xf32>
    %cst_140 = arith.constant 4.471500e-02 : f32
    %555 = vector.broadcast %cst_140 : f32 to vector<16x64xf32>
    %556 = arith.mulf %555, %552 : vector<16x64xf32>
    %557 = arith.mulf %556, %552 : vector<16x64xf32>
    %558 = arith.mulf %557, %552 : vector<16x64xf32>
    %559 = arith.addf %552, %558 : vector<16x64xf32>
    %cst_141 = arith.constant 0.797884583 : f32
    %560 = vector.broadcast %cst_141 : f32 to vector<16x64xf32>
    %561 = arith.mulf %560, %559 : vector<16x64xf32>
    %562 = math.tanh %561 : vector<16x64xf32>
    %cst_142 = arith.constant 1.000000e+00 : f32
    %563 = vector.broadcast %cst_142 : f32 to vector<16x64xf32>
    %564 = arith.addf %563, %562 : vector<16x64xf32>
    %565 = arith.mulf %554, %564 : vector<16x64xf32>
    %c1_143 = arith.constant 1 : index
    %c0_144 = arith.constant 0 : index
    %c0_145 = arith.constant 0 : index
    %566 = vector.load %arg4[%c1_143, %c0_144, %c0_145] : memref<4x64x32xf32, #tpu.memory_space<vmem>>, vector<1x64x32xf32>
    %567 = vector.shape_cast %566 : vector<1x64x32xf32> to vector<64x32xf32>
    %cst_146 = arith.constant dense<0.000000e+00> : vector<16x32xf32>
    %568 = tpu.matmul %565, %567, %cst_146 {dimension_numbers = #tpu.dot_dimension_numbers<[1], [0], [0], [1], [0, 0, 1, 1], [], []>} : vector<16x64xf32>, vector<64x32xf32>, vector<16x32xf32> -> vector<16x32xf32>
    %569 = vector.extract_strided_slice %437 {offsets = [0, 64], sizes = [1, 32], strides = [1, 1]} : vector<1x128xf32> to vector<1x32xf32>
    %570 = vector.broadcast %569 : vector<1x32xf32> to vector<16x32xf32>
    %571 = arith.addf %568, %570 : vector<16x32xf32>
    %572 = arith.addf %547, %571 : vector<16x32xf32>
    %573 = vector.extract_strided_slice %438 {offsets = [0, 64], sizes = [1, 32], strides = [1, 1]} : vector<1x128xf32> to vector<1x32xf32>
    %574 = vector.extract_strided_slice %438 {offsets = [0, 96], sizes = [1, 32], strides = [1, 1]} : vector<1x128xf32> to vector<1x32xf32>
    %cst_147 = arith.constant dense<0.000000e+00> : vector<16xf32>
    %575 = vector.multi_reduction <add>, %572, %cst_147 [1] : vector<16x32xf32> to vector<16xf32>
    %576 = vector.shape_cast %575 : vector<16xf32> to vector<16x1xf32>
    %cst_148 = arith.constant 3.200000e+01 : f32
    %577 = vector.broadcast %cst_148 : f32 to vector<16x1xf32>
    %578 = arith.divf %576, %577 : vector<16x1xf32>
    %579 = vector.broadcast %578 : vector<16x1xf32> to vector<16x32xf32>
    %580 = arith.subf %572, %579 : vector<16x32xf32>
    %581 = arith.mulf %580, %580 : vector<16x32xf32>
    %cst_149 = arith.constant dense<0.000000e+00> : vector<16xf32>
    %582 = vector.multi_reduction <add>, %581, %cst_149 [1] : vector<16x32xf32> to vector<16xf32>
    %583 = vector.shape_cast %582 : vector<16xf32> to vector<16x1xf32>
    %cst_150 = arith.constant 3.200000e+01 : f32
    %584 = vector.broadcast %cst_150 : f32 to vector<16x1xf32>
    %585 = arith.divf %583, %584 : vector<16x1xf32>
    %586 = vector.broadcast %578 : vector<16x1xf32> to vector<16x32xf32>
    %587 = arith.subf %572, %586 : vector<16x32xf32>
    %cst_151 = arith.constant 9.99999974E-6 : f32
    %588 = vector.broadcast %cst_151 : f32 to vector<16x1xf32>
    %589 = arith.addf %585, %588 : vector<16x1xf32>
    %590 = math.rsqrt %589 : vector<16x1xf32>
    %591 = vector.broadcast %590 : vector<16x1xf32> to vector<16x32xf32>
    %592 = arith.mulf %587, %591 : vector<16x32xf32>
    %593 = vector.broadcast %573 : vector<1x32xf32> to vector<16x32xf32>
    %594 = arith.mulf %592, %593 : vector<16x32xf32>
    %595 = vector.broadcast %574 : vector<1x32xf32> to vector<16x32xf32>
    %596 = arith.addf %594, %595 : vector<16x32xf32>
    %c2 = arith.constant 2 : index
    %c0_152 = arith.constant 0 : index
    %c0_153 = arith.constant 0 : index
    %597 = vector.load %arg3[%c2, %c0_152, %c0_153] : memref<4x32x192xf32, #tpu.memory_space<vmem>>, vector<1x32x192xf32>
    %598 = vector.shape_cast %597 : vector<1x32x192xf32> to vector<32x192xf32>
    %c2_154 = arith.constant 2 : index
    %c0_155 = arith.constant 0 : index
    %c0_156 = arith.constant 0 : index
    %599 = vector.load %arg5[%c2_154, %c0_155, %c0_156] : memref<4x4x128xf32, #tpu.memory_space<vmem>>, vector<1x4x128xf32>
    %600 = vector.shape_cast %599 : vector<1x4x128xf32> to vector<4x128xf32>
    %601 = vector.extract_strided_slice %600 {offsets = [0, 0], sizes = [1, 128], strides = [1, 1]} : vector<4x128xf32> to vector<1x128xf32>
    %602 = vector.extract_strided_slice %600 {offsets = [1, 0], sizes = [1, 128], strides = [1, 1]} : vector<4x128xf32> to vector<1x128xf32>
    %603 = vector.extract_strided_slice %600 {offsets = [2, 0], sizes = [1, 128], strides = [1, 1]} : vector<4x128xf32> to vector<1x128xf32>
    %604 = vector.extract_strided_slice %598 {offsets = [0, 0], sizes = [32, 32], strides = [1, 1]} : vector<32x192xf32> to vector<32x32xf32>
    %cst_157 = arith.constant dense<0.000000e+00> : vector<16x32xf32>
    %605 = tpu.matmul %0, %604, %cst_157 {dimension_numbers = #tpu.dot_dimension_numbers<[1], [0], [0], [1], [0, 0, 1, 1], [], []>} : vector<16x32xf32>, vector<32x32xf32>, vector<16x32xf32> -> vector<16x32xf32>
    %606 = vector.extract_strided_slice %601 {offsets = [0, 0], sizes = [1, 32], strides = [1, 1]} : vector<1x128xf32> to vector<1x32xf32>
    %607 = vector.broadcast %606 : vector<1x32xf32> to vector<16x32xf32>
    %608 = arith.addf %605, %607 : vector<16x32xf32>
    %609 = vector.extract_strided_slice %598 {offsets = [0, 32], sizes = [32, 64], strides = [1, 1]} : vector<32x192xf32> to vector<32x64xf32>
    %cst_158 = arith.constant dense<0.000000e+00> : vector<16x64xf32>
    %610 = tpu.matmul %596, %609, %cst_158 {dimension_numbers = #tpu.dot_dimension_numbers<[1], [0], [0], [1], [0, 0, 1, 1], [], []>} : vector<16x32xf32>, vector<32x64xf32>, vector<16x64xf32> -> vector<16x64xf32>
    %611 = vector.extract_strided_slice %601 {offsets = [0, 32], sizes = [1, 64], strides = [1, 1]} : vector<1x128xf32> to vector<1x64xf32>
    %612 = vector.broadcast %611 : vector<1x64xf32> to vector<16x64xf32>
    %613 = arith.addf %610, %612 : vector<16x64xf32>
    %614 = vector.extract_strided_slice %613 {offsets = [0, 0], sizes = [16, 32], strides = [1, 1]} : vector<16x64xf32> to vector<16x32xf32>
    %615 = vector.extract_strided_slice %613 {offsets = [0, 32], sizes = [16, 32], strides = [1, 1]} : vector<16x64xf32> to vector<16x32xf32>
    %cst_159 = arith.constant 0.353553385 : f32
    %616 = vector.broadcast %cst_159 : f32 to vector<16x32xf32>
    %617 = arith.mulf %608, %616 : vector<16x32xf32>
    %618 = tpu.concatenate %614, %614, %614, %614 in 0 : vector<16x32xf32>, vector<16x32xf32>, vector<16x32xf32>, vector<16x32xf32> -> vector<64x32xf32>
    %619 = arith.mulf %618, %26 : vector<64x32xf32>
    %620 = tpu.concatenate %615, %615, %615, %615 in 0 : vector<16x32xf32>, vector<16x32xf32>, vector<16x32xf32>, vector<16x32xf32> -> vector<64x32xf32>
    %621 = arith.mulf %620, %26 : vector<64x32xf32>
    %cst_160 = arith.constant dense<0.000000e+00> : vector<16x64xf32>
    %622 = tpu.matmul %617, %619, %cst_160 {dimension_numbers = #tpu.dot_dimension_numbers<[1], [1], [0], [0], [0, 0, 1, 0], [], []>} : vector<16x32xf32>, vector<64x32xf32>, vector<16x64xf32> -> vector<16x64xf32>
    %623 = arith.addf %622, %176 : vector<16x64xf32>
    %624 = vector.extract_strided_slice %623 {offsets = [0, 0], sizes = [16, 16], strides = [1, 1]} : vector<16x64xf32> to vector<16x16xf32>
    %cst_161 = arith.constant dense<0xFF800000> : vector<16xf32>
    %625 = vector.multi_reduction <maximumf>, %624, %cst_161 [1] : vector<16x16xf32> to vector<16xf32>
    %626 = vector.shape_cast %625 : vector<16xf32> to vector<16x1xf32>
    %627 = vector.extract_strided_slice %623 {offsets = [0, 16], sizes = [16, 16], strides = [1, 1]} : vector<16x64xf32> to vector<16x16xf32>
    %cst_162 = arith.constant dense<0xFF800000> : vector<16xf32>
    %628 = vector.multi_reduction <maximumf>, %627, %cst_162 [1] : vector<16x16xf32> to vector<16xf32>
    %629 = vector.shape_cast %628 : vector<16xf32> to vector<16x1xf32>
    %630 = vector.extract_strided_slice %623 {offsets = [0, 32], sizes = [16, 16], strides = [1, 1]} : vector<16x64xf32> to vector<16x16xf32>
    %cst_163 = arith.constant dense<0xFF800000> : vector<16xf32>
    %631 = vector.multi_reduction <maximumf>, %630, %cst_163 [1] : vector<16x16xf32> to vector<16xf32>
    %632 = vector.shape_cast %631 : vector<16xf32> to vector<16x1xf32>
    %633 = vector.extract_strided_slice %623 {offsets = [0, 48], sizes = [16, 16], strides = [1, 1]} : vector<16x64xf32> to vector<16x16xf32>
    %cst_164 = arith.constant dense<0xFF800000> : vector<16xf32>
    %634 = vector.multi_reduction <maximumf>, %633, %cst_164 [1] : vector<16x16xf32> to vector<16xf32>
    %635 = vector.shape_cast %634 : vector<16xf32> to vector<16x1xf32>
    %636 = vector.broadcast %626 : vector<16x1xf32> to vector<16x64xf32>
    %637 = vector.broadcast %34 : vector<1x64xf32> to vector<16x64xf32>
    %638 = arith.mulf %636, %637 : vector<16x64xf32>
    %cst_165 = arith.constant 0.000000e+00 : f32
    %639 = vector.broadcast %cst_165 : f32 to vector<16x64xf32>
    %640 = arith.addf %639, %638 : vector<16x64xf32>
    %641 = vector.broadcast %629 : vector<16x1xf32> to vector<16x64xf32>
    %642 = vector.broadcast %41 : vector<1x64xf32> to vector<16x64xf32>
    %643 = arith.mulf %641, %642 : vector<16x64xf32>
    %644 = arith.addf %640, %643 : vector<16x64xf32>
    %645 = vector.broadcast %632 : vector<16x1xf32> to vector<16x64xf32>
    %646 = vector.broadcast %48 : vector<1x64xf32> to vector<16x64xf32>
    %647 = arith.mulf %645, %646 : vector<16x64xf32>
    %648 = arith.addf %644, %647 : vector<16x64xf32>
    %649 = vector.broadcast %635 : vector<16x1xf32> to vector<16x64xf32>
    %650 = vector.broadcast %55 : vector<1x64xf32> to vector<16x64xf32>
    %651 = arith.mulf %649, %650 : vector<16x64xf32>
    %652 = arith.addf %648, %651 : vector<16x64xf32>
    %653 = arith.subf %623, %652 : vector<16x64xf32>
    %654 = math.exp %653 : vector<16x64xf32>
    %655 = vector.extract_strided_slice %654 {offsets = [0, 0], sizes = [16, 16], strides = [1, 1]} : vector<16x64xf32> to vector<16x16xf32>
    %cst_166 = arith.constant dense<0.000000e+00> : vector<16xf32>
    %656 = vector.multi_reduction <add>, %655, %cst_166 [1] : vector<16x16xf32> to vector<16xf32>
    %657 = vector.shape_cast %656 : vector<16xf32> to vector<16x1xf32>
    %658 = vector.extract_strided_slice %654 {offsets = [0, 16], sizes = [16, 16], strides = [1, 1]} : vector<16x64xf32> to vector<16x16xf32>
    %cst_167 = arith.constant dense<0.000000e+00> : vector<16xf32>
    %659 = vector.multi_reduction <add>, %658, %cst_167 [1] : vector<16x16xf32> to vector<16xf32>
    %660 = vector.shape_cast %659 : vector<16xf32> to vector<16x1xf32>
    %661 = vector.extract_strided_slice %654 {offsets = [0, 32], sizes = [16, 16], strides = [1, 1]} : vector<16x64xf32> to vector<16x16xf32>
    %cst_168 = arith.constant dense<0.000000e+00> : vector<16xf32>
    %662 = vector.multi_reduction <add>, %661, %cst_168 [1] : vector<16x16xf32> to vector<16xf32>
    %663 = vector.shape_cast %662 : vector<16xf32> to vector<16x1xf32>
    %664 = vector.extract_strided_slice %654 {offsets = [0, 48], sizes = [16, 16], strides = [1, 1]} : vector<16x64xf32> to vector<16x16xf32>
    %cst_169 = arith.constant dense<0.000000e+00> : vector<16xf32>
    %665 = vector.multi_reduction <add>, %664, %cst_169 [1] : vector<16x16xf32> to vector<16xf32>
    %666 = vector.shape_cast %665 : vector<16xf32> to vector<16x1xf32>
    %667 = vector.broadcast %657 : vector<16x1xf32> to vector<16x64xf32>
    %668 = vector.broadcast %34 : vector<1x64xf32> to vector<16x64xf32>
    %669 = arith.mulf %667, %668 : vector<16x64xf32>
    %cst_170 = arith.constant 0.000000e+00 : f32
    %670 = vector.broadcast %cst_170 : f32 to vector<16x64xf32>
    %671 = arith.addf %670, %669 : vector<16x64xf32>
    %672 = vector.broadcast %660 : vector<16x1xf32> to vector<16x64xf32>
    %673 = vector.broadcast %41 : vector<1x64xf32> to vector<16x64xf32>
    %674 = arith.mulf %672, %673 : vector<16x64xf32>
    %675 = arith.addf %671, %674 : vector<16x64xf32>
    %676 = vector.broadcast %663 : vector<16x1xf32> to vector<16x64xf32>
    %677 = vector.broadcast %48 : vector<1x64xf32> to vector<16x64xf32>
    %678 = arith.mulf %676, %677 : vector<16x64xf32>
    %679 = arith.addf %675, %678 : vector<16x64xf32>
    %680 = vector.broadcast %666 : vector<16x1xf32> to vector<16x64xf32>
    %681 = vector.broadcast %55 : vector<1x64xf32> to vector<16x64xf32>
    %682 = arith.mulf %680, %681 : vector<16x64xf32>
    %683 = arith.addf %679, %682 : vector<16x64xf32>
    %684 = tpu.reciprocal %683 {approx = true} : vector<16x64xf32> -> vector<16x64xf32>
    %685 = arith.mulf %654, %684 : vector<16x64xf32>
    %cst_171 = arith.constant dense<0.000000e+00> : vector<16x32xf32>
    %686 = tpu.matmul %685, %621, %cst_171 {dimension_numbers = #tpu.dot_dimension_numbers<[1], [0], [0], [1], [0, 0, 1, 1], [], []>} : vector<16x64xf32>, vector<64x32xf32>, vector<16x32xf32> -> vector<16x32xf32>
    %687 = vector.extract_strided_slice %598 {offsets = [0, 96], sizes = [32, 32], strides = [1, 1]} : vector<32x192xf32> to vector<32x32xf32>
    %cst_172 = arith.constant dense<0.000000e+00> : vector<16x32xf32>
    %688 = tpu.matmul %686, %687, %cst_172 {dimension_numbers = #tpu.dot_dimension_numbers<[1], [0], [0], [1], [0, 0, 1, 1], [], []>} : vector<16x32xf32>, vector<32x32xf32>, vector<16x32xf32> -> vector<16x32xf32>
    %689 = vector.extract_strided_slice %601 {offsets = [0, 96], sizes = [1, 32], strides = [1, 1]} : vector<1x128xf32> to vector<1x32xf32>
    %690 = vector.broadcast %689 : vector<1x32xf32> to vector<16x32xf32>
    %691 = arith.addf %688, %690 : vector<16x32xf32>
    %692 = arith.addf %0, %691 : vector<16x32xf32>
    %693 = vector.extract_strided_slice %603 {offsets = [0, 0], sizes = [1, 32], strides = [1, 1]} : vector<1x128xf32> to vector<1x32xf32>
    %694 = vector.extract_strided_slice %603 {offsets = [0, 32], sizes = [1, 32], strides = [1, 1]} : vector<1x128xf32> to vector<1x32xf32>
    %cst_173 = arith.constant dense<0.000000e+00> : vector<16xf32>
    %695 = vector.multi_reduction <add>, %692, %cst_173 [1] : vector<16x32xf32> to vector<16xf32>
    %696 = vector.shape_cast %695 : vector<16xf32> to vector<16x1xf32>
    %cst_174 = arith.constant 3.200000e+01 : f32
    %697 = vector.broadcast %cst_174 : f32 to vector<16x1xf32>
    %698 = arith.divf %696, %697 : vector<16x1xf32>
    %699 = vector.broadcast %698 : vector<16x1xf32> to vector<16x32xf32>
    %700 = arith.subf %692, %699 : vector<16x32xf32>
    %701 = arith.mulf %700, %700 : vector<16x32xf32>
    %cst_175 = arith.constant dense<0.000000e+00> : vector<16xf32>
    %702 = vector.multi_reduction <add>, %701, %cst_175 [1] : vector<16x32xf32> to vector<16xf32>
    %703 = vector.shape_cast %702 : vector<16xf32> to vector<16x1xf32>
    %cst_176 = arith.constant 3.200000e+01 : f32
    %704 = vector.broadcast %cst_176 : f32 to vector<16x1xf32>
    %705 = arith.divf %703, %704 : vector<16x1xf32>
    %706 = vector.broadcast %698 : vector<16x1xf32> to vector<16x32xf32>
    %707 = arith.subf %692, %706 : vector<16x32xf32>
    %cst_177 = arith.constant 9.99999974E-6 : f32
    %708 = vector.broadcast %cst_177 : f32 to vector<16x1xf32>
    %709 = arith.addf %705, %708 : vector<16x1xf32>
    %710 = math.rsqrt %709 : vector<16x1xf32>
    %711 = vector.broadcast %710 : vector<16x1xf32> to vector<16x32xf32>
    %712 = arith.mulf %707, %711 : vector<16x32xf32>
    %713 = vector.broadcast %693 : vector<1x32xf32> to vector<16x32xf32>
    %714 = arith.mulf %712, %713 : vector<16x32xf32>
    %715 = vector.broadcast %694 : vector<1x32xf32> to vector<16x32xf32>
    %716 = arith.addf %714, %715 : vector<16x32xf32>
    %717 = vector.extract_strided_slice %598 {offsets = [0, 128], sizes = [32, 64], strides = [1, 1]} : vector<32x192xf32> to vector<32x64xf32>
    %cst_178 = arith.constant dense<0.000000e+00> : vector<16x64xf32>
    %718 = tpu.matmul %716, %717, %cst_178 {dimension_numbers = #tpu.dot_dimension_numbers<[1], [0], [0], [1], [0, 0, 1, 1], [], []>} : vector<16x32xf32>, vector<32x64xf32>, vector<16x64xf32> -> vector<16x64xf32>
    %719 = vector.extract_strided_slice %602 {offsets = [0, 0], sizes = [1, 64], strides = [1, 1]} : vector<1x128xf32> to vector<1x64xf32>
    %720 = vector.broadcast %719 : vector<1x64xf32> to vector<16x64xf32>
    %721 = arith.addf %718, %720 : vector<16x64xf32>
    %cst_179 = arith.constant 5.000000e-01 : f32
    %722 = vector.broadcast %cst_179 : f32 to vector<16x64xf32>
    %723 = arith.mulf %722, %721 : vector<16x64xf32>
    %cst_180 = arith.constant 4.471500e-02 : f32
    %724 = vector.broadcast %cst_180 : f32 to vector<16x64xf32>
    %725 = arith.mulf %724, %721 : vector<16x64xf32>
    %726 = arith.mulf %725, %721 : vector<16x64xf32>
    %727 = arith.mulf %726, %721 : vector<16x64xf32>
    %728 = arith.addf %721, %727 : vector<16x64xf32>
    %cst_181 = arith.constant 0.797884583 : f32
    %729 = vector.broadcast %cst_181 : f32 to vector<16x64xf32>
    %730 = arith.mulf %729, %728 : vector<16x64xf32>
    %731 = math.tanh %730 : vector<16x64xf32>
    %cst_182 = arith.constant 1.000000e+00 : f32
    %732 = vector.broadcast %cst_182 : f32 to vector<16x64xf32>
    %733 = arith.addf %732, %731 : vector<16x64xf32>
    %734 = arith.mulf %723, %733 : vector<16x64xf32>
    %c2_183 = arith.constant 2 : index
    %c0_184 = arith.constant 0 : index
    %c0_185 = arith.constant 0 : index
    %735 = vector.load %arg4[%c2_183, %c0_184, %c0_185] : memref<4x64x32xf32, #tpu.memory_space<vmem>>, vector<1x64x32xf32>
    %736 = vector.shape_cast %735 : vector<1x64x32xf32> to vector<64x32xf32>
    %cst_186 = arith.constant dense<0.000000e+00> : vector<16x32xf32>
    %737 = tpu.matmul %734, %736, %cst_186 {dimension_numbers = #tpu.dot_dimension_numbers<[1], [0], [0], [1], [0, 0, 1, 1], [], []>} : vector<16x64xf32>, vector<64x32xf32>, vector<16x32xf32> -> vector<16x32xf32>
    %738 = vector.extract_strided_slice %602 {offsets = [0, 64], sizes = [1, 32], strides = [1, 1]} : vector<1x128xf32> to vector<1x32xf32>
    %739 = vector.broadcast %738 : vector<1x32xf32> to vector<16x32xf32>
    %740 = arith.addf %737, %739 : vector<16x32xf32>
    %741 = arith.addf %716, %740 : vector<16x32xf32>
    %742 = vector.extract_strided_slice %603 {offsets = [0, 64], sizes = [1, 32], strides = [1, 1]} : vector<1x128xf32> to vector<1x32xf32>
    %743 = vector.extract_strided_slice %603 {offsets = [0, 96], sizes = [1, 32], strides = [1, 1]} : vector<1x128xf32> to vector<1x32xf32>
    %cst_187 = arith.constant dense<0.000000e+00> : vector<16xf32>
    %744 = vector.multi_reduction <add>, %741, %cst_187 [1] : vector<16x32xf32> to vector<16xf32>
    %745 = vector.shape_cast %744 : vector<16xf32> to vector<16x1xf32>
    %cst_188 = arith.constant 3.200000e+01 : f32
    %746 = vector.broadcast %cst_188 : f32 to vector<16x1xf32>
    %747 = arith.divf %745, %746 : vector<16x1xf32>
    %748 = vector.broadcast %747 : vector<16x1xf32> to vector<16x32xf32>
    %749 = arith.subf %741, %748 : vector<16x32xf32>
    %750 = arith.mulf %749, %749 : vector<16x32xf32>
    %cst_189 = arith.constant dense<0.000000e+00> : vector<16xf32>
    %751 = vector.multi_reduction <add>, %750, %cst_189 [1] : vector<16x32xf32> to vector<16xf32>
    %752 = vector.shape_cast %751 : vector<16xf32> to vector<16x1xf32>
    %cst_190 = arith.constant 3.200000e+01 : f32
    %753 = vector.broadcast %cst_190 : f32 to vector<16x1xf32>
    %754 = arith.divf %752, %753 : vector<16x1xf32>
    %755 = vector.broadcast %747 : vector<16x1xf32> to vector<16x32xf32>
    %756 = arith.subf %741, %755 : vector<16x32xf32>
    %cst_191 = arith.constant 9.99999974E-6 : f32
    %757 = vector.broadcast %cst_191 : f32 to vector<16x1xf32>
    %758 = arith.addf %754, %757 : vector<16x1xf32>
    %759 = math.rsqrt %758 : vector<16x1xf32>
    %760 = vector.broadcast %759 : vector<16x1xf32> to vector<16x32xf32>
    %761 = arith.mulf %756, %760 : vector<16x32xf32>
    %762 = vector.broadcast %742 : vector<1x32xf32> to vector<16x32xf32>
    %763 = arith.mulf %761, %762 : vector<16x32xf32>
    %764 = vector.broadcast %743 : vector<1x32xf32> to vector<16x32xf32>
    %765 = arith.addf %763, %764 : vector<16x32xf32>
    %c3 = arith.constant 3 : index
    %c0_192 = arith.constant 0 : index
    %c0_193 = arith.constant 0 : index
    %766 = vector.load %arg3[%c3, %c0_192, %c0_193] : memref<4x32x192xf32, #tpu.memory_space<vmem>>, vector<1x32x192xf32>
    %767 = vector.shape_cast %766 : vector<1x32x192xf32> to vector<32x192xf32>
    %c3_194 = arith.constant 3 : index
    %c0_195 = arith.constant 0 : index
    %c0_196 = arith.constant 0 : index
    %768 = vector.load %arg5[%c3_194, %c0_195, %c0_196] : memref<4x4x128xf32, #tpu.memory_space<vmem>>, vector<1x4x128xf32>
    %769 = vector.shape_cast %768 : vector<1x4x128xf32> to vector<4x128xf32>
    %770 = vector.extract_strided_slice %769 {offsets = [0, 0], sizes = [1, 128], strides = [1, 1]} : vector<4x128xf32> to vector<1x128xf32>
    %771 = vector.extract_strided_slice %769 {offsets = [1, 0], sizes = [1, 128], strides = [1, 1]} : vector<4x128xf32> to vector<1x128xf32>
    %772 = vector.extract_strided_slice %769 {offsets = [2, 0], sizes = [1, 128], strides = [1, 1]} : vector<4x128xf32> to vector<1x128xf32>
    %773 = vector.extract_strided_slice %767 {offsets = [0, 0], sizes = [32, 32], strides = [1, 1]} : vector<32x192xf32> to vector<32x32xf32>
    %cst_197 = arith.constant dense<0.000000e+00> : vector<16x32xf32>
    %774 = tpu.matmul %765, %773, %cst_197 {dimension_numbers = #tpu.dot_dimension_numbers<[1], [0], [0], [1], [0, 0, 1, 1], [], []>} : vector<16x32xf32>, vector<32x32xf32>, vector<16x32xf32> -> vector<16x32xf32>
    %775 = vector.extract_strided_slice %770 {offsets = [0, 0], sizes = [1, 32], strides = [1, 1]} : vector<1x128xf32> to vector<1x32xf32>
    %776 = vector.broadcast %775 : vector<1x32xf32> to vector<16x32xf32>
    %777 = arith.addf %774, %776 : vector<16x32xf32>
    %778 = vector.extract_strided_slice %767 {offsets = [0, 32], sizes = [32, 64], strides = [1, 1]} : vector<32x192xf32> to vector<32x64xf32>
    %cst_198 = arith.constant dense<0.000000e+00> : vector<16x64xf32>
    %779 = tpu.matmul %596, %778, %cst_198 {dimension_numbers = #tpu.dot_dimension_numbers<[1], [0], [0], [1], [0, 0, 1, 1], [], []>} : vector<16x32xf32>, vector<32x64xf32>, vector<16x64xf32> -> vector<16x64xf32>
    %780 = vector.extract_strided_slice %770 {offsets = [0, 32], sizes = [1, 64], strides = [1, 1]} : vector<1x128xf32> to vector<1x64xf32>
    %781 = vector.broadcast %780 : vector<1x64xf32> to vector<16x64xf32>
    %782 = arith.addf %779, %781 : vector<16x64xf32>
    %783 = vector.extract_strided_slice %782 {offsets = [0, 0], sizes = [16, 32], strides = [1, 1]} : vector<16x64xf32> to vector<16x32xf32>
    %784 = vector.extract_strided_slice %782 {offsets = [0, 32], sizes = [16, 32], strides = [1, 1]} : vector<16x64xf32> to vector<16x32xf32>
    %cst_199 = arith.constant 0.353553385 : f32
    %785 = vector.broadcast %cst_199 : f32 to vector<16x32xf32>
    %786 = arith.mulf %777, %785 : vector<16x32xf32>
    %787 = tpu.concatenate %783, %783, %783, %783 in 0 : vector<16x32xf32>, vector<16x32xf32>, vector<16x32xf32>, vector<16x32xf32> -> vector<64x32xf32>
    %788 = arith.mulf %787, %26 : vector<64x32xf32>
    %789 = tpu.concatenate %784, %784, %784, %784 in 0 : vector<16x32xf32>, vector<16x32xf32>, vector<16x32xf32>, vector<16x32xf32> -> vector<64x32xf32>
    %790 = arith.mulf %789, %26 : vector<64x32xf32>
    %cst_200 = arith.constant dense<0.000000e+00> : vector<16x64xf32>
    %791 = tpu.matmul %786, %788, %cst_200 {dimension_numbers = #tpu.dot_dimension_numbers<[1], [1], [0], [0], [0, 0, 1, 0], [], []>} : vector<16x32xf32>, vector<64x32xf32>, vector<16x64xf32> -> vector<16x64xf32>
    %792 = arith.addf %791, %176 : vector<16x64xf32>
    %793 = vector.extract_strided_slice %792 {offsets = [0, 0], sizes = [16, 16], strides = [1, 1]} : vector<16x64xf32> to vector<16x16xf32>
    %cst_201 = arith.constant dense<0xFF800000> : vector<16xf32>
    %794 = vector.multi_reduction <maximumf>, %793, %cst_201 [1] : vector<16x16xf32> to vector<16xf32>
    %795 = vector.shape_cast %794 : vector<16xf32> to vector<16x1xf32>
    %796 = vector.extract_strided_slice %792 {offsets = [0, 16], sizes = [16, 16], strides = [1, 1]} : vector<16x64xf32> to vector<16x16xf32>
    %cst_202 = arith.constant dense<0xFF800000> : vector<16xf32>
    %797 = vector.multi_reduction <maximumf>, %796, %cst_202 [1] : vector<16x16xf32> to vector<16xf32>
    %798 = vector.shape_cast %797 : vector<16xf32> to vector<16x1xf32>
    %799 = vector.extract_strided_slice %792 {offsets = [0, 32], sizes = [16, 16], strides = [1, 1]} : vector<16x64xf32> to vector<16x16xf32>
    %cst_203 = arith.constant dense<0xFF800000> : vector<16xf32>
    %800 = vector.multi_reduction <maximumf>, %799, %cst_203 [1] : vector<16x16xf32> to vector<16xf32>
    %801 = vector.shape_cast %800 : vector<16xf32> to vector<16x1xf32>
    %802 = vector.extract_strided_slice %792 {offsets = [0, 48], sizes = [16, 16], strides = [1, 1]} : vector<16x64xf32> to vector<16x16xf32>
    %cst_204 = arith.constant dense<0xFF800000> : vector<16xf32>
    %803 = vector.multi_reduction <maximumf>, %802, %cst_204 [1] : vector<16x16xf32> to vector<16xf32>
    %804 = vector.shape_cast %803 : vector<16xf32> to vector<16x1xf32>
    %805 = vector.broadcast %795 : vector<16x1xf32> to vector<16x64xf32>
    %806 = vector.broadcast %34 : vector<1x64xf32> to vector<16x64xf32>
    %807 = arith.mulf %805, %806 : vector<16x64xf32>
    %cst_205 = arith.constant 0.000000e+00 : f32
    %808 = vector.broadcast %cst_205 : f32 to vector<16x64xf32>
    %809 = arith.addf %808, %807 : vector<16x64xf32>
    %810 = vector.broadcast %798 : vector<16x1xf32> to vector<16x64xf32>
    %811 = vector.broadcast %41 : vector<1x64xf32> to vector<16x64xf32>
    %812 = arith.mulf %810, %811 : vector<16x64xf32>
    %813 = arith.addf %809, %812 : vector<16x64xf32>
    %814 = vector.broadcast %801 : vector<16x1xf32> to vector<16x64xf32>
    %815 = vector.broadcast %48 : vector<1x64xf32> to vector<16x64xf32>
    %816 = arith.mulf %814, %815 : vector<16x64xf32>
    %817 = arith.addf %813, %816 : vector<16x64xf32>
    %818 = vector.broadcast %804 : vector<16x1xf32> to vector<16x64xf32>
    %819 = vector.broadcast %55 : vector<1x64xf32> to vector<16x64xf32>
    %820 = arith.mulf %818, %819 : vector<16x64xf32>
    %821 = arith.addf %817, %820 : vector<16x64xf32>
    %822 = arith.subf %792, %821 : vector<16x64xf32>
    %823 = math.exp %822 : vector<16x64xf32>
    %824 = vector.extract_strided_slice %823 {offsets = [0, 0], sizes = [16, 16], strides = [1, 1]} : vector<16x64xf32> to vector<16x16xf32>
    %cst_206 = arith.constant dense<0.000000e+00> : vector<16xf32>
    %825 = vector.multi_reduction <add>, %824, %cst_206 [1] : vector<16x16xf32> to vector<16xf32>
    %826 = vector.shape_cast %825 : vector<16xf32> to vector<16x1xf32>
    %827 = vector.extract_strided_slice %823 {offsets = [0, 16], sizes = [16, 16], strides = [1, 1]} : vector<16x64xf32> to vector<16x16xf32>
    %cst_207 = arith.constant dense<0.000000e+00> : vector<16xf32>
    %828 = vector.multi_reduction <add>, %827, %cst_207 [1] : vector<16x16xf32> to vector<16xf32>
    %829 = vector.shape_cast %828 : vector<16xf32> to vector<16x1xf32>
    %830 = vector.extract_strided_slice %823 {offsets = [0, 32], sizes = [16, 16], strides = [1, 1]} : vector<16x64xf32> to vector<16x16xf32>
    %cst_208 = arith.constant dense<0.000000e+00> : vector<16xf32>
    %831 = vector.multi_reduction <add>, %830, %cst_208 [1] : vector<16x16xf32> to vector<16xf32>
    %832 = vector.shape_cast %831 : vector<16xf32> to vector<16x1xf32>
    %833 = vector.extract_strided_slice %823 {offsets = [0, 48], sizes = [16, 16], strides = [1, 1]} : vector<16x64xf32> to vector<16x16xf32>
    %cst_209 = arith.constant dense<0.000000e+00> : vector<16xf32>
    %834 = vector.multi_reduction <add>, %833, %cst_209 [1] : vector<16x16xf32> to vector<16xf32>
    %835 = vector.shape_cast %834 : vector<16xf32> to vector<16x1xf32>
    %836 = vector.broadcast %826 : vector<16x1xf32> to vector<16x64xf32>
    %837 = vector.broadcast %34 : vector<1x64xf32> to vector<16x64xf32>
    %838 = arith.mulf %836, %837 : vector<16x64xf32>
    %cst_210 = arith.constant 0.000000e+00 : f32
    %839 = vector.broadcast %cst_210 : f32 to vector<16x64xf32>
    %840 = arith.addf %839, %838 : vector<16x64xf32>
    %841 = vector.broadcast %829 : vector<16x1xf32> to vector<16x64xf32>
    %842 = vector.broadcast %41 : vector<1x64xf32> to vector<16x64xf32>
    %843 = arith.mulf %841, %842 : vector<16x64xf32>
    %844 = arith.addf %840, %843 : vector<16x64xf32>
    %845 = vector.broadcast %832 : vector<16x1xf32> to vector<16x64xf32>
    %846 = vector.broadcast %48 : vector<1x64xf32> to vector<16x64xf32>
    %847 = arith.mulf %845, %846 : vector<16x64xf32>
    %848 = arith.addf %844, %847 : vector<16x64xf32>
    %849 = vector.broadcast %835 : vector<16x1xf32> to vector<16x64xf32>
    %850 = vector.broadcast %55 : vector<1x64xf32> to vector<16x64xf32>
    %851 = arith.mulf %849, %850 : vector<16x64xf32>
    %852 = arith.addf %848, %851 : vector<16x64xf32>
    %853 = tpu.reciprocal %852 {approx = true} : vector<16x64xf32> -> vector<16x64xf32>
    %854 = arith.mulf %823, %853 : vector<16x64xf32>
    %cst_211 = arith.constant dense<0.000000e+00> : vector<16x32xf32>
    %855 = tpu.matmul %854, %790, %cst_211 {dimension_numbers = #tpu.dot_dimension_numbers<[1], [0], [0], [1], [0, 0, 1, 1], [], []>} : vector<16x64xf32>, vector<64x32xf32>, vector<16x32xf32> -> vector<16x32xf32>
    %856 = vector.extract_strided_slice %767 {offsets = [0, 96], sizes = [32, 32], strides = [1, 1]} : vector<32x192xf32> to vector<32x32xf32>
    %cst_212 = arith.constant dense<0.000000e+00> : vector<16x32xf32>
    %857 = tpu.matmul %855, %856, %cst_212 {dimension_numbers = #tpu.dot_dimension_numbers<[1], [0], [0], [1], [0, 0, 1, 1], [], []>} : vector<16x32xf32>, vector<32x32xf32>, vector<16x32xf32> -> vector<16x32xf32>
    %858 = vector.extract_strided_slice %770 {offsets = [0, 96], sizes = [1, 32], strides = [1, 1]} : vector<1x128xf32> to vector<1x32xf32>
    %859 = vector.broadcast %858 : vector<1x32xf32> to vector<16x32xf32>
    %860 = arith.addf %857, %859 : vector<16x32xf32>
    %861 = arith.addf %765, %860 : vector<16x32xf32>
    %862 = vector.extract_strided_slice %772 {offsets = [0, 0], sizes = [1, 32], strides = [1, 1]} : vector<1x128xf32> to vector<1x32xf32>
    %863 = vector.extract_strided_slice %772 {offsets = [0, 32], sizes = [1, 32], strides = [1, 1]} : vector<1x128xf32> to vector<1x32xf32>
    %cst_213 = arith.constant dense<0.000000e+00> : vector<16xf32>
    %864 = vector.multi_reduction <add>, %861, %cst_213 [1] : vector<16x32xf32> to vector<16xf32>
    %865 = vector.shape_cast %864 : vector<16xf32> to vector<16x1xf32>
    %cst_214 = arith.constant 3.200000e+01 : f32
    %866 = vector.broadcast %cst_214 : f32 to vector<16x1xf32>
    %867 = arith.divf %865, %866 : vector<16x1xf32>
    %868 = vector.broadcast %867 : vector<16x1xf32> to vector<16x32xf32>
    %869 = arith.subf %861, %868 : vector<16x32xf32>
    %870 = arith.mulf %869, %869 : vector<16x32xf32>
    %cst_215 = arith.constant dense<0.000000e+00> : vector<16xf32>
    %871 = vector.multi_reduction <add>, %870, %cst_215 [1] : vector<16x32xf32> to vector<16xf32>
    %872 = vector.shape_cast %871 : vector<16xf32> to vector<16x1xf32>
    %cst_216 = arith.constant 3.200000e+01 : f32
    %873 = vector.broadcast %cst_216 : f32 to vector<16x1xf32>
    %874 = arith.divf %872, %873 : vector<16x1xf32>
    %875 = vector.broadcast %867 : vector<16x1xf32> to vector<16x32xf32>
    %876 = arith.subf %861, %875 : vector<16x32xf32>
    %cst_217 = arith.constant 9.99999974E-6 : f32
    %877 = vector.broadcast %cst_217 : f32 to vector<16x1xf32>
    %878 = arith.addf %874, %877 : vector<16x1xf32>
    %879 = math.rsqrt %878 : vector<16x1xf32>
    %880 = vector.broadcast %879 : vector<16x1xf32> to vector<16x32xf32>
    %881 = arith.mulf %876, %880 : vector<16x32xf32>
    %882 = vector.broadcast %862 : vector<1x32xf32> to vector<16x32xf32>
    %883 = arith.mulf %881, %882 : vector<16x32xf32>
    %884 = vector.broadcast %863 : vector<1x32xf32> to vector<16x32xf32>
    %885 = arith.addf %883, %884 : vector<16x32xf32>
    %886 = vector.extract_strided_slice %767 {offsets = [0, 128], sizes = [32, 64], strides = [1, 1]} : vector<32x192xf32> to vector<32x64xf32>
    %cst_218 = arith.constant dense<0.000000e+00> : vector<16x64xf32>
    %887 = tpu.matmul %885, %886, %cst_218 {dimension_numbers = #tpu.dot_dimension_numbers<[1], [0], [0], [1], [0, 0, 1, 1], [], []>} : vector<16x32xf32>, vector<32x64xf32>, vector<16x64xf32> -> vector<16x64xf32>
    %888 = vector.extract_strided_slice %771 {offsets = [0, 0], sizes = [1, 64], strides = [1, 1]} : vector<1x128xf32> to vector<1x64xf32>
    %889 = vector.broadcast %888 : vector<1x64xf32> to vector<16x64xf32>
    %890 = arith.addf %887, %889 : vector<16x64xf32>
    %cst_219 = arith.constant 5.000000e-01 : f32
    %891 = vector.broadcast %cst_219 : f32 to vector<16x64xf32>
    %892 = arith.mulf %891, %890 : vector<16x64xf32>
    %cst_220 = arith.constant 4.471500e-02 : f32
    %893 = vector.broadcast %cst_220 : f32 to vector<16x64xf32>
    %894 = arith.mulf %893, %890 : vector<16x64xf32>
    %895 = arith.mulf %894, %890 : vector<16x64xf32>
    %896 = arith.mulf %895, %890 : vector<16x64xf32>
    %897 = arith.addf %890, %896 : vector<16x64xf32>
    %cst_221 = arith.constant 0.797884583 : f32
    %898 = vector.broadcast %cst_221 : f32 to vector<16x64xf32>
    %899 = arith.mulf %898, %897 : vector<16x64xf32>
    %900 = math.tanh %899 : vector<16x64xf32>
    %cst_222 = arith.constant 1.000000e+00 : f32
    %901 = vector.broadcast %cst_222 : f32 to vector<16x64xf32>
    %902 = arith.addf %901, %900 : vector<16x64xf32>
    %903 = arith.mulf %892, %902 : vector<16x64xf32>
    %c3_223 = arith.constant 3 : index
    %c0_224 = arith.constant 0 : index
    %c0_225 = arith.constant 0 : index
    %904 = vector.load %arg4[%c3_223, %c0_224, %c0_225] : memref<4x64x32xf32, #tpu.memory_space<vmem>>, vector<1x64x32xf32>
    %905 = vector.shape_cast %904 : vector<1x64x32xf32> to vector<64x32xf32>
    %cst_226 = arith.constant dense<0.000000e+00> : vector<16x32xf32>
    %906 = tpu.matmul %903, %905, %cst_226 {dimension_numbers = #tpu.dot_dimension_numbers<[1], [0], [0], [1], [0, 0, 1, 1], [], []>} : vector<16x64xf32>, vector<64x32xf32>, vector<16x32xf32> -> vector<16x32xf32>
    %907 = vector.extract_strided_slice %771 {offsets = [0, 64], sizes = [1, 32], strides = [1, 1]} : vector<1x128xf32> to vector<1x32xf32>
    %908 = vector.broadcast %907 : vector<1x32xf32> to vector<16x32xf32>
    %909 = arith.addf %906, %908 : vector<16x32xf32>
    %910 = arith.addf %885, %909 : vector<16x32xf32>
    %911 = vector.extract_strided_slice %772 {offsets = [0, 64], sizes = [1, 32], strides = [1, 1]} : vector<1x128xf32> to vector<1x32xf32>
    %912 = vector.extract_strided_slice %772 {offsets = [0, 96], sizes = [1, 32], strides = [1, 1]} : vector<1x128xf32> to vector<1x32xf32>
    %cst_227 = arith.constant dense<0.000000e+00> : vector<16xf32>
    %913 = vector.multi_reduction <add>, %910, %cst_227 [1] : vector<16x32xf32> to vector<16xf32>
    %914 = vector.shape_cast %913 : vector<16xf32> to vector<16x1xf32>
    %cst_228 = arith.constant 3.200000e+01 : f32
    %915 = vector.broadcast %cst_228 : f32 to vector<16x1xf32>
    %916 = arith.divf %914, %915 : vector<16x1xf32>
    %917 = vector.broadcast %916 : vector<16x1xf32> to vector<16x32xf32>
    %918 = arith.subf %910, %917 : vector<16x32xf32>
    %919 = arith.mulf %918, %918 : vector<16x32xf32>
    %cst_229 = arith.constant dense<0.000000e+00> : vector<16xf32>
    %920 = vector.multi_reduction <add>, %919, %cst_229 [1] : vector<16x32xf32> to vector<16xf32>
    %921 = vector.shape_cast %920 : vector<16xf32> to vector<16x1xf32>
    %cst_230 = arith.constant 3.200000e+01 : f32
    %922 = vector.broadcast %cst_230 : f32 to vector<16x1xf32>
    %923 = arith.divf %921, %922 : vector<16x1xf32>
    %924 = vector.broadcast %916 : vector<16x1xf32> to vector<16x32xf32>
    %925 = arith.subf %910, %924 : vector<16x32xf32>
    %cst_231 = arith.constant 9.99999974E-6 : f32
    %926 = vector.broadcast %cst_231 : f32 to vector<16x1xf32>
    %927 = arith.addf %923, %926 : vector<16x1xf32>
    %928 = math.rsqrt %927 : vector<16x1xf32>
    %929 = vector.broadcast %928 : vector<16x1xf32> to vector<16x32xf32>
    %930 = arith.mulf %925, %929 : vector<16x32xf32>
    %931 = vector.broadcast %911 : vector<1x32xf32> to vector<16x32xf32>
    %932 = arith.mulf %930, %931 : vector<16x32xf32>
    %933 = vector.broadcast %912 : vector<1x32xf32> to vector<16x32xf32>
    %934 = arith.addf %932, %933 : vector<16x32xf32>
    %c0_232 = arith.constant 0 : index
    %c0_233 = arith.constant 0 : index
    %c0_234 = arith.constant 0 : index
    %935 = vector.load %arg5[%c0_232, %c0_233, %c0_234] : memref<4x4x128xf32, #tpu.memory_space<vmem>>, vector<1x4x128xf32>
    %936 = vector.shape_cast %935 : vector<1x4x128xf32> to vector<4x128xf32>
    %937 = vector.extract_strided_slice %936 {offsets = [3, 0], sizes = [1, 32], strides = [1, 1]} : vector<4x128xf32> to vector<1x32xf32>
    %938 = vector.extract_strided_slice %936 {offsets = [3, 32], sizes = [1, 32], strides = [1, 1]} : vector<4x128xf32> to vector<1x32xf32>
    %cst_235 = arith.constant dense<0.000000e+00> : vector<1x16xf32>
    %939 = tpu.matmul %937, %934, %cst_235 {dimension_numbers = #tpu.dot_dimension_numbers<[1], [1], [0], [0], [0, 0, 1, 0], [], []>} : vector<1x32xf32>, vector<16x32xf32>, vector<1x16xf32> -> vector<1x16xf32>
    %cst_236 = arith.constant dense<0.000000e+00> : vector<1x16xf32>
    %940 = tpu.matmul %938, %596, %cst_236 {dimension_numbers = #tpu.dot_dimension_numbers<[1], [1], [0], [0], [0, 0, 1, 0], [], []>} : vector<1x32xf32>, vector<16x32xf32>, vector<1x16xf32> -> vector<1x16xf32>
    %cst_237 = arith.constant dense<0.000000e+00> : vector<1x128xf32>
    %941 = tpu.matmul %939, %189, %cst_237 {dimension_numbers = #tpu.dot_dimension_numbers<[1], [0], [0], [1], [0, 0, 1, 1], [], []>} : vector<1x16xf32>, vector<16x128xf32>, vector<1x128xf32> -> vector<1x128xf32>
    %cst_238 = arith.constant dense<0.000000e+00> : vector<1x128xf32>
    %942 = tpu.matmul %940, %246, %cst_238 {dimension_numbers = #tpu.dot_dimension_numbers<[1], [0], [0], [1], [0, 0, 1, 1], [], []>} : vector<1x16xf32>, vector<16x128xf32>, vector<1x128xf32> -> vector<1x128xf32>
    %943 = arith.addf %941, %942 : vector<1x128xf32>
    %cst_239 = arith.constant 0.176776692 : f32
    %944 = vector.broadcast %cst_239 : f32 to vector<1x128xf32>
    %945 = arith.mulf %943, %944 : vector<1x128xf32>
    %946 = arith.negf %945 : vector<1x128xf32>
    %947 = math.exp %946 : vector<1x128xf32>
    %cst_240 = arith.constant 1.000000e+00 : f32
    %948 = vector.broadcast %cst_240 : f32 to vector<1x128xf32>
    %949 = arith.addf %948, %947 : vector<1x128xf32>
    %950 = arith.divf %948, %949 : vector<1x128xf32>
    %951 = arith.mulf %950, %266 : vector<1x128xf32>
    %c0_241 = arith.constant 0 : index
    %c0_242 = arith.constant 0 : index
    %952 = vector.load %arg6[%c0_241, %c0_242] : memref<1x128xf32, #tpu.memory_space<vmem>>, vector<1x128xf32>
    tpu.vector_store %arg6[%c0_241, %c0_242], %951 {strides = array<i32>} : memref<1x128xf32, #tpu.memory_space<vmem>>, vector<1x128xf32>,
    return
  }
  func.func @transform_0(%arg0: i32, %arg1: memref<2xi32, #tpu.memory_space<smem>>) -> (i32, i32) {
    %c0_i32 = arith.constant 0 : i32
    %c0_i32_0 = arith.constant 0 : i32
    %c0_i32_1 = arith.constant 0 : i32
    return %c0_i32, %c0_i32_0 : i32, i32
  }
  func.func @transform_1(%arg0: i32, %arg1: memref<2xi32, #tpu.memory_space<smem>>) -> (i32, i32, i32) {
    %c0_i32 = arith.constant 0 : i32
    %c0_i32_0 = arith.constant 0 : i32
    %c0_i32_1 = arith.constant 0 : i32
    %c0_i32_2 = arith.constant 0 : i32
    return %c0_i32, %c0_i32_0, %c0_i32_1 : i32, i32, i32
  }
  func.func @transform_2(%arg0: i32, %arg1: memref<2xi32, #tpu.memory_space<smem>>) -> (i32, i32, i32) {
    %c0_i32 = arith.constant 0 : i32
    %c0_i32_0 = arith.constant 0 : i32
    %c0_i32_1 = arith.constant 0 : i32
    %c0_i32_2 = arith.constant 0 : i32
    return %c0_i32, %c0_i32_0, %c0_i32_1 : i32, i32, i32
  }
  func.func @transform_3(%arg0: i32, %arg1: memref<2xi32, #tpu.memory_space<smem>>) -> (i32, i32, i32) {
    %c0_i32 = arith.constant 0 : i32
    %c0_i32_0 = arith.constant 0 : i32
    %c0_i32_1 = arith.constant 0 : i32
    %c0_i32_2 = arith.constant 0 : i32
    return %c0_i32, %c0_i32_0, %c0_i32_1 : i32, i32, i32
  }
  func.func @transform_4(%arg0: i32, %arg1: memref<2xi32, #tpu.memory_space<smem>>) -> (i32, i32) {
    %c0_i32 = arith.constant 0 : i32
    %c0_i32_0 = arith.constant 0 : i32
    %c0_i32_1 = arith.constant 0 : i32
    return %c0_i32, %c0_i32_0 : i32, i32
  }
}

</mosaic_0001>

<bundles_post_ra>
// kernel: tpu_custom_call.1
= control target key start
LH: loop header
LB: loop body
LE: loop exit
PB: predicated region body
PF: predicated region fallthrough
CT: control target
= control target key end

     0   :  { %s6572_s0 = inlined_call_operand.vmem [shape: s32[2], index: 0, kind: input, shape index: {}]   ;;  %s6573_s1 = inlined_call_operand.vmem [shape: f32[16,32], index: 1, kind: input, shape index: {}]   ;;  %s6574_s2 = inlined_call_operand.vmem [shape: f32[4,32,192], index: 2, kind: input, shape index: {}]   ;;  %s6575_s3 = inlined_call_operand.vmem [shape: f32[4,64,32], index: 3, kind: input, shape index: {}]   ;;  %s6576_s4 = inlined_call_operand.vmem [shape: f32[4,4,128], index: 4, kind: input, shape index: {}]   ;;  %s6577_s5 = inlined_call_operand.hbm [shape: f32[1,128], index: 5, kind: output, shape index: {}]  }
   0x1   :  { %s10_s20 = sshll.u32 %s6572_s0, 4  ;;  %s11_s20 = int_to_ptr.vmem [resolvable:$true] %s10_s20 }
   0x2   :  { %s5127_s21 = scalar_lea.vmem %s11_s20, 16  ;;  %p5132_p1 = scmp.lt.s32.totalorder %s11_s20, %s11_s20 }
   0x3   :  { %p5128_p0 = scmp.ne.s32.totalorder %s11_s20, %s5127_s21  ;;  %p5133_p2 = scmp.lt.s32.totalorder %s5127_s21, %s5127_s21 }
   0x5   :  { %p5134_p3 = por %p5133_p2, %p5132_p1 }
   0x7   :  { %p5135_p4 = pnand %p5134_p3, %p5128_p0 }
   0x9   :  { %5138 = shalt.err (!%p5135_p4)  }
   0xa   :  { %s5163_s22 = smov [#allocation3]  }
   0xb   :  { %13 = dma.vmem_to_smem %s11_s20, 16, %s5163_s22, [#allocation2] }
   0xc   :  { %5159 = dma.done.wait [#allocation2], 16 }
   0xd   :  { %5160 = vsyncadd [#allocation2], 4294967280 }
   0xe   :  { %15 = sfence }
   0xf   :  { %v5210_v0 = vld [vmem:[%s6574_s2 + $0x30] sm:$0xff]  ;;  %v5215_v1 = vld [vmem:[%s6574_s2 + $0x20] sm:$0xff]  ;;  %vm6579_vm0 = vcmask 261120   ;;  %v27_v2 = vlaneseq }
  0x10   :  { %4619 = vmatprep.subr.mxu0 %v5210_v0  ;;  %v5221_v3 = vld [vmem:[%s6573_s1] sm:$0xff]  ;;  %v5227_v4 = vld [vmem:[%s6574_s2 + $0x10] sm:$0xff] }
  0x11   :  { %4620 = vmatpush3.msra.mxu0 %v5210_v0  ;;  %4627 = vmatprep.mubr.msk.f32.mxu0 %vm6579_vm0, %v5221_v3  ;;  %v5231_v5 = vand.u32 127, %v27_v2 }
  0x13   :  { %6587 = vst [vmem:[#allocation8_spill] sm:$0xff] %v5231_v5 }
  0x14   :  { %16 = vsyncpa [#allocation5], 0  ;;  %4621 = vmatprep.subr.mxu0 %v5215_v1  ;;  %v5238_v6 = vld [vmem:[%s6574_s2] sm:$0xff]  ;;  %vm116_vm1 = vcmp.ge.s32.totalorder %v5231_v5, 24  ;;  %vm140_vm2 = vcmp.lt.s32.totalorder %v5231_v5, 32  ;;  %vm114_vm3 = vcmp.ge.s32.totalorder %v5231_v5, 16 }
  0x15   :  { %4622 = vmatpush3.msra.mxu0 %v5215_v1  ;;  %vm138_vm4 = vcmp.lt.s32.totalorder %v5231_v5, 24  ;;  %vm5249_vm5 = vmand %vm116_vm1, %vm140_vm2  ;;  %v5257_v8 = vld [vmem:[%s6573_s1 + $0x8] sm:$0xff]  ;;  %v6581_v9 = vmov 0.0   ;;  %vm112_vm6 = vcmp.ge.s32.totalorder %v5231_v5, 8  ;;  %vm136_vm7 = vcmp.lt.s32.totalorder %v5231_v5, 16  ;;  %s5165_s9 = smov 32  }
  0x16   :  { %4623 = vmatprep.subr.mxu0 %v5227_v4  ;;  %v5262_v10 = vsel %vm5249_vm5, 1.0, %v6581_v9  ;;  %vm5271_vm8 = vmand %vm114_vm3, %vm138_vm4  ;;  %vm6578_vm10 = vcmp.lt.s32.totalorder %v5231_v5, 8  ;;  %v5316_v16 = vshrl.u32 %v27_v2, 7  ;;  %v5326_v19 = vld [vmem:[%s6576_s4] sm:$0xf]  ;;  %s5166_s12 = smov 96  }
  0x17   :  { %4624 = vmatpush3.msra.mxu0 %v5227_v4  ;;  %476 = vrot.lane.b32.xlu0 %v5262_v10, %s5165_s9  ;;  %v5279_v12 = vsel %vm5271_vm8, 1.0, %v6581_v9  ;;  %vm5289_vm9 = vmand %vm112_vm6, %vm136_vm7  ;;  %v5308_v15 = vsel %vm6578_vm10, 1.0, %v6581_v9  ;;  %vm176_vm11 = vcmp.ge.s32.totalorder %v5231_v5, 32  ;;  %vm177_vm12 = vcmp.lt.s32.totalorder %v5231_v5, 48  ;;  %s231_s13 = sld [smem:[#allocation3]]  ;;  %s5168_s15 = smov 64  }
  0x18   :  { %4625 = vmatprep.subr.mxu0 %v5238_v6  ;;  %472 = vrot.lane.b32.xlu1 %v5279_v12, %s5165_s9  ;;  %v5298_v14 = vsel %vm5289_vm9, 1.0, %v6581_v9  ;;  %v5319_v17 = vsub.s32 0, %v5316_v16  ;;  %vm5384_vm13 = vmand %vm176_vm11, %vm177_vm12  ;;  %vm181_vm14 = vcmp.ge.s32.totalorder %v5231_v5, 48  ;;  %vm182_vm15 = vcmp.lt.s32.totalorder %v5231_v5, 64  ;;  %s4237_s14 = sld [smem:[#allocation3 + $0x1]]  ;;  %s5169_s16 = smov 112  }
  0x19   :  { %4626 = vmatpush3.msra.mxu0 %v5238_v6  ;;  %vm5394_vm4 = vmand %vm181_vm14, %vm182_vm15  ;;  %v6580_v52 = vmov 0   ;;  %vm203_vm10 = vcmp.ge.s32.totalorder %v5231_v5, 40  ;;  %s5170_s17 = smov 80  }
  0x1a   :  { %4628 = vmatmul.mubr.msk.f32.vlgmr.msra.gmra.mxu0 %vm6579_vm0, %v5257_v8  ;;  %v5332_v21 = vrot.slane %v5326_v19, %v5319_v17  ;;  %v195_v53 = vsel %vm112_vm6, 1, %v6580_v52  ;;  %v196_v54 = vsel %vm114_vm3, 1, %v6580_v52  ;;  %v199_v56 = vsel %vm116_vm1, 1, %v6580_v52 }
  0x1b   :  { %474 = vrot.lane.b32.xlu0 %v5262_v10, %s5165_s9  ;;  %v197_v55 = vadd.s32 %v196_v54, %v195_v53  ;;  %v214_v57 = vsel %vm5289_vm9, 1, %v6580_v52  ;;  %v201_v59 = vsel %vm176_vm11, 1, %v6580_v52  ;;  %vm220_vm6 = vcmp.lt.s32.totalorder %v5231_v5, 40  ;;  %vm223_vm9 = vmand %vm203_vm10, %vm177_vm12 }
  0x1c   :  { %470 = vrot.lane.b32.xlu1 %v5279_v12, %s5165_s9  ;;  %v217_v60 = vsel %vm5271_vm8, 0, %v214_v57  ;;  %vm221_vm1 = vmand %vm176_vm11, %vm220_vm6  ;;  %v204_v63 = vsel %vm203_vm10, 1, %v6580_v52  ;;  %v206_v13 = vsel %vm181_vm14, 1, %v6580_v52  ;;  %vm208_vm8 = vcmp.ge.s32.totalorder %v5231_v5, 56 }
  0x1d   :  { %v200_v58 = vadd.s32 %v199_v56, %v197_v55  ;;  %v219_v62 = vsel %vm5249_vm5, 1, %v217_v60  ;;  %vm228_vm10 = vmand %vm208_vm8, %vm182_vm15 }
  0x1e   :  { %v222_v2 = vsel %vm221_vm1, 0, %v219_v62 }
  0x1f   :  { %468 = vrot.lane.b32.xlu0 %v5298_v14, %s5165_s9  ;;  %v202_v61 = vadd.s32 %v201_v59, %v200_v58  ;;  %v224_v7 = vsel %vm223_vm9, 1, %v222_v2  ;;  %vm647_vm9 = vcmask 130048   ;;  %v5496_v2 = vsel %vm136_vm7, 1.0, %v6581_v9 }
  0x20   :  { %466 = vrot.lane.b32.xlu1 %v5298_v14, %s5165_s9 }
  0x21   :  { %v205_v11 = vadd.s32 %v204_v63, %v202_v61 }
  0x23   :  { %464 = vrot.lane.b32.xlu0 %v5308_v15, %s5165_s9 }
  0x24   :  { %462 = vrot.lane.b32.xlu1 %v5308_v15, %s5165_s9 }
  0x89   :  { %v5321_v18 = vpop.permute.xlu0 %476 }
  0x8a   :  { %v5328_v20 = vpop.permute.xlu1 %472 }
  0x8d   :  { %v5334_v22 = vpop.permute.xlu0 %474 }
  0x8e   :  { %v5339_v25 = vpop.permute.xlu1 %470 }
  0x91   :  { %v5350_v31 = vpop.permute.xlu0 %468 }
  0x92   :  { %v5356_v33 = vpop.permute.xlu1 %466 }
  0x95   :  { %v5364_v36 = vpop.permute.xlu0 %464 }
  0x96   :  { %v5369_v38 = vpop.permute.xlu1 %462 }
  0x97   :  { %6594 = vst [vmem:[#allocation9_spill] sm:$0xff] %v5369_v38 }
  0xda   :  { %v4629_v23 = vpop.f32.mrf.mxu0 }
  0xdb   :  { %v5337_v24 = vadd.f32 %v4629_v23, %v5332_v21  ;;  %v207_v23 = vadd.s32 %v206_v13, %v205_v11 }
  0xdc   :  { %v443_v26 = vpop.f32.mrf.mxu0 }
  0xdd   :  { %v5342_v27 = vadd.f32 %v443_v26, %v5332_v21  ;;  %v493_v28 = vmul.f32 %v5321_v18, %v5337_v24  ;;  %v491_v32 = vmul.f32 %v5328_v20, %v5337_v24  ;;  %v489_v35 = vmul.f32 %v5350_v31, %v5337_v24 }
  0xde   :  { %v487_v39 = vmul.f32 %v5364_v36, %v5337_v24  ;;  %v453_v51 = vmul.f32 0.35355338, %v5337_v24  ;;  %v209_v26 = vsel %vm208_vm8, 1, %v6580_v52  ;;  %vm654_vm8 = vcmask 261248  }
  0xdf   :  { %548 = vrot.lane.b32.xlu0 %v493_v28, %s5166_s12  ;;  %v492_v29 = vmul.f32 %v5334_v22, %v5342_v27  ;;  %v452_v30 = vmul.f32 0.35355338, %v5342_v27  ;;  %v490_v34 = vmul.f32 %v5339_v25, %v5342_v27  ;;  %v488_v37 = vmul.f32 %v5356_v33, %v5342_v27 }
  0xe0   :  { %v486_v40 = vmul.f32 %v5369_v38, %v5342_v27 }
  0xe1   :  { %546 = vrot.lane.b32.xlu1 %v492_v29, %s5166_s12  ;;  %4646 = vmatprep.mubr.msk.f32.mxu1 %vm6579_vm0, %v452_v30  ;;  %v210_v29 = vadd.s32 %v209_v26, %v207_v23 }
  0xe3   :  { %544 = vrot.lane.b32.xlu0 %v491_v32, %s5166_s12  ;;  %v232_v32 = vstv %s231_s13 }
  0xe5   :  { %542 = vrot.lane.b32.xlu1 %v490_v34, %s5166_s12  ;;  %v211_v34 = vmul.u32 8, %v210_v29 }
  0xe7   :  { %540 = vrot.lane.b32.xlu0 %v489_v35, %s5166_s12 }
  0xe9   :  { %538 = vrot.lane.b32.xlu1 %v488_v37, %s5166_s12  ;;  %v236_v37 = vstv %s4237_s14 }
  0xeb   :  { %536 = vrot.lane.b32.xlu0 %v487_v39, %s5166_s12  ;;  %v5453_v39 = vsub.s32 %v5231_v5, %v211_v34 }
  0xed   :  { %534 = vrot.lane.b32.xlu1 %v486_v40, %s5166_s12 }
 0x151   :  { %v549_v43 = vpop.permute.xlu0 %548 }
 0x152   :  { %4630 = vmatprep.subr.msk.mxu1 %vm6579_vm0, %v549_v43 }
 0x153   :  { %4631 = vmatpush3.xpose.msk.msra.mxu1 %vm6579_vm0, %v549_v43  ;;  %v547_v44 = vpop.permute.xlu1 %546 }
 0x154   :  { %4632 = vmatprep.subr.msk.mxu1 %vm6579_vm0, %v547_v44 }
 0x155   :  { %v545_v45 = vpop.permute.xlu0 %544 }
 0x157   :  { %4633 = vmatpush3.xpose.msk.msra.mxu1 %vm6579_vm0, %v547_v44  ;;  %v543_v46 = vpop.permute.xlu1 %542 }
 0x158   :  { %4634 = vmatprep.subr.msk.mxu1 %vm6579_vm0, %v545_v45 }
 0x159   :  { %v541_v47 = vpop.permute.xlu0 %540 }
 0x15b   :  { %4635 = vmatpush3.xpose.msk.msra.mxu1 %vm6579_vm0, %v545_v45  ;;  %v539_v48 = vpop.permute.xlu1 %538 }
 0x15c   :  { %4636 = vmatprep.subr.msk.mxu1 %vm6579_vm0, %v543_v46 }
 0x15d   :  { %v537_v49 = vpop.permute.xlu0 %536 }
 0x15f   :  { %4637 = vmatpush3.xpose.msk.msra.mxu1 %vm6579_vm0, %v543_v46  ;;  %v535_v50 = vpop.permute.xlu1 %534 }
 0x160   :  { %4638 = vmatprep.subr.msk.mxu1 %vm6579_vm0, %v541_v47 }
 0x163   :  { %4639 = vmatpush3.xpose.msk.msra.mxu1 %vm6579_vm0, %v541_v47 }
 0x164   :  { %4640 = vmatprep.subr.msk.mxu1 %vm6579_vm0, %v539_v48 }
 0x167   :  { %4641 = vmatpush3.xpose.msk.msra.mxu1 %vm6579_vm0, %v539_v48 }
 0x168   :  { %4642 = vmatprep.subr.msk.mxu1 %vm6579_vm0, %v537_v49 }
 0x16b   :  { %4643 = vmatpush3.xpose.msk.msra.mxu1 %vm6579_vm0, %v537_v49 }
 0x16c   :  { %4644 = vmatprep.subr.msk.mxu1 %vm6579_vm0, %v535_v50 }
 0x16f   :  { %4645 = vmatpush3.xpose.msk.msra.mxu1 %vm6579_vm0, %v535_v50 }
 0x172   :  { %4647 = vmatmul.mubr.msk.f32.vlgmr.msra.gmra.mxu1 %vm6579_vm0, %v453_v51  ;;  %vm225_vm0 = vcmp.lt.s32.totalorder %v5231_v5, 56 }
 0x173   :  { %vm226_vm5 = vmand %vm181_vm14, %vm225_vm0 }
 0x174   :  { %v227_v28 = vsel %vm226_vm5, 0, %v224_v7  ;;  %vm661_vm5 = vcmask 392448  }
 0x175   :  { %v229_v30 = vsel %vm228_vm10, 1, %v227_v28  ;;  %vm668_vm10 = vcmask 523648   ;;  %v5504_v28 = vsel %vm5384_vm13, 1.0, %v6581_v9 }
 0x176   :  { %vm230_vm11 = vcmp.eq.s32.totalorder %v229_v30, 0  ;;  %vm234_vm12 = vcmp.eq.s32.totalorder %v229_v30, 1  ;;  %vm239_vm0 = vcmp.ne.s32.totalorder %v229_v30, 1  ;;  %vm238_vm6 = vcmp.ne.s32.totalorder %v229_v30, 0 }
 0x177   :  { %v233_v35 = vsel %vm230_vm11, %v232_v32, 0  ;;  %vm173_vm11 = vmand %vm114_vm3, %vm140_vm2  ;;  %vm793_vm2 = vcmask 523264   ;;  %vm6603_vm3 = vcmask 261120  }
 0x178   :  { %v237_v40 = vsel %vm234_vm12, %v236_v37, %v233_v35  ;;  %v5491_v63 = vsel %vm173_vm11, 1.0, %v6581_v9  ;;  %vm6604_vm7 = vmmov %vm6603_vm3 }
 0x179   :  { %vm240_vm14 = vcmp.ge.s32.totalorder %v5453_v39, %v237_v40  ;;  %v5512_v40 = vsel %vm5394_vm4, 1.0, %v6581_v9  ;;  %vm6605_vm13 = vmmov %vm6603_vm3 }
 0x17a   :  { %vm5456_vm1 = vmor %vm239_vm0, %vm240_vm14 }
 0x17b   :  { %vm5460_vm15 = vmor %vm238_vm6, %vm240_vm14  ;;  %v5467_v45 = vsel %vm5456_vm1, -1e+30, %v6581_v9 }
 0x17c   :  { %v5472_v47 = vsel %vm5460_vm15, -1e+30, %v6581_v9  ;;  %vm6606_vm4 = vmmov %vm6603_vm3 }
 0x17d   :  { %vm6607_vm12 = vmmov %vm6603_vm3 }
 0x17e   :  { %vm6608_vm0 = vmmov %vm6603_vm3 }
 0x17f   :  { %vm6609_vm14 = vmmov %vm6608_vm0 }
 0x180   :  { %vm6610_vm6 = vmmov %vm6608_vm0 }
 0x181   :  { %vm6611_vm11 = vmmov %vm6608_vm0 }
 0x232   :  { %v4648_v46 = vpop.f32.mrf.mxu1 }
 0x233   :  { %v644_v48 = vadd.f32 %v4648_v46, %v5467_v45 }
 0x234   :  { %v638_v49 = vpop.f32.mrf.mxu1 }
 0x235   :  { %v639_v50 = vadd.f32 %v638_v49, %v5472_v47  ;;  %v651_v51 = vsel %vm647_vm9, %v644_v48, -inf  ;;  %v658_v54 = vsel %vm654_vm8, %v644_v48, -inf  ;;  %v665_v58 = vsel %vm661_vm5, %v644_v48, -inf }
 0x236   :  { %652 = vmax.xlane.f32.xlu0 %v651_v51  ;;  %v672_v59 = vsel %vm668_vm10, %v644_v48, -inf }
 0x237   :  { %v655_v53 = vsel %vm654_vm8, %v639_v50, -inf  ;;  %v662_v55 = vsel %vm661_vm5, %v639_v50, -inf  ;;  %v648_v56 = vsel %vm647_vm9, %v639_v50, -inf  ;;  %v669_v57 = vsel %vm668_vm10, %v639_v50, -inf }
 0x238   :  { %656 = vmax.xlane.f32.xlu1 %v655_v53 }
 0x23a   :  { %659 = vmax.xlane.f32.xlu0 %v658_v54 }
 0x23c   :  { %663 = vmax.xlane.f32.xlu1 %v662_v55 }
 0x23e   :  { %649 = vmax.xlane.f32.xlu0 %v648_v56 }
 0x240   :  { %670 = vmax.xlane.f32.xlu1 %v669_v57 }
 0x242   :  { %666 = vmax.xlane.f32.xlu0 %v665_v58 }
 0x246   :  { %673 = vmax.xlane.f32.xlu0 %v672_v59 }
 0x25c   :  { %508 = vrot.lane.b32.xlu0 %v5262_v10, %s5168_s15 }
 0x2bf   :  { %v653_v60 = vpop.xlane.xlu0 %652 }
 0x2c0   :  { %v676_v30 = vmul.f32 %v5496_v2, %v653_v60 }
 0x2c1   :  { %v657_v61 = vpop.xlane.xlu1 %656 }
 0x2c2   :  { %v679_v23 = vmul.f32 %v5491_v63, %v657_v61 }
 0x2c3   :  { %v660_v62 = vpop.xlane.xlu0 %659 }
 0x2c4   :  { %v680_v26 = vmul.f32 %v5491_v63, %v660_v62 }
 0x2c5   :  { %v664_v7 = vpop.xlane.xlu1 %663 }
 0x2c6   :  { %v682_v35 = vadd.f32 %v680_v26, %v676_v30  ;;  %v683_v37 = vmul.f32 %v5504_v28, %v664_v7 }
 0x2c7   :  { %v650_v11 = vpop.xlane.xlu0 %649 }
 0x2c8   :  { %v675_v13 = vmul.f32 %v5496_v2, %v650_v11 }
 0x2c9   :  { %v671_v46 = vpop.xlane.xlu1 %670 }
 0x2ca   :  { %v681_v32 = vadd.f32 %v679_v23, %v675_v13  ;;  %v687_v54 = vmul.f32 %v5512_v40, %v671_v46 }
 0x2cb   :  { %v667_v29 = vpop.xlane.xlu0 %666 }
 0x2cc   :  { %v684_v34 = vmul.f32 %v5504_v28, %v667_v29  ;;  %v685_v51 = vadd.f32 %v683_v37, %v681_v32 }
 0x2ce   :  { %v686_v41 = vadd.f32 %v684_v34, %v682_v35  ;;  %v689_v56 = vadd.f32 %v687_v54, %v685_v51 }
 0x2cf   :  { %v674_v49 = vpop.xlane.xlu0 %673 }
 0x2d0   :  { %v688_v53 = vmul.f32 %v5512_v40, %v674_v49  ;;  %v691_v59 = vsub.f32 %v639_v50, %v689_v56 }
 0x2d2   :  { %v690_v55 = vadd.f32 %v688_v53, %v686_v41  ;;  %v693_v60 = vmul.f32 1.442695, %v691_v59 }
 0x2d4   :  { %v692_v57 = vsub.f32 %v644_v48, %v690_v55  ;;  %v5544_v48 = vpop.permute.xlu0 %508 }
 0x2d5   :  { %v525_v50 = vmul.f32 %v5544_v48, %v5337_v24 }
 0x2d6   :  { %v695_v58 = vmul.f32 1.442695, %v692_v57 }
 0x2d8   :  { %5040 = vpow2.f32 %v695_v58 }
 0x2d9   :  { %5042 = vpow2.f32 %v693_v60 }
 0x2e5   :  { %v5516_v61 = vpop.eup %5040 }
 0x2e6   :  { %719 = vrot.lane.b32.xlu1 %v5516_v61, %s5166_s12  ;;  %707 = vrot.lane.b32.xlu0 %v5516_v61, %s5169_s16  ;;  %v5526_v42 = vpop.eup %5042  ;;  %v700_v62 = vsel %vm647_vm9, %v5516_v61, 0.0 }
 0x2e7   :  { %v697_v55 = vsel %vm647_vm9, %v5526_v42, 0.0 }
 0x2ea   :  { %731 = vrot.lane.b32.xlu1 %v5516_v61, %s5170_s17  ;;  %504 = vrot.lane.b32.xlu0 %v5279_v12, %s5168_s15 }
 0x2ee   :  { %705 = vrot.lane.b32.xlu1 %v5526_v42, %s5169_s16  ;;  %500 = vrot.lane.b32.xlu0 %v5298_v14, %s5168_s15 }
 0x2f2   :  { %717 = vrot.lane.b32.xlu1 %v5526_v42, %s5166_s12  ;;  %496 = vrot.lane.b32.xlu0 %v5308_v15, %s5168_s15 }
 0x2f6   :  { %506 = vrot.lane.b32.xlu1 %v5262_v10, %s5168_s15  ;;  %729 = vrot.lane.b32.xlu0 %v5526_v42, %s5170_s17 }
 0x2fa   :  { %502 = vrot.lane.b32.xlu1 %v5279_v12, %s5168_s15 }
 0x2fe   :  { %498 = vrot.lane.b32.xlu1 %v5298_v14, %s5168_s15 }
 0x302   :  { %494 = vrot.lane.b32.xlu1 %v5308_v15, %s5168_s15 }
 0x306   :  { %783 = vrot.lane.b32.xlu1 %v525_v50, %s5168_s15 }
 0x315   :  { %701 = vadd.xlane.f32.xlu0 %v700_v62 }
 0x358   :  { %v720_v11 = vpop.permute.xlu1 %719  ;;  %v708_v13 = vpop.permute.xlu0 %707 }
 0x359   :  { %v714_v56 = vsel %vm647_vm9, %v708_v13, 0.0  ;;  %v726_v58 = vsel %vm647_vm9, %v720_v11, 0.0 }
 0x35c   :  { %v732_v7 = vpop.permute.xlu1 %731  ;;  %v5553_v23 = vpop.permute.xlu0 %504 }
 0x35d   :  { %v523_v26 = vmul.f32 %v5553_v23, %v5337_v24  ;;  %v738_v60 = vsel %vm647_vm9, %v732_v7, 0.0 }
 0x35f   :  { %779 = vrot.lane.b32.xlu1 %v523_v26, %s5168_s15 }
 0x360   :  { %v706_v29 = vpop.permute.xlu1 %705  ;;  %v5562_v35 = vpop.permute.xlu0 %500 }
 0x361   :  { %v521_v46 = vmul.f32 %v5562_v35, %v5337_v24  ;;  %v711_v59 = vsel %vm647_vm9, %v706_v29, 0.0 }
 0x364   :  { %v718_v30 = vpop.permute.xlu1 %717  ;;  %v5583_v57 = vpop.permute.xlu0 %496 }
 0x365   :  { %v723_v50 = vsel %vm647_vm9, %v718_v30, 0.0  ;;  %v519_v13 = vmul.f32 %v5583_v57, %v5337_v24 }
 0x368   :  { %v5558_v32 = vpop.permute.xlu1 %506  ;;  %v730_v62 = vpop.permute.xlu0 %729 }
 0x369   :  { %v524_v34 = vmul.f32 %v5558_v32, %v5342_v27  ;;  %v735_v26 = vsel %vm647_vm9, %v730_v62, 0.0 }
 0x36b   :  { %781 = vrot.lane.b32.xlu0 %v524_v34, %s5168_s15 }
 0x36c   :  { %v5565_v37 = vpop.permute.xlu1 %502 }
 0x36d   :  { %v522_v49 = vmul.f32 %v5565_v37, %v5342_v27 }
 0x36f   :  { %777 = vrot.lane.b32.xlu1 %v522_v49, %s5168_s15  ;;  %775 = vrot.lane.b32.xlu0 %v521_v46, %s5168_s15 }
 0x370   :  { %v5573_v51 = vpop.permute.xlu1 %498 }
 0x371   :  { %v520_v41 = vmul.f32 %v5573_v51, %v5342_v27 }
 0x373   :  { %773 = vrot.lane.b32.xlu1 %v520_v41, %s5168_s15 }
 0x374   :  { %v5578_v53 = vpop.permute.xlu1 %494 }
 0x375   :  { %v518_v11 = vmul.f32 %v5578_v53, %v5342_v27 }
 0x378   :  { %v784_v54 = vpop.permute.xlu1 %783 }
 0x379   :  { %4649 = vmatprep.subr.mxu0 %v784_v54 }
 0x37a   :  { %4650 = vmatpush3.msra.mxu0 %v784_v54 }
 0x38e   :  { %698 = vadd.xlane.f32.xlu0 %v697_v55 }
 0x392   :  { %715 = vadd.xlane.f32.xlu0 %v714_v56 }
 0x396   :  { %727 = vadd.xlane.f32.xlu0 %v726_v58 }
 0x397   :  { %712 = vadd.xlane.f32.xlu1 %v711_v59 }
 0x39a   :  { %739 = vadd.xlane.f32.xlu0 %v738_v60 }
 0x39b   :  { %724 = vadd.xlane.f32.xlu1 %v723_v50 }
 0x39e   :  { %v702_v24 = vpop.xlane.xlu0 %701 }
 0x39f   :  { %736 = vadd.xlane.f32.xlu1 %v735_v26  ;;  %v742_v46 = vmul.f32 %v5496_v2, %v702_v24 }
 0x3b0   :  { %771 = vrot.lane.b32.xlu0 %v519_v13, %s5168_s15  ;;  %769 = vrot.lane.b32.xlu1 %v518_v11, %s5168_s15 }
 0x3b4   :  { %885 = vrot.lane.b32.xlu0 %v5210_v0, %s5165_s9  ;;  %883 = vrot.lane.b32.xlu1 %v5215_v1, %s5165_s9 }
 0x3b8   :  { %881 = vrot.lane.b32.xlu0 %v5227_v4, %s5165_s9  ;;  %879 = vrot.lane.b32.xlu1 %v5238_v6, %s5165_s9 }
 0x3bc   :  { %892 = vrot.lane.b32.xlu0 %v5332_v21, %s5165_s9 }
 0x3d1   :  { %v780_v27 = vpop.permute.xlu1 %779 }
 0x3dd   :  { %v782_v7 = vpop.permute.xlu0 %781 }
 0x3de   :  { %4651 = vmatprep.subr.mxu0 %v782_v7 }
 0x3df   :  { %4652 = vmatpush3.msra.mxu0 %v782_v7 }
 0x3e0   :  { %4653 = vmatprep.subr.mxu0 %v780_v27 }
 0x3e1   :  { %v778_v29 = vpop.permute.xlu1 %777  ;;  %4654 = vmatpush3.msra.mxu0 %v780_v27  ;;  %v776_v0 = vpop.permute.xlu0 %775 }
 0x3e2   :  { %4655 = vmatprep.subr.mxu0 %v778_v29 }
 0x3e3   :  { %4656 = vmatpush3.msra.mxu0 %v778_v29 }
 0x3e4   :  { %4657 = vmatprep.subr.mxu0 %v776_v0 }
 0x3e5   :  { %v774_v1 = vpop.permute.xlu1 %773  ;;  %4658 = vmatpush3.msra.mxu0 %v776_v0 }
 0x3e6   :  { %4659 = vmatprep.subr.mxu0 %v774_v1 }
 0x3e7   :  { %4660 = vmatpush3.msra.mxu0 %v774_v1 }
 0x417   :  { %v699_v4 = vpop.xlane.xlu0 %698 }
 0x418   :  { %v741_v59 = vmul.f32 %v5496_v2, %v699_v4 }
 0x41b   :  { %v716_v6 = vpop.xlane.xlu0 %715 }
 0x41c   :  { %v746_v21 = vmul.f32 %v5491_v63, %v716_v6 }
 0x41e   :  { %v748_v55 = vadd.f32 %v746_v21, %v742_v46 }
 0x41f   :  { %v728_v30 = vpop.xlane.xlu0 %727 }
 0x420   :  { %v713_v34 = vpop.xlane.xlu1 %712  ;;  %v750_v49 = vmul.f32 %v5504_v28, %v728_v30 }
 0x421   :  { %v745_v41 = vmul.f32 %v5491_v63, %v713_v34 }
 0x422   :  { %v752_v50 = vadd.f32 %v750_v49, %v748_v55 }
 0x423   :  { %v740_v54 = vpop.xlane.xlu0 %739  ;;  %v747_v62 = vadd.f32 %v745_v41, %v741_v59 }
 0x424   :  { %v754_v56 = vmul.f32 %v5512_v40, %v740_v54  ;;  %v725_v58 = vpop.xlane.xlu1 %724 }
 0x425   :  { %v749_v60 = vmul.f32 %v5504_v28, %v725_v58 }
 0x426   :  { %v756_v13 = vadd.f32 %v754_v56, %v752_v50 }
 0x427   :  { %v772_v26 = vpop.permute.xlu0 %771  ;;  %v751_v24 = vadd.f32 %v749_v60, %v747_v62 }
 0x428   :  { %v737_v11 = vpop.xlane.xlu1 %736  ;;  %4661 = vmatprep.subr.mxu0 %v772_v26  ;;  %5044 = vrcp.f32 %v756_v13 }
 0x429   :  { %v753_v27 = vmul.f32 %v5512_v40, %v737_v11  ;;  %4662 = vmatpush3.msra.mxu0 %v772_v26 }
 0x42b   :  { %v755_v7 = vadd.f32 %v753_v27, %v751_v24  ;;  %v886_v0 = vpop.permute.xlu0 %885 }
 0x42c   :  { %v770_v29 = vpop.permute.xlu1 %769 }
 0x42d   :  { %5046 = vrcp.f32 %v755_v7  ;;  %4663 = vmatprep.subr.mxu0 %v770_v29 }
 0x42e   :  { %4664 = vmatpush3.msra.mxu0 %v770_v29 }
 0x42f   :  { %4668 = vmatprep.subr.mxu0 %v886_v0  ;;  %v882_v34 = vpop.permute.xlu0 %881 }
 0x430   :  { %v884_v30 = vpop.permute.xlu1 %883 }
 0x434   :  { %v880_v46 = vpop.permute.xlu1 %879 }
 0x435   :  { %v5045_v1 = vpop.eup %5044 }
 0x436   :  { %v760_v21 = vmul.f32 %v5045_v1, %v5516_v61  ;;  %v893_v61 = vpop.permute.xlu0 %892  ;;  %v364_v1 = vld [vmem:[%s6574_s2 + $0x38] sm:$0xff] }
 0x43a   :  { %v5047_v4 = vpop.eup %5046 }
 0x43b   :  { %v759_v6 = vmul.f32 %v5047_v4, %v5526_v42  ;;  %v362_v4 = vld [vmem:[%s6574_s2 + $0x28] sm:$0xff] }
 0x43d   :  { %4665 = vmatprep.mubr.msk.f32.mxu0 %vm793_vm2, %v759_v6 }
 0x43e   :  { %4666 = vmatmul.mubr.msk.f32.vlgmr.msra.gmra.mxu0 %vm793_vm2, %v760_v21  ;;  %v358_v21 = vld [vmem:[%s6574_s2 + $0x8] sm:$0xff] }
 0x43f   :  { %4669 = vmatpush3.msra.mxu0 %v886_v0 }
 0x440   :  { %4670 = vmatprep.subr.mxu0 %v884_v30 }
 0x441   :  { %4671 = vmatpush3.msra.mxu0 %v884_v30  ;;  %v360_v30 = vld [vmem:[%s6574_s2 + $0x18] sm:$0xff] }
 0x442   :  { %4672 = vmatprep.subr.mxu0 %v882_v34 }
 0x443   :  { %4673 = vmatpush3.msra.mxu0 %v882_v34  ;;  %v5648_v34 = vsub.s32 1, %v5316_v16 }
 0x444   :  { %4674 = vmatprep.subr.mxu0 %v880_v46 }
 0x445   :  { %4675 = vmatpush3.msra.mxu0 %v880_v46  ;;  %v1020_v46 = vrot.slane %v5326_v19, %v5648_v34 }
 0x446   :  { %4679 = vmatprep.subr.mxu0 %v364_v1 }
 0x4fe   :  { %v4667_v49 = vpop.f32.mrf.mxu0 }
 0x500   :  { %v866_v41 = vpop.f32.mrf.mxu0 }
 0x501   :  { %4676 = vmatprep.mubr.msk.f32.mxu0 %vm6603_vm3, %v866_v41  ;;  %vm6612_vm3 = vmmov %vm6608_vm0 }
 0x502   :  { %4677 = vmatmul.mubr.msk.f32.vlgmr.msra.gmra.mxu0 %vm6604_vm7, %v4667_v49  ;;  %vm6613_vm7 = vmmov %vm6608_vm0 }
 0x503   :  { %4680 = vmatpush3.msra.mxu0 %v364_v1  ;;  %v1120_v1 = vld [vmem:[%s6575_s3] sm:$0xff] }
 0x504   :  { %4681 = vmatprep.subr.mxu0 %v362_v4 }
 0x505   :  { %4682 = vmatpush3.msra.mxu0 %v362_v4 }
 0x506   :  { %4683 = vmatprep.subr.mxu0 %v360_v30 }
 0x507   :  { %4684 = vmatpush3.msra.mxu0 %v360_v30 }
 0x508   :  { %4685 = vmatprep.subr.mxu0 %v358_v21 }
 0x509   :  { %4686 = vmatpush3.msra.mxu0 %v358_v21 }
 0x5c2   :  { %v4678_v42 = vpop.f32.mrf.mxu0 }
 0x5c3   :  { %v973_v54 = vadd.f32 %v4678_v42, %v893_v61 }
 0x5c4   :  { %v967_v55 = vpop.f32.mrf.mxu0 }
 0x5c5   :  { %v968_v56 = vadd.f32 %v967_v55, %v893_v61  ;;  %v977_v58 = vadd.f32 %v973_v54, %v5257_v8 }
 0x5c7   :  { %v981_v59 = vsel %vm6605_vm13, %v977_v58, 0.0  ;;  %v976_v60 = vadd.f32 %v968_v56, %v5221_v3  ;;  %v5627_v3 = vsub.s32 2, %v5316_v16  ;;  %vm6614_vm13 = vmmov %vm6608_vm0 }
 0x5c8   :  { %982 = vadd.xlane.f32.xlu0 %v981_v59 }
 0x5c9   :  { %v978_v50 = vsel %vm6606_vm4, %v976_v60, 0.0  ;;  %v5637_v6 = vrot.slane %v5326_v19, %v5627_v3  ;;  %vm6615_vm4 = vmmov %vm6608_vm0 }
 0x5ca   :  { %979 = vadd.xlane.f32.xlu1 %v978_v50 }
 0x651   :  { %v983_v62 = vpop.xlane.xlu0 %982 }
 0x652   :  { %v986_v26 = vmul.f32 0.03125, %v983_v62 }
 0x653   :  { %v980_v13 = vpop.xlane.xlu1 %979 }
 0x654   :  { %v988_v11 = vsub.f32 %v977_v58, %v986_v26  ;;  %v985_v24 = vmul.f32 0.03125, %v980_v13 }
 0x656   :  { %v987_v27 = vsub.f32 %v976_v60, %v985_v24  ;;  %v990_v7 = vmul.f32 %v988_v11, %v988_v11  ;;  %v1127_v24 = vld [vmem:[%s6575_s3 + $0x38] sm:$0xff] }
 0x657   :  { %4690 = vmatprep.subr.mxu1 %v1127_v24 }
 0x658   :  { %v994_v29 = vsel %vm6607_vm12, %v990_v7, 0.0  ;;  %v989_v0 = vmul.f32 %v987_v27, %v987_v27  ;;  %4691 = vmatpush3.msra.mxu1 %v1127_v24  ;;  %v1124_v7 = vld [vmem:[%s6575_s3 + $0x20] sm:$0xff]  ;;  %vm6616_vm12 = vmmov %vm6608_vm0 }
 0x659   :  { %995 = vadd.xlane.f32.xlu1 %v994_v29  ;;  %v1123_v29 = vld [vmem:[%s6575_s3 + $0x18] sm:$0xff] }
 0x65a   :  { %v991_v8 = vsel %vm6608_vm0, %v989_v0, 0.0  ;;  %v1122_v0 = vld [vmem:[%s6575_s3 + $0x10] sm:$0xff] }
 0x65b   :  { %992 = vadd.xlane.f32.xlu0 %v991_v8  ;;  %v1121_v8 = vld [vmem:[%s6575_s3 + $0x8] sm:$0xff] }
 0x66a   :  { %1129 = vrot.lane.b32.xlu1 %v1020_v46, %s5168_s15 }
 0x671   :  { %1012 = vrot.lane.b32.xlu0 %v5637_v6, %s5166_s12 }
 0x6e2   :  { %v996_v49 = vpop.xlane.xlu1 %995 }
 0x6e3   :  { %v998_v41 = vmul.f32 0.03125, %v996_v49 }
 0x6e4   :  { %v993_v61 = vpop.xlane.xlu0 %992 }
 0x6e5   :  { %v1000_v42 = vadd.f32 1e-05, %v998_v41  ;;  %v997_v54 = vmul.f32 0.03125, %v993_v61 }
 0x6e7   :  { %5048 = vrsqrt.f32 %v1000_v42  ;;  %v999_v55 = vadd.f32 1e-05, %v997_v54 }
 0x6e8   :  { %v1013_v26 = vpop.permute.xlu0 %1012 }
 0x6e9   :  { %5050 = vrsqrt.f32 %v999_v55 }
 0x6f4   :  { %v5049_v56 = vpop.eup %5048 }
 0x6f5   :  { %v1004_v58 = vmul.f32 %v5049_v56, %v988_v11  ;;  %v1126_v11 = vld [vmem:[%s6575_s3 + $0x30] sm:$0xff] }
 0x6f6   :  { %v5051_v59 = vpop.eup %5050  ;;  %4692 = vmatprep.subr.mxu1 %v1126_v11 }
 0x6f7   :  { %v1003_v60 = vmul.f32 %v5051_v59, %v987_v27  ;;  %v1010_v50 = vmul.f32 %v5637_v6, %v1004_v58  ;;  %v1125_v27 = vld [vmem:[%s6575_s3 + $0x28] sm:$0xff]  ;;  %4693 = vmatpush3.msra.mxu1 %v1126_v11 }
 0x6f8   :  { %4694 = vmatprep.subr.mxu1 %v1125_v27 }
 0x6f9   :  { %v1009_v62 = vmul.f32 %v5637_v6, %v1003_v60  ;;  %v1016_v13 = vadd.f32 %v1013_v26, %v1010_v50  ;;  %4695 = vmatpush3.msra.mxu1 %v1125_v27 }
 0x6fa   :  { %4696 = vmatprep.subr.mxu1 %v1124_v7 }
 0x6fb   :  { %v1015_v19 = vadd.f32 %v1013_v26, %v1009_v62  ;;  %4697 = vmatpush3.msra.mxu1 %v1124_v7 }
 0x6fc   :  { %4698 = vmatprep.subr.mxu1 %v1123_v29 }
 0x6fd   :  { %4687 = vmatprep.mubr.msk.f32.mxu0 %vm6609_vm14, %v1015_v19  ;;  %4699 = vmatpush3.msra.mxu1 %v1123_v29  ;;  %vm6617_vm14 = vmmov %vm6608_vm0 }
 0x6fe   :  { %4688 = vmatmul.mubr.msk.f32.vlgmr.msra.gmra.mxu0 %vm6610_vm6, %v1016_v13  ;;  %4700 = vmatprep.subr.mxu1 %v1122_v0  ;;  %vm6618_vm6 = vmmov %vm6608_vm0 }
 0x6ff   :  { %4701 = vmatpush3.msra.mxu1 %v1122_v0 }
 0x700   :  { %4702 = vmatprep.subr.mxu1 %v1121_v8 }
 0x701   :  { %4703 = vmatpush3.msra.mxu1 %v1121_v8 }
 0x702   :  { %4704 = vmatprep.subr.mxu1 %v1120_v1 }
 0x703   :  { %4705 = vmatpush3.msra.mxu1 %v1120_v1 }
 0x7be   :  { %v4689_v4 = vpop.f32.mrf.mxu0 }
 0x7bf   :  { %v1099_v30 = vadd.f32 %v4689_v4, %v1020_v46 }
 0x7c0   :  { %v1093_v21 = vpop.f32.mrf.mxu0 }
 0x7c1   :  { %v1105_v49 = vmul.f32 0.044715, %v1099_v30  ;;  %v1094_v41 = vadd.f32 %v1093_v21, %v1020_v46  ;;  %v1103_v7 = vmul.f32 0.5, %v1099_v30  ;;  %v1130_v46 = vpop.permute.xlu1 %1129 }
 0x7c3   :  { %v1107_v61 = vmul.f32 %v1105_v49, %v1099_v30  ;;  %v1104_v42 = vmul.f32 0.044715, %v1094_v41  ;;  %v1102_v11 = vmul.f32 0.5, %v1094_v41 }
 0x7c5   :  { %v1109_v54 = vmul.f32 %v1107_v61, %v1099_v30  ;;  %v1106_v55 = vmul.f32 %v1104_v42, %v1094_v41 }
 0x7c7   :  { %v1111_v56 = vadd.f32 %v1109_v54, %v1099_v30  ;;  %v1108_v58 = vmul.f32 %v1106_v55, %v1094_v41 }
 0x7c9   :  { %v1113_v59 = vmul.f32 0.7978846, %v1111_v56  ;;  %v1110_v60 = vadd.f32 %v1108_v58, %v1094_v41 }
 0x7cb   :  { %5052 = vtanh.f32 %v1113_v59  ;;  %v1112_v50 = vmul.f32 0.7978846, %v1110_v60 }
 0x7cd   :  { %5054 = vtanh.f32 %v1112_v50 }
 0x7d8   :  { %v5053_v62 = vpop.eup %5052 }
 0x7d9   :  { %v1117_v24 = vadd.f32 1.0, %v5053_v62 }
 0x7da   :  { %v5055_v26 = vpop.eup %5054 }
 0x7db   :  { %v1116_v27 = vadd.f32 1.0, %v5055_v26  ;;  %v1119_v0 = vmul.f32 %v1117_v24, %v1103_v7  ;;  %v5701_v26 = vld [vmem:[%s6574_s2 + $0x60] sm:$0xff]  ;;  %v5708_v24 = vld [vmem:[%s6574_s2 + $0x50] sm:$0xff] }
 0x7dd   :  { %v1118_v29 = vmul.f32 %v1116_v27, %v1102_v11 }
 0x7df   :  { %4706 = vmatprep.mubr.msk.f32.mxu1 %vm793_vm2, %v1118_v29 }
 0x7e0   :  { %4707 = vmatmul.mubr.msk.f32.vlgmr.msra.gmra.mxu1 %vm793_vm2, %v1119_v0 }
 0x8a0   :  { %v4708_v8 = vpop.f32.mrf.mxu1 }
 0x8a1   :  { %v1210_v1 = vadd.f32 %v4708_v8, %v1130_v46 }
 0x8a2   :  { %v1204_v4 = vpop.f32.mrf.mxu1 }
 0x8a3   :  { %v1205_v21 = vadd.f32 %v1204_v4, %v1130_v46  ;;  %v1214_v49 = vadd.f32 %v1210_v1, %v1016_v13 }
 0x8a5   :  { %v1218_v61 = vsel %vm6611_vm11, %v1214_v49, 0.0  ;;  %v1213_v42 = vadd.f32 %v1205_v21, %v1015_v19  ;;  %v5690_v19 = vld [vmem:[%s6574_s2 + $0x70] sm:$0xff]  ;;  %vm6619_vm11 = vmmov %vm6608_vm0 }
 0x8a6   :  { %1219 = vadd.xlane.f32.xlu0 %v1218_v61  ;;  %4709 = vmatprep.subr.mxu0 %v5690_v19 }
 0x8a7   :  { %v1215_v41 = vsel %vm6612_vm3, %v1213_v42, 0.0  ;;  %4710 = vmatpush3.msra.mxu0 %v5690_v19  ;;  %vm6620_vm3 = vmmov %vm6608_vm0 }
 0x8a8   :  { %1216 = vadd.xlane.f32.xlu1 %v1215_v41  ;;  %4711 = vmatprep.subr.mxu0 %v5701_v26 }
 0x8a9   :  { %4712 = vmatpush3.msra.mxu0 %v5701_v26 }
 0x8aa   :  { %4713 = vmatprep.subr.mxu0 %v5708_v24 }
 0x8ab   :  { %4714 = vmatpush3.msra.mxu0 %v5708_v24 }
 0x92f   :  { %v1220_v30 = vpop.xlane.xlu0 %1219 }
 0x930   :  { %v1222_v54 = vmul.f32 0.03125, %v1220_v30 }
 0x931   :  { %v1217_v55 = vpop.xlane.xlu1 %1216 }
 0x932   :  { %v1224_v56 = vsub.f32 %v1214_v49, %v1222_v54  ;;  %v1221_v58 = vmul.f32 0.03125, %v1217_v55  ;;  %v5730_v55 = vld [vmem:[%s6576_s4 + $0x4] sm:$0xf] }
 0x934   :  { %v1223_v59 = vsub.f32 %v1213_v42, %v1221_v58  ;;  %v1226_v60 = vmul.f32 %v1224_v56, %v1224_v56 }
 0x936   :  { %v1230_v50 = vsel %vm6613_vm7, %v1226_v60, 0.0  ;;  %v1225_v62 = vmul.f32 %v1223_v59, %v1223_v59  ;;  %vm6621_vm7 = vmmov %vm6608_vm0 }
 0x937   :  { %1231 = vadd.xlane.f32.xlu1 %v1230_v50 }
 0x938   :  { %v1227_v13 = vsel %vm6614_vm13, %v1225_v62, 0.0  ;;  %vm6622_vm13 = vmmov %vm6608_vm0 }
 0x939   :  { %1228 = vadd.xlane.f32.xlu0 %v1227_v13 }
 0x948   :  { %1246 = vrot.lane.b32.xlu1 %v5637_v6, %s5165_s9 }
 0x94f   :  { %1241 = vrot.lane.b32.xlu0 %v5637_v6, %s5168_s15  ;;  %v5714_v6 = vld [vmem:[%s6574_s2 + $0x40] sm:$0xff] }
 0x950   :  { %4715 = vmatprep.subr.mxu0 %v5714_v6 }
 0x951   :  { %4716 = vmatpush3.msra.mxu0 %v5714_v6 }
 0x9c0   :  { %v1232_v11 = vpop.xlane.xlu1 %1231 }
 0x9c1   :  { %v1234_v27 = vmul.f32 0.03125, %v1232_v11 }
 0x9c2   :  { %v1229_v7 = vpop.xlane.xlu0 %1228 }
 0x9c3   :  { %v1236_v29 = vadd.f32 1e-05, %v1234_v27  ;;  %v1233_v0 = vmul.f32 0.03125, %v1229_v7 }
 0x9c4   :  { %v1247_v41 = vpop.permute.xlu1 %1246 }
 0x9c5   :  { %5056 = vrsqrt.f32 %v1236_v29  ;;  %v1235_v46 = vadd.f32 1e-05, %v1233_v0 }
 0x9c6   :  { %v1242_v1 = vpop.permute.xlu0 %1241 }
 0x9c7   :  { %5058 = vrsqrt.f32 %v1235_v46 }
 0x9d2   :  { %v5057_v8 = vpop.eup %5056 }
 0x9d3   :  { %v1240_v4 = vmul.f32 %v5057_v8, %v1224_v56  ;;  %v5734_v56 = vrot.slane %v5730_v55, %v5319_v17 }
 0x9d4   :  { %v5059_v21 = vpop.eup %5058 }
 0x9d5   :  { %v1239_v49 = vmul.f32 %v5059_v21, %v1223_v59  ;;  %v1245_v61 = vmul.f32 %v1242_v1, %v1240_v4 }
 0x9d7   :  { %v1244_v42 = vmul.f32 %v1242_v1, %v1239_v49  ;;  %v5721_v54 = vadd.f32 %v1247_v41, %v1245_v61 }
 0x9d9   :  { %v5719_v30 = vadd.f32 %v1247_v41, %v1244_v42 }
 0x9db   :  { %4717 = vmatprep.mubr.msk.f32.mxu0 %vm6615_vm4, %v5719_v30  ;;  %vm6623_vm4 = vmmov %vm6608_vm0 }
 0x9dc   :  { %4718 = vmatmul.mubr.msk.f32.vlgmr.msra.gmra.mxu0 %vm6616_vm12, %v5721_v54  ;;  %vm6624_vm12 = vmmov %vm6608_vm0 }
 0xa9c   :  { %v4719_v58 = vpop.f32.mrf.mxu0 }
 0xa9d   :  { %v5737_v59 = vadd.f32 %v4719_v58, %v5734_v56 }
 0xa9e   :  { %v1338_v60 = vpop.f32.mrf.mxu0 }
 0xa9f   :  { %v5740_v50 = vadd.f32 %v1338_v60, %v5734_v56  ;;  %v1356_v62 = vmul.f32 %v5737_v59, %v5321_v18  ;;  %v1354_v27 = vmul.f32 %v5737_v59, %v5328_v20  ;;  %v1352_v29 = vmul.f32 %v5737_v59, %v5350_v31 }
 0xaa0   :  { %v1350_v46 = vmul.f32 %v5737_v59, %v5364_v36  ;;  %v1348_v60 = vmul.f32 0.35355338, %v5737_v59 }
 0xaa1   :  { %1387 = vrot.lane.b32.xlu1 %v1356_v62, %s5166_s12  ;;  %v1355_v13 = vmul.f32 %v5740_v50, %v5334_v22  ;;  %v1347_v11 = vmul.f32 0.35355338, %v5740_v50  ;;  %v1353_v7 = vmul.f32 %v5740_v50, %v5339_v25  ;;  %v1351_v0 = vmul.f32 %v5740_v50, %v5356_v33 }
 0xaa2   :  { %v1349_v8 = vmul.f32 %v5740_v50, %v5369_v38 }
 0xaa3   :  { %1385 = vrot.lane.b32.xlu0 %v1355_v13, %s5166_s12  ;;  %4736 = vmatprep.mubr.msk.f32.mxu0 %vm6608_vm0, %v1347_v11 }
 0xaa5   :  { %1383 = vrot.lane.b32.xlu1 %v1354_v27, %s5166_s12 }
 0xaa7   :  { %1381 = vrot.lane.b32.xlu0 %v1353_v7, %s5166_s12 }
 0xaa9   :  { %1379 = vrot.lane.b32.xlu1 %v1352_v29, %s5166_s12 }
 0xaab   :  { %1377 = vrot.lane.b32.xlu0 %v1351_v0, %s5166_s12 }
 0xaad   :  { %1375 = vrot.lane.b32.xlu1 %v1350_v46, %s5166_s12 }
 0xaaf   :  { %1373 = vrot.lane.b32.xlu0 %v1349_v8, %s5166_s12 }
 0xb13   :  { %v1388_v1 = vpop.permute.xlu1 %1387 }
 0xb14   :  { %4720 = vmatprep.subr.msk.mxu0 %vm6617_vm14, %v1388_v1  ;;  %vm6625_vm14 = vmmov %vm6608_vm0 }
 0xb15   :  { %4721 = vmatpush3.xpose.msk.msra.mxu0 %vm6618_vm6, %v1388_v1  ;;  %v1386_v4 = vpop.permute.xlu0 %1385  ;;  %vm6626_vm6 = vmmov %vm6608_vm0 }
 0xb16   :  { %4722 = vmatprep.subr.msk.mxu0 %vm6619_vm11, %v1386_v4  ;;  %vm6627_vm11 = vmmov %vm6608_vm0 }
 0xb17   :  { %v1384_v21 = vpop.permute.xlu1 %1383 }
 0xb19   :  { %4723 = vmatpush3.xpose.msk.msra.mxu0 %vm6620_vm3, %v1386_v4  ;;  %v1382_v49 = vpop.permute.xlu0 %1381  ;;  %vm6628_vm3 = vmmov %vm6608_vm0 }
 0xb1a   :  { %4724 = vmatprep.subr.msk.mxu0 %vm6621_vm7, %v1384_v21  ;;  %vm6629_vm7 = vmmov %vm6608_vm0 }
 0xb1b   :  { %v1380_v61 = vpop.permute.xlu1 %1379 }
 0xb1d   :  { %4725 = vmatpush3.xpose.msk.msra.mxu0 %vm6622_vm13, %v1384_v21  ;;  %v1378_v42 = vpop.permute.xlu0 %1377  ;;  %vm6630_vm13 = vmmov %vm6608_vm0 }
 0xb1e   :  { %4726 = vmatprep.subr.msk.mxu0 %vm6623_vm4, %v1382_v49  ;;  %vm6631_vm4 = vmmov %vm6608_vm0 }
 0xb1f   :  { %v1376_v41 = vpop.permute.xlu1 %1375 }
 0xb21   :  { %4727 = vmatpush3.xpose.msk.msra.mxu0 %vm6624_vm12, %v1382_v49  ;;  %v1374_v58 = vpop.permute.xlu0 %1373  ;;  %vm6632_vm12 = vmmov %vm6608_vm0 }
 0xb22   :  { %4728 = vmatprep.subr.msk.mxu0 %vm6608_vm0, %v1380_v61 }
 0xb25   :  { %4729 = vmatpush3.xpose.msk.msra.mxu0 %vm6625_vm14, %v1380_v61  ;;  %vm6633_vm14 = vmmov %vm6608_vm0 }
 0xb26   :  { %4730 = vmatprep.subr.msk.mxu0 %vm6626_vm6, %v1378_v42  ;;  %vm6634_vm6 = vmmov %vm6608_vm0 }
 0xb29   :  { %4731 = vmatpush3.xpose.msk.msra.mxu0 %vm6627_vm11, %v1378_v42  ;;  %vm6635_vm11 = vmmov %vm6608_vm0 }
 0xb2a   :  { %4732 = vmatprep.subr.msk.mxu0 %vm6628_vm3, %v1376_v41  ;;  %vm6636_vm3 = vmmov %vm6608_vm0 }
 0xb2d   :  { %4733 = vmatpush3.xpose.msk.msra.mxu0 %vm6629_vm7, %v1376_v41  ;;  %vm6637_vm7 = vmmov %vm6608_vm0 }
 0xb2e   :  { %4734 = vmatprep.subr.msk.mxu0 %vm6630_vm13, %v1374_v58  ;;  %vm6638_vm13 = vmmov %vm6608_vm0 }
 0xb31   :  { %4735 = vmatpush3.xpose.msk.msra.mxu0 %vm6631_vm4, %v1374_v58  ;;  %vm6639_vm4 = vmmov %vm6608_vm0 }
 0xb34   :  { %4737 = vmatmul.mubr.msk.f32.vlgmr.msra.gmra.mxu0 %vm6632_vm12, %v1348_v60  ;;  %vm6640_vm12 = vmmov %vm6608_vm0 }
 0xbf4   :  { %v4738_v62 = vpop.f32.mrf.mxu0 }
 0xbf5   :  { %v1483_v13 = vadd.f32 %v4738_v62, %v5467_v45 }
 0xbf6   :  { %v1477_v11 = vpop.f32.mrf.mxu0 }
 0xbf7   :  { %v1478_v27 = vadd.f32 %v1477_v11, %v5472_v47  ;;  %v1495_v7 = vsel %vm654_vm8, %v1483_v13, -inf  ;;  %v1489_v29 = vsel %vm647_vm9, %v1483_v13, -inf  ;;  %v1501_v1 = vsel %vm661_vm5, %v1483_v13, -inf }
 0xbf8   :  { %1496 = vmax.xlane.f32.xlu1 %v1495_v7  ;;  %1490 = vmax.xlane.f32.xlu0 %v1489_v29  ;;  %v1507_v47 = vsel %vm668_vm10, %v1483_v13, -inf }
 0xbf9   :  { %v1492_v0 = vsel %vm654_vm8, %v1478_v27, -inf  ;;  %v1486_v46 = vsel %vm647_vm9, %v1478_v27, -inf  ;;  %v1498_v8 = vsel %vm661_vm5, %v1478_v27, -inf  ;;  %v1504_v45 = vsel %vm668_vm10, %v1478_v27, -inf }
 0xbfc   :  { %1493 = vmax.xlane.f32.xlu0 %v1492_v0  ;;  %1487 = vmax.xlane.f32.xlu1 %v1486_v46 }
 0xc00   :  { %1499 = vmax.xlane.f32.xlu0 %v1498_v8  ;;  %1502 = vmax.xlane.f32.xlu1 %v1501_v1 }
 0xc04   :  { %1505 = vmax.xlane.f32.xlu0 %v1504_v45  ;;  %1508 = vmax.xlane.f32.xlu1 %v1507_v47 }
 0xc81   :  { %v1497_v4 = vpop.xlane.xlu1 %1496  ;;  %v1491_v21 = vpop.xlane.xlu0 %1490 }
 0xc82   :  { %v1515_v42 = vmul.f32 %v5491_v63, %v1497_v4  ;;  %v1511_v41 = vmul.f32 %v5496_v2, %v1491_v21 }
 0xc84   :  { %v1517_v0 = vadd.f32 %v1515_v42, %v1511_v41 }
 0xc85   :  { %v1494_v49 = vpop.xlane.xlu0 %1493  ;;  %v1488_v61 = vpop.xlane.xlu1 %1487 }
 0xc86   :  { %v1514_v58 = vmul.f32 %v5491_v63, %v1494_v49  ;;  %v1510_v60 = vmul.f32 %v5496_v2, %v1488_v61 }
 0xc88   :  { %v1516_v46 = vadd.f32 %v1514_v58, %v1510_v60 }
 0xc89   :  { %v1500_v62 = vpop.xlane.xlu0 %1499  ;;  %v1503_v11 = vpop.xlane.xlu1 %1502 }
 0xc8a   :  { %v1518_v7 = vmul.f32 %v5504_v28, %v1500_v62  ;;  %v1519_v29 = vmul.f32 %v5504_v28, %v1503_v11 }
 0xc8c   :  { %v1520_v45 = vadd.f32 %v1518_v7, %v1516_v46  ;;  %v1521_v47 = vadd.f32 %v1519_v29, %v1517_v0 }
 0xc8d   :  { %v1506_v8 = vpop.xlane.xlu0 %1505  ;;  %v1509_v1 = vpop.xlane.xlu1 %1508 }
 0xc8e   :  { %v1522_v4 = vmul.f32 %v5512_v40, %v1506_v8  ;;  %v1523_v21 = vmul.f32 %v5512_v40, %v1509_v1  ;;  %v1358_v8 = vmul.f32 %v5737_v59, %v5583_v57  ;;  %v1357_v1 = vmul.f32 %v5740_v50, %v5578_v53 }
 0xc90   :  { %v1524_v52 = vadd.f32 %v1522_v4, %v1520_v45  ;;  %v1525_v49 = vadd.f32 %v1523_v21, %v1521_v47 }
 0xc92   :  { %v1527_v9 = vsub.f32 %v1483_v13, %v1525_v49  ;;  %v1526_v61 = vsub.f32 %v1478_v27, %v1524_v52 }
 0xc94   :  { %v1530_v5 = vmul.f32 1.442695, %v1527_v9  ;;  %v1528_v38 = vmul.f32 1.442695, %v1526_v61  ;;  %v1362_v9 = vmul.f32 %v5737_v59, %v5553_v23  ;;  %v1361_v23 = vmul.f32 %v5740_v50, %v5565_v37 }
 0xc96   :  { %5060 = vpow2.f32 %v1530_v5  ;;  %v1363_v5 = vmul.f32 %v5740_v50, %v5558_v32  ;;  %v1364_v32 = vmul.f32 %v5737_v59, %v5544_v48 }
 0xc97   :  { %5062 = vpow2.f32 %v1528_v38  ;;  %v1360_v38 = vmul.f32 %v5737_v59, %v5562_v35  ;;  %v1359_v35 = vmul.f32 %v5740_v50, %v5573_v51 }
 0xca3   :  { %v5804_v62 = vpop.eup %5060 }
 0xca4   :  { %1554 = vrot.lane.b32.xlu0 %v5804_v62, %s5166_s12  ;;  %1542 = vrot.lane.b32.xlu1 %v5804_v62, %s5169_s16  ;;  %v5810_v42 = vpop.eup %5062  ;;  %v1535_v52 = vsel %vm647_vm9, %v5804_v62, 0.0 }
 0xca5   :  { %v1532_v13 = vsel %vm647_vm9, %v5810_v42, 0.0 }
 0xca8   :  { %1540 = vrot.lane.b32.xlu0 %v5810_v42, %s5169_s16  ;;  %1552 = vrot.lane.b32.xlu1 %v5810_v42, %s5166_s12 }
 0xcac   :  { %1566 = vrot.lane.b32.xlu0 %v5804_v62, %s5170_s17  ;;  %1564 = vrot.lane.b32.xlu1 %v5810_v42, %s5170_s17 }
 0xcb0   :  { %1616 = vrot.lane.b32.xlu1 %v1363_v5, %s5168_s15 }
 0xcb4   :  { %1614 = vrot.lane.b32.xlu1 %v1362_v9, %s5168_s15 }
 0xcb8   :  { %1610 = vrot.lane.b32.xlu1 %v1360_v38, %s5168_s15 }
 0xccb   :  { %1536 = vadd.xlane.f32.xlu0 %v1535_v52 }
 0xcdc   :  { %1533 = vadd.xlane.f32.xlu1 %v1532_v13 }
 0xce1   :  { %1618 = vrot.lane.b32.xlu0 %v1364_v32, %s5168_s15 }
 0xce5   :  { %1612 = vrot.lane.b32.xlu0 %v1361_v23, %s5168_s15 }
 0xce9   :  { %1608 = vrot.lane.b32.xlu0 %v1359_v35, %s5168_s15 }
 0xd16   :  { %v1555_v27 = vpop.permute.xlu0 %1554  ;;  %v1543_v41 = vpop.permute.xlu1 %1542 }
 0xd17   :  { %v1549_v58 = vsel %vm647_vm9, %v1543_v41, 0.0  ;;  %v1561_v48 = vsel %vm647_vm9, %v1555_v27, 0.0 }
 0xd18   :  { %1550 = vadd.xlane.f32.xlu1 %v1549_v58 }
 0xd1a   :  { %v1541_v60 = vpop.permute.xlu0 %1540  ;;  %v1553_v11 = vpop.permute.xlu1 %1552 }
 0xd1b   :  { %v1546_v7 = vsel %vm647_vm9, %v1541_v60, 0.0  ;;  %v1558_v51 = vsel %vm647_vm9, %v1553_v11, 0.0 }
 0xd1c   :  { %1562 = vadd.xlane.f32.xlu1 %v1561_v48  ;;  %1547 = vadd.xlane.f32.xlu0 %v1546_v7 }
 0xd1e   :  { %v1567_v37 = vpop.permute.xlu0 %1566  ;;  %v1565_v0 = vpop.permute.xlu1 %1564 }
 0xd1f   :  { %v1573_v29 = vsel %vm647_vm9, %v1567_v37, 0.0  ;;  %v1570_v46 = vsel %vm647_vm9, %v1565_v0, 0.0 }
 0xd20   :  { %1574 = vadd.xlane.f32.xlu1 %v1573_v29  ;;  %1559 = vadd.xlane.f32.xlu0 %v1558_v51 }
 0xd22   :  { %v1617_v57 = vpop.permute.xlu1 %1616 }
 0xd24   :  { %1571 = vadd.xlane.f32.xlu0 %v1570_v46 }
 0xd26   :  { %v1615_v45 = vpop.permute.xlu1 %1614 }
 0xd31   :  { %1606 = vrot.lane.b32.xlu1 %v1358_v8, %s5168_s15 }
 0xd35   :  { %1719 = vrot.lane.b32.xlu1 %v5690_v19, %s5165_s9 }
 0xd39   :  { %1715 = vrot.lane.b32.xlu1 %v5708_v24, %s5165_s9  ;;  %v1611_v24 = vpop.permute.xlu1 %1610 }
 0xd3a   :  { %1604 = vrot.lane.b32.xlu0 %v1357_v1, %s5168_s15 }
 0xd3d   :  { %1726 = vrot.lane.b32.xlu1 %v5734_v56, %s5165_s9 }
 0xd3e   :  { %1717 = vrot.lane.b32.xlu0 %v5701_v26, %s5165_s9 }
 0xd42   :  { %1713 = vrot.lane.b32.xlu0 %v5714_v6, %s5165_s9 }
 0xd54   :  { %v1537_v59 = vpop.xlane.xlu0 %1536 }
 0xd55   :  { %v1577_v21 = vmul.f32 %v5496_v2, %v1537_v59 }
 0xd58   :  { %v1619_v19 = vpop.permute.xlu0 %1618 }
 0xd59   :  { %4739 = vmatprep.subr.mxu1 %v1619_v19 }
 0xd5a   :  { %4740 = vmatpush3.msra.mxu1 %v1619_v19 }
 0xd5b   :  { %4741 = vmatprep.subr.mxu1 %v1617_v57 }
 0xd5c   :  { %4742 = vmatpush3.msra.mxu1 %v1617_v57  ;;  %v1613_v53 = vpop.permute.xlu0 %1612 }
 0xd5d   :  { %4743 = vmatprep.subr.mxu1 %v1615_v45 }
 0xd5e   :  { %4744 = vmatpush3.msra.mxu1 %v1615_v45 }
 0xd5f   :  { %4745 = vmatprep.subr.mxu1 %v1613_v53 }
 0xd60   :  { %4746 = vmatpush3.msra.mxu1 %v1613_v53  ;;  %v1609_v56 = vpop.permute.xlu0 %1608 }
 0xd61   :  { %4747 = vmatprep.subr.mxu1 %v1611_v24 }
 0xd62   :  { %4748 = vmatpush3.msra.mxu1 %v1611_v24 }
 0xd63   :  { %4749 = vmatprep.subr.mxu1 %v1609_v56 }
 0xd64   :  { %4750 = vmatpush3.msra.mxu1 %v1609_v56 }
 0xd65   :  { %v1534_v26 = vpop.xlane.xlu1 %1533 }
 0xd66   :  { %v1576_v52 = vmul.f32 %v5496_v2, %v1534_v26 }
 0xda1   :  { %v1551_v6 = vpop.xlane.xlu1 %1550 }
 0xda2   :  { %v1581_v50 = vmul.f32 %v5491_v63, %v1551_v6 }
 0xda4   :  { %v1583_v5 = vadd.f32 %v1581_v50, %v1577_v21 }
 0xda5   :  { %v1563_v47 = vpop.xlane.xlu1 %1562  ;;  %v1548_v4 = vpop.xlane.xlu0 %1547 }
 0xda6   :  { %v1585_v49 = vmul.f32 %v5504_v28, %v1563_v47  ;;  %v1580_v61 = vmul.f32 %v5491_v63, %v1548_v4  ;;  %v5884_v47 = vrot.slane %v5730_v55, %v5627_v3 }
 0xda8   :  { %v1587_v23 = vadd.f32 %v1585_v49, %v1583_v5  ;;  %v1582_v35 = vadd.f32 %v1580_v61, %v1576_v52 }
 0xda9   :  { %v1575_v9 = vpop.xlane.xlu1 %1574  ;;  %v1560_v38 = vpop.xlane.xlu0 %1559 }
 0xdaa   :  { %v1589_v13 = vmul.f32 %v5512_v40, %v1575_v9  ;;  %v1584_v32 = vmul.f32 %v5504_v28, %v1560_v38 }
 0xdac   :  { %v1591_v27 = vadd.f32 %v1589_v13, %v1587_v23  ;;  %v1586_v60 = vadd.f32 %v1584_v32, %v1582_v35  ;;  %v4284_v13 = vld [vmem:[%s6574_s2 + $0x78] sm:$0xff]  ;;  %v4282_v32 = vld [vmem:[%s6574_s2 + $0x68] sm:$0xff] }
 0xdad   :  { %v1607_v41 = vpop.permute.xlu1 %1606  ;;  %v1572_v58 = vpop.xlane.xlu0 %1571  ;;  %v4280_v23 = vld [vmem:[%s6574_s2 + $0x58] sm:$0xff]  ;;  %v4278_v35 = vld [vmem:[%s6574_s2 + $0x48] sm:$0xff] }
 0xdae   :  { %v1588_v11 = vmul.f32 %v5512_v40, %v1572_v58  ;;  %4751 = vmatprep.subr.mxu1 %v1607_v41  ;;  %5064 = vrcp.f32 %v1591_v27  ;;  %v1853_v27 = vrot.slane %v5730_v55, %v5648_v34 }
 0xdaf   :  { %4752 = vmatpush3.msra.mxu1 %v1607_v41 }
 0xdb0   :  { %v1590_v48 = vadd.f32 %v1588_v11, %v1586_v60 }
 0xdb1   :  { %v1605_v7 = vpop.permute.xlu0 %1604  ;;  %v1720_v37 = vpop.permute.xlu1 %1719 }
 0xdb2   :  { %5066 = vrcp.f32 %v1590_v48  ;;  %4753 = vmatprep.subr.mxu1 %v1605_v7 }
 0xdb3   :  { %4754 = vmatpush3.msra.mxu1 %v1605_v7 }
 0xdb4   :  { %4758 = vmatprep.subr.mxu1 %v1720_v37 }
 0xdb5   :  { %v1718_v8 = vpop.permute.xlu0 %1717  ;;  %v1716_v1 = vpop.permute.xlu1 %1715 }
 0xdb9   :  { %v1714_v57 = vpop.permute.xlu0 %1713 }
 0xdbb   :  { %v5065_v29 = vpop.eup %5064 }
 0xdbc   :  { %v1595_v46 = vmul.f32 %v5065_v29, %v5804_v62  ;;  %v1727_v62 = vpop.permute.xlu1 %1726 }
 0xdbf   :  { %v5067_v51 = vpop.eup %5066 }
 0xdc0   :  { %v1594_v0 = vmul.f32 %v5067_v51, %v5810_v42 }
 0xdc2   :  { %4755 = vmatprep.mubr.msk.f32.mxu1 %vm793_vm2, %v1594_v0 }
 0xdc3   :  { %4756 = vmatmul.mubr.msk.f32.vlgmr.msra.gmra.mxu1 %vm793_vm2, %v1595_v46 }
 0xdc4   :  { %4759 = vmatpush3.msra.mxu1 %v1720_v37 }
 0xdc5   :  { %4760 = vmatprep.subr.mxu1 %v1718_v8 }
 0xdc6   :  { %4761 = vmatpush3.msra.mxu1 %v1718_v8 }
 0xdc7   :  { %4762 = vmatprep.subr.mxu1 %v1716_v1 }
 0xdc8   :  { %4763 = vmatpush3.msra.mxu1 %v1716_v1 }
 0xdc9   :  { %4764 = vmatprep.subr.mxu1 %v1714_v57 }
 0xdca   :  { %4765 = vmatpush3.msra.mxu1 %v1714_v57 }
 0xdcb   :  { %4769 = vmatprep.subr.mxu1 %v4284_v13 }
 0xe83   :  { %v4757_v59 = vpop.f32.mrf.mxu1 }
 0xe85   :  { %v1700_v19 = vpop.f32.mrf.mxu1 }
 0xe86   :  { %4766 = vmatprep.mubr.msk.f32.mxu1 %vm6608_vm0, %v1700_v19  ;;  %v4311_v19 = vld [vmem:[%s6575_s3 + $0x78] sm:$0xff] }
 0xe87   :  { %4767 = vmatmul.mubr.msk.f32.vlgmr.msra.gmra.mxu1 %vm6633_vm14, %v4757_v59  ;;  %v5915_v59 = vld [vmem:[%s6573_s1] sm:$0xff]  ;;  %4780 = vmatprep.subr.mxu0 %v4311_v19  ;;  %vm6641_vm14 = vmmov %vm6608_vm0 }
 0xe88   :  { %4770 = vmatpush3.msra.mxu1 %v4284_v13  ;;  %4781 = vmatpush3.msra.mxu0 %v4311_v19 }
 0xe89   :  { %4771 = vmatprep.subr.mxu1 %v4282_v32 }
 0xe8a   :  { %4772 = vmatpush3.msra.mxu1 %v4282_v32 }
 0xe8b   :  { %4773 = vmatprep.subr.mxu1 %v4280_v23 }
 0xe8c   :  { %4774 = vmatpush3.msra.mxu1 %v4280_v23 }
 0xe8d   :  { %4775 = vmatprep.subr.mxu1 %v4278_v35 }
 0xe8e   :  { %4776 = vmatpush3.msra.mxu1 %v4278_v35 }
 0xf47   :  { %v4768_v42 = vpop.f32.mrf.mxu1 }
 0xf48   :  { %v1807_v45 = vadd.f32 %v4768_v42, %v1727_v62  ;;  %v4309_v42 = vld [vmem:[%s6575_s3 + $0x68] sm:$0xff] }
 0xf49   :  { %v1801_v53 = vpop.f32.mrf.mxu1 }
 0xf4a   :  { %v1811_v24 = vadd.f32 %v1807_v45, %v5721_v54  ;;  %v1802_v56 = vadd.f32 %v1801_v53, %v1727_v62  ;;  %v4310_v62 = vld [vmem:[%s6575_s3 + $0x70] sm:$0xff]  ;;  %v4308_v45 = vld [vmem:[%s6575_s3 + $0x60] sm:$0xff]  ;;  %v4307_v53 = vld [vmem:[%s6575_s3 + $0x58] sm:$0xff] }
 0xf4b   :  { %4782 = vmatprep.subr.mxu0 %v4310_v62 }
 0xf4c   :  { %v1810_v26 = vadd.f32 %v1802_v56, %v5719_v30  ;;  %v1815_v6 = vsel %vm6634_vm6, %v1811_v24, 0.0  ;;  %4783 = vmatpush3.msra.mxu0 %v4310_v62  ;;  %v4305_v56 = vld [vmem:[%s6575_s3 + $0x48] sm:$0xff]  ;;  %vm6642_vm6 = vmmov %vm6608_vm0 }
 0xf4d   :  { %1816 = vadd.xlane.f32.xlu1 %v1815_v6  ;;  %4784 = vmatprep.subr.mxu0 %v4309_v42 }
 0xf4e   :  { %v1812_v50 = vsel %vm6635_vm11, %v1810_v26, 0.0  ;;  %4785 = vmatpush3.msra.mxu0 %v4309_v42  ;;  %v5960_v42 = vld [vmem:[%s6574_s2 + $0xa0] sm:$0xff]  ;;  %vm6643_vm11 = vmmov %vm6608_vm0 }
 0xf4f   :  { %1813 = vadd.xlane.f32.xlu0 %v1812_v50  ;;  %4786 = vmatprep.subr.mxu0 %v4308_v45 }
 0xf50   :  { %4787 = vmatpush3.msra.mxu0 %v4308_v45  ;;  %v5985_v45 = vld [vmem:[%s6573_s1 + $0x8] sm:$0xff] }
 0xf51   :  { %4788 = vmatprep.subr.mxu0 %v4307_v53 }
 0xf52   :  { %4789 = vmatpush3.msra.mxu0 %v4307_v53 }
 0xf5e   :  { %1845 = vrot.lane.b32.xlu1 %v5884_v47, %s5166_s12 }
 0xfd6   :  { %v1817_v4 = vpop.xlane.xlu1 %1816 }
 0xfd7   :  { %v1819_v21 = vmul.f32 0.03125, %v1817_v4 }
 0xfd8   :  { %v1814_v49 = vpop.xlane.xlu0 %1813 }
 0xfd9   :  { %v1818_v54 = vmul.f32 0.03125, %v1814_v49  ;;  %v1821_v61 = vsub.f32 %v1811_v24, %v1819_v21  ;;  %v4306_v24 = vld [vmem:[%s6575_s3 + $0x50] sm:$0xff] }
 0xfda   :  { %v1846_v51 = vpop.permute.xlu1 %1845  ;;  %4790 = vmatprep.subr.mxu0 %v4306_v24 }
 0xfdb   :  { %v1820_v5 = vsub.f32 %v1810_v26, %v1818_v54  ;;  %v1823_v38 = vmul.f32 %v1821_v61, %v1821_v61  ;;  %4791 = vmatpush3.msra.mxu0 %v4306_v24  ;;  %v4304_v26 = vld [vmem:[%s6575_s3 + $0x40] sm:$0xff] }
 0xfdc   :  { %4792 = vmatprep.subr.mxu0 %v4305_v56 }
 0xfdd   :  { %v1822_v30 = vmul.f32 %v1820_v5, %v1820_v5  ;;  %v1827_v52 = vsel %vm6637_vm7, %v1823_v38, 0.0  ;;  %4793 = vmatpush3.msra.mxu0 %v4305_v56  ;;  %vm6645_vm7 = vmmov %vm6608_vm0 }
 0xfde   :  { %4794 = vmatprep.subr.mxu0 %v4304_v26 }
 0xfdf   :  { %v1824_v9 = vsel %vm6636_vm3, %v1822_v30, 0.0  ;;  %4795 = vmatpush3.msra.mxu0 %v4304_v26  ;;  %vm6644_vm3 = vmmov %vm6608_vm0 }
 0xfe0   :  { %1825 = vadd.xlane.f32.xlu0 %v1824_v9 }
 0xfe4   :  { %1828 = vadd.xlane.f32.xlu0 %v1827_v52 }
 0xffa   :  { %1963 = vrot.lane.b32.xlu0 %v1853_v27, %s5168_s15 }
0x1069   :  { %v1826_v41 = vpop.xlane.xlu0 %1825 }
0x106a   :  { %v1830_v58 = vmul.f32 0.03125, %v1826_v41 }
0x106c   :  { %v1832_v60 = vadd.f32 1e-05, %v1830_v58 }
0x106d   :  { %v1829_v11 = vpop.xlane.xlu0 %1828 }
0x106e   :  { %5068 = vrsqrt.f32 %v1832_v60  ;;  %v1831_v48 = vmul.f32 0.03125, %v1829_v11 }
0x1070   :  { %v1833_v7 = vadd.f32 1e-05, %v1831_v48 }
0x1072   :  { %5070 = vrsqrt.f32 %v1833_v7 }
0x107b   :  { %v5069_v37 = vpop.eup %5068 }
0x107c   :  { %v1836_v29 = vmul.f32 %v5069_v37, %v1820_v5  ;;  %v1964_v37 = vpop.permute.xlu0 %1963 }
0x107e   :  { %v1842_v0 = vmul.f32 %v5884_v47, %v1836_v29 }
0x107f   :  { %v5071_v46 = vpop.eup %5070 }
0x1080   :  { %v1837_v8 = vmul.f32 %v5071_v46, %v1821_v61  ;;  %v5906_v55 = vadd.f32 %v1846_v51, %v1842_v0 }
0x1082   :  { %v1843_v1 = vmul.f32 %v5884_v47, %v1837_v8  ;;  %4777 = vmatprep.mubr.msk.f32.mxu1 %vm6638_vm13, %v5906_v55  ;;  %vm6646_vm13 = vmmov %vm6608_vm0 }
0x1084   :  { %v1849_v57 = vadd.f32 %v1846_v51, %v1843_v1 }
0x1086   :  { %4778 = vmatmul.mubr.msk.f32.vlgmr.msra.gmra.mxu1 %vm6639_vm4, %v1849_v57  ;;  %vm6647_vm4 = vmmov %vm6608_vm0 }
0x1087   :  { %4807 = vmatprep.mubr.msk.f32.mxu1 %vm6640_vm12, %v5915_v59  ;;  %vm6648_vm12 = vmmov %vm6608_vm0 }
0x1146   :  { %v4779_v6 = vpop.f32.mrf.mxu1 }
0x1147   :  { %v1932_v50 = vadd.f32 %v4779_v6, %v1853_v27 }
0x1148   :  { %v1926_v4 = vpop.f32.mrf.mxu1 }
0x1149   :  { %v1938_v21 = vmul.f32 0.044715, %v1932_v50  ;;  %v1927_v49 = vadd.f32 %v1926_v4, %v1853_v27  ;;  %v1936_v11 = vmul.f32 0.5, %v1932_v50  ;;  %v5948_v27 = vld [vmem:[%s6574_s2 + $0xb0] sm:$0xff] }
0x114a   :  { %4799 = vmatprep.subr.mxu1 %v5948_v27 }
0x114b   :  { %v1940_v54 = vmul.f32 %v1938_v21, %v1932_v50  ;;  %v1937_v61 = vmul.f32 0.044715, %v1927_v49  ;;  %v1935_v58 = vmul.f32 0.5, %v1927_v49  ;;  %4800 = vmatpush3.msra.mxu1 %v5948_v27 }
0x114c   :  { %4801 = vmatprep.subr.mxu1 %v5960_v42 }
0x114d   :  { %v1942_v5 = vmul.f32 %v1940_v54, %v1932_v50  ;;  %v1939_v30 = vmul.f32 %v1937_v61, %v1927_v49  ;;  %4802 = vmatpush3.msra.mxu1 %v5960_v42 }
0x114f   :  { %v1944_v9 = vadd.f32 %v1942_v5, %v1932_v50  ;;  %v1941_v38 = vmul.f32 %v1939_v30, %v1927_v49  ;;  %v6000_v5 = vld [vmem:[%s6576_s4 + $0x8] sm:$0xf] }
0x1150   :  { %v6004_v30 = vrot.slane %v6000_v5, %v5319_v17 }
0x1151   :  { %v1946_v52 = vmul.f32 0.7978846, %v1944_v9  ;;  %v1943_v13 = vadd.f32 %v1941_v38, %v1927_v49 }
0x1153   :  { %5072 = vtanh.f32 %v1946_v52  ;;  %v1945_v32 = vmul.f32 0.7978846, %v1943_v13 }
0x1155   :  { %5074 = vtanh.f32 %v1945_v32 }
0x1160   :  { %v5073_v23 = vpop.eup %5072 }
0x1161   :  { %v1950_v41 = vadd.f32 1.0, %v5073_v23 }
0x1162   :  { %v5075_v35 = vpop.eup %5074 }
0x1163   :  { %v1949_v60 = vadd.f32 1.0, %v5075_v35  ;;  %v1952_v7 = vmul.f32 %v1950_v41, %v1936_v11 }
0x1165   :  { %v1951_v48 = vmul.f32 %v1949_v60, %v1935_v58 }
0x1167   :  { %4796 = vmatprep.mubr.msk.f32.mxu0 %vm793_vm2, %v1951_v48 }
0x1168   :  { %4797 = vmatmul.mubr.msk.f32.vlgmr.msra.gmra.mxu0 %vm793_vm2, %v1952_v7 }
0x1228   :  { %v4798_v29 = vpop.f32.mrf.mxu0 }
0x1229   :  { %v2044_v51 = vadd.f32 %v4798_v29, %v1964_v37 }
0x122a   :  { %v2038_v0 = vpop.f32.mrf.mxu0 }
0x122b   :  { %v2039_v46 = vadd.f32 %v2038_v0, %v1964_v37  ;;  %v2048_v8 = vadd.f32 %v2044_v51, %v1849_v57  ;;  %v5978_v57 = vld [vmem:[%s6574_s2 + $0x80] sm:$0xff] }
0x122d   :  { %v2047_v1 = vadd.f32 %v2039_v46, %v5906_v55  ;;  %v2052_v19 = vsel %vm6608_vm0, %v2048_v8, 0.0  ;;  %v5966_v55 = vld [vmem:[%s6574_s2 + $0x90] sm:$0xff] }
0x122e   :  { %2053 = vadd.xlane.f32.xlu0 %v2052_v19  ;;  %4803 = vmatprep.subr.mxu1 %v5966_v55 }
0x122f   :  { %v2049_v62 = vsel %vm6641_vm14, %v2047_v1, 0.0  ;;  %4804 = vmatpush3.msra.mxu1 %v5966_v55  ;;  %vm6649_vm14 = vmmov %vm6608_vm0 }
0x1230   :  { %2050 = vadd.xlane.f32.xlu1 %v2049_v62  ;;  %4805 = vmatprep.subr.mxu1 %v5978_v57 }
0x1231   :  { %4806 = vmatpush3.msra.mxu1 %v5978_v57 }
0x1232   :  { %4808 = vmatmul.mubr.msk.f32.vlgmr.msra.gmra.mxu1 %vm6642_vm6, %v5985_v45  ;;  %vm6650_vm6 = vmmov %vm6608_vm0 }
0x1241   :  { %2185 = vrot.lane.b32.xlu1 %v5948_v27, %s5166_s12 }
0x1245   :  { %2075 = vrot.lane.b32.xlu1 %v5884_v47, %s5168_s15 }
0x1249   :  { %2181 = vrot.lane.b32.xlu1 %v5966_v55, %s5166_s12 }
0x12b7   :  { %v2054_v53 = vpop.xlane.xlu0 %2053 }
0x12b8   :  { %v2056_v24 = vmul.f32 0.03125, %v2054_v53 }
0x12b9   :  { %v2051_v56 = vpop.xlane.xlu1 %2050 }
0x12ba   :  { %v2058_v26 = vsub.f32 %v2048_v8, %v2056_v24  ;;  %v2055_v6 = vmul.f32 0.03125, %v2051_v56 }
0x12bc   :  { %v2057_v50 = vsub.f32 %v2047_v1, %v2055_v6  ;;  %v2060_v4 = vmul.f32 %v2058_v26, %v2058_v26 }
0x12bd   :  { %v2186_v21 = vpop.permute.xlu1 %2185 }
0x12be   :  { %v2064_v49 = vsel %vm6643_vm11, %v2060_v4, 0.0  ;;  %v2059_v54 = vmul.f32 %v2057_v50, %v2057_v50  ;;  %4810 = vmatprep.subr.mxu1 %v2186_v21  ;;  %vm6651_vm11 = vmmov %vm6608_vm0 }
0x12bf   :  { %2065 = vadd.xlane.f32.xlu0 %v2064_v49  ;;  %4811 = vmatpush3.msra.mxu1 %v2186_v21 }
0x12c0   :  { %v2061_v61 = vsel %vm6644_vm3, %v2059_v54, 0.0  ;;  %vm6652_vm3 = vmmov %vm6608_vm0 }
0x12c1   :  { %2062 = vadd.xlane.f32.xlu1 %v2061_v61 }
0x12d2   :  { %2179 = vrot.lane.b32.xlu1 %v5978_v57, %s5166_s12 }
0x12d5   :  { %2183 = vrot.lane.b32.xlu0 %v5960_v42, %s5166_s12 }
0x12d9   :  { %2080 = vrot.lane.b32.xlu0 %v5884_v47, %s5165_s9  ;;  %v2076_v47 = vpop.permute.xlu1 %2075 }
0x12dd   :  { %2192 = vrot.lane.b32.xlu0 %v6004_v30, %s5166_s12  ;;  %v2182_v32 = vpop.permute.xlu1 %2181 }
0x12f2   :  { %v4809_v9 = vpop.f32.mrf.mxu1 }
0x12f4   :  { %v2166_v38 = vpop.f32.mrf.mxu1 }
0x12f5   :  { %v2167_v52 = vadd.f32 %v2166_v38, %v6004_v30 }
0x12f7   :  { %v2276_v13 = vmul.f32 0.35355338, %v2167_v52 }
0x12f9   :  { %4837 = vmatprep.mubr.msk.f32.mxu0 %vm6645_vm7, %v2276_v13  ;;  %vm6653_vm7 = vmmov %vm6608_vm0  ;;  %v2172_v13 = vadd.f32 %v4809_v9, %v6004_v30  ;;  %v6663_v9 = vmov 0.0  }
0x1348   :  { %v2066_v23 = vpop.xlane.xlu0 %2065 }
0x1349   :  { %v2068_v35 = vmul.f32 0.03125, %v2066_v23 }
0x134a   :  { %v2063_v41 = vpop.xlane.xlu1 %2062 }
0x134b   :  { %v2070_v58 = vadd.f32 1e-05, %v2068_v35  ;;  %v2067_v60 = vmul.f32 0.03125, %v2063_v41 }
0x134c   :  { %v2184_v11 = vpop.permute.xlu0 %2183 }
0x134d   :  { %5076 = vrsqrt.f32 %v2070_v58  ;;  %v2069_v48 = vadd.f32 1e-05, %v2067_v60  ;;  %4812 = vmatprep.subr.mxu1 %v2184_v11 }
0x134e   :  { %4813 = vmatpush3.msra.mxu1 %v2184_v11  ;;  %v2180_v7 = vpop.permute.xlu1 %2179 }
0x134f   :  { %5078 = vrsqrt.f32 %v2069_v48  ;;  %4814 = vmatprep.subr.mxu1 %v2182_v32 }
0x1350   :  { %4815 = vmatpush3.msra.mxu1 %v2182_v32  ;;  %v2081_v8 = vpop.permute.xlu0 %2080  ;;  %v6057_v32 = vadd.s32 8, %v5316_v16 }
0x1351   :  { %4816 = vmatprep.subr.mxu1 %v2180_v7 }
0x1352   :  { %4817 = vmatpush3.msra.mxu1 %v2180_v7  ;;  %v4236_v23 = vadd.s32 4294967288, %v6057_v32 }
0x1354   :  { %v2193_v53 = vpop.permute.xlu0 %2192 }
0x135a   :  { %v5077_v37 = vpop.eup %5076 }
0x135b   :  { %v2074_v29 = vmul.f32 %v5077_v37, %v2058_v26 }
0x135c   :  { %v5079_v51 = vpop.eup %5078 }
0x135d   :  { %v2073_v0 = vmul.f32 %v5079_v51, %v2057_v50  ;;  %v2079_v46 = vmul.f32 %v2076_v47, %v2074_v29 }
0x135f   :  { %v2078_v1 = vmul.f32 %v2076_v47, %v2073_v0  ;;  %v6012_v62 = vadd.f32 %v2081_v8, %v2079_v46  ;;  %v2277_v47 = vmul.f32 0.35355338, %v2172_v13 }
0x1361   :  { %v6010_v19 = vadd.f32 %v2081_v8, %v2078_v1 }
0x1363   :  { %4818 = vmatprep.mubr.msk.f32.mxu1 %vm6646_vm13, %v6010_v19  ;;  %vm6654_vm13 = vmmov %vm6608_vm0 }
0x1364   :  { %4819 = vmatmul.mubr.msk.f32.vlgmr.msra.gmra.mxu1 %vm6647_vm4, %v6012_v62  ;;  %vm6655_vm4 = vmmov %vm6608_vm0 }
0x1424   :  { %v4820_v24 = vpop.f32.mrf.mxu1 }
0x1425   :  { %v6018_v56 = vadd.f32 %v4820_v24, %v2193_v53 }
0x1426   :  { %v2267_v26 = vpop.f32.mrf.mxu1 }
0x1427   :  { %v6020_v6 = vadd.f32 %v2267_v26, %v2193_v53  ;;  %v2285_v50 = vmul.f32 %v5262_v10, %v6018_v56  ;;  %v2283_v21 = vmul.f32 %v5279_v12, %v6018_v56  ;;  %v2281_v54 = vmul.f32 %v5298_v14, %v6018_v56 }
0x1428   :  { %v2279_v38 = vmul.f32 %v5308_v15, %v6018_v56 }
0x1429   :  { %4821 = vmatprep.subr.msk.mxu0 %vm6648_vm12, %v2285_v50  ;;  %v2284_v4 = vmul.f32 %v5262_v10, %v6020_v6  ;;  %v2282_v49 = vmul.f32 %v5279_v12, %v6020_v6  ;;  %v2280_v61 = vmul.f32 %v5298_v14, %v6020_v6  ;;  %vm6656_vm12 = vmmov %vm6608_vm0  ;;  %v2278_v52 = vmul.f32 %v5308_v15, %v6020_v6 }
0x142a   :  { %4822 = vmatpush3.xpose.msk.msra.mxu0 %vm6608_vm0, %v2285_v50 }
0x142b   :  { %4823 = vmatprep.subr.msk.mxu0 %vm6649_vm14, %v2284_v4  ;;  %vm6657_vm14 = vmmov %vm6608_vm0 }
0x142e   :  { %4824 = vmatpush3.xpose.msk.msra.mxu0 %vm6650_vm6, %v2284_v4  ;;  %vm6658_vm6 = vmmov %vm6608_vm0 }
0x142f   :  { %4825 = vmatprep.subr.msk.mxu0 %vm6651_vm11, %v2283_v21  ;;  %vm6659_vm11 = vmmov %vm6608_vm0 }
0x1432   :  { %4826 = vmatpush3.xpose.msk.msra.mxu0 %vm6652_vm3, %v2283_v21  ;;  %vm6660_vm3 = vmmov %vm6608_vm0 }
0x1433   :  { %4827 = vmatprep.subr.msk.mxu0 %vm6653_vm7, %v2282_v49  ;;  %vm6661_vm7 = vmmov %vm6608_vm0 }
0x1436   :  { %4828 = vmatpush3.xpose.msk.msra.mxu0 %vm6654_vm13, %v2282_v49  ;;  %vm6662_vm13 = vmmov %vm6608_vm0 }
0x1437   :  { %4829 = vmatprep.subr.msk.mxu0 %vm6655_vm4, %v2281_v54  ;;  %vm246_vm4 = vcmp.ge.s32.totalorder %v5453_v39, %v4236_v23 }
0x143a   :  { %4830 = vmatpush3.xpose.msk.msra.mxu0 %vm6656_vm12, %v2281_v54  ;;  %vm245_vm12 = vcmp.ge.s32.totalorder %v5453_v39, %v5316_v16 }
0x143b   :  { %4831 = vmatprep.subr.msk.mxu0 %vm6608_vm0, %v2280_v61  ;;  %vm248_vm0 = vmor %vm5456_vm1, %vm246_vm4 }
0x143c   :  { %v6068_v35 = vsel %vm248_vm0, -1e+30, %v6663_v9  ;;  %vm6665_vm1 = vmmov %vm6660_vm3 }
0x143d   :  { %vm6672_vm4 = vmmov %vm6665_vm1 }
0x143e   :  { %4832 = vmatpush3.xpose.msk.msra.mxu0 %vm6657_vm14, %v2280_v61  ;;  %vm247_vm14 = vmor %vm5460_vm15, %vm245_vm12 }
0x143f   :  { %4833 = vmatprep.subr.msk.mxu0 %vm6658_vm6, %v2279_v38  ;;  %v6071_v58 = vsel %vm247_vm14, -1e+30, %v6663_v9  ;;  %vm6666_vm15 = vmmov %vm6665_vm1 }
0x1440   :  { %vm6667_vm6 = vmmov %vm6665_vm1 }
0x1441   :  { %vm6673_vm12 = vmmov %vm6665_vm1 }
0x1442   :  { %4834 = vmatpush3.xpose.msk.msra.mxu0 %vm6659_vm11, %v2279_v38  ;;  %vm6668_vm11 = vmmov %vm6665_vm1 }
0x1443   :  { %4835 = vmatprep.subr.msk.mxu0 %vm6660_vm3, %v2278_v52  ;;  %vm6669_vm3 = vmmov %vm6665_vm1 }
0x1444   :  { %vm6674_vm0 = vmmov %vm6665_vm1 }
0x1445   :  { %vm6675_vm14 = vmmov %vm6674_vm0 }
0x1446   :  { %4836 = vmatpush3.xpose.msk.msra.mxu0 %vm6661_vm7, %v2278_v52  ;;  %vm6670_vm7 = vmmov %vm6665_vm1 }
0x1449   :  { %4838 = vmatmul.mubr.msk.f32.vlgmr.msra.gmra.mxu0 %vm6662_vm13, %v2277_v47  ;;  %vm6671_vm13 = vmmov %vm6665_vm1 }
0x1509   :  { %v4839_v41 = vpop.f32.mrf.mxu0 }
0x150a   :  { %v2396_v60 = vadd.f32 %v4839_v41, %v6068_v35 }
0x150b   :  { %v2390_v11 = vpop.f32.mrf.mxu0 }
0x150c   :  { %v2391_v48 = vadd.f32 %v2390_v11, %v6071_v58  ;;  %v2408_v39 = vsel %vm654_vm8, %v2396_v60, -inf  ;;  %v2402_v43 = vsel %vm647_vm9, %v2396_v60, -inf  ;;  %v2414_v29 = vsel %vm661_vm5, %v2396_v60, -inf }
0x150d   :  { %2409 = vmax.xlane.f32.xlu1 %v2408_v39  ;;  %2403 = vmax.xlane.f32.xlu0 %v2402_v43  ;;  %v2420_v0 = vsel %vm668_vm10, %v2396_v60, -inf }
0x150e   :  { %v2405_v44 = vsel %vm654_vm8, %v2391_v48, -inf  ;;  %v2399_v7 = vsel %vm647_vm9, %v2391_v48, -inf  ;;  %v2411_v37 = vsel %vm661_vm5, %v2391_v48, -inf  ;;  %v2417_v51 = vsel %vm668_vm10, %v2391_v48, -inf }
0x1511   :  { %2406 = vmax.xlane.f32.xlu0 %v2405_v44  ;;  %2400 = vmax.xlane.f32.xlu1 %v2399_v7 }
0x1515   :  { %2412 = vmax.xlane.f32.xlu0 %v2411_v37  ;;  %2415 = vmax.xlane.f32.xlu1 %v2414_v29 }
0x1519   :  { %2418 = vmax.xlane.f32.xlu0 %v2417_v51  ;;  %2421 = vmax.xlane.f32.xlu1 %v2420_v0 }
0x1596   :  { %v2410_v46 = vpop.xlane.xlu1 %2409  ;;  %v2404_v8 = vpop.xlane.xlu0 %2403 }
0x1597   :  { %v2428_v24 = vmul.f32 %v5491_v63, %v2410_v46  ;;  %v2424_v26 = vmul.f32 %v5496_v2, %v2404_v8  ;;  %v2289_v8 = vmul.f32 %v6018_v56, %v5350_v31 }
0x1599   :  { %v2430_v38 = vadd.f32 %v2428_v24, %v2424_v26  ;;  %v2293_v24 = vmul.f32 %v6018_v56, %v5321_v18  ;;  %v2290_v26 = vmul.f32 %v6020_v6, %v5339_v25 }
0x159a   :  { %v2407_v1 = vpop.xlane.xlu0 %2406  ;;  %v2401_v53 = vpop.xlane.xlu1 %2400 }
0x159b   :  { %v2427_v50 = vmul.f32 %v5491_v63, %v2407_v1  ;;  %v2423_v4 = vmul.f32 %v5496_v2, %v2401_v53 }
0x159d   :  { %v2429_v52 = vadd.f32 %v2427_v50, %v2423_v4  ;;  %v2288_v50 = vmul.f32 %v6020_v6, %v5356_v33 }
0x159e   :  { %v2413_v21 = vpop.xlane.xlu0 %2412  ;;  %v2416_v49 = vpop.xlane.xlu1 %2415 }
0x159f   :  { %v2431_v54 = vmul.f32 %v5504_v28, %v2413_v21  ;;  %v2432_v61 = vmul.f32 %v5504_v28, %v2416_v49 }
0x15a1   :  { %v2433_v23 = vadd.f32 %v2431_v54, %v2429_v52  ;;  %v2434_v41 = vadd.f32 %v2432_v61, %v2430_v38 }
0x15a2   :  { %v2419_v13 = vpop.xlane.xlu0 %2418  ;;  %v2422_v47 = vpop.xlane.xlu1 %2421 }
0x15a3   :  { %v2435_v11 = vmul.f32 %v5512_v40, %v2419_v13  ;;  %v2436_v39 = vmul.f32 %v5512_v40, %v2422_v47 }
0x15a5   :  { %v2437_v43 = vadd.f32 %v2435_v11, %v2433_v23  ;;  %v2438_v44 = vadd.f32 %v2436_v39, %v2434_v41  ;;  %v2287_v39 = vmul.f32 %v6018_v56, %v5364_v36 }
0x15a7   :  { %v2440_v7 = vsub.f32 %v2396_v60, %v2438_v44  ;;  %v2439_v37 = vsub.f32 %v2391_v48, %v2437_v43  ;;  %v2292_v60 = vmul.f32 %v6020_v6, %v5334_v22  ;;  %v2291_v48 = vmul.f32 %v6018_v56, %v5328_v20  ;;  %v6664_v43 = vld [vmem:[#allocation9_spill] sm:$0xff] }
0x15a8   :  { %v2286_v44 = vmul.f32 %v6020_v6, %v6664_v43 }
0x15a9   :  { %v2443_v29 = vmul.f32 1.442695, %v2440_v7  ;;  %v2441_v51 = vmul.f32 1.442695, %v2439_v37 }
0x15ab   :  { %5080 = vpow2.f32 %v2443_v29 }
0x15ac   :  { %5082 = vpow2.f32 %v2441_v51 }
0x15b8   :  { %v6091_v0 = vpop.eup %5080 }
0x15b9   :  { %2467 = vrot.lane.b32.xlu0 %v6091_v0, %s5166_s12  ;;  %2455 = vrot.lane.b32.xlu1 %v6091_v0, %s5169_s16  ;;  %v6097_v46 = vpop.eup %5082  ;;  %v2448_v1 = vsel %vm647_vm9, %v6091_v0, 0.0 }
0x15ba   :  { %v2445_v53 = vsel %vm647_vm9, %v6097_v46, 0.0 }
0x15bd   :  { %2453 = vrot.lane.b32.xlu0 %v6097_v46, %s5169_s16  ;;  %2465 = vrot.lane.b32.xlu1 %v6097_v46, %s5166_s12 }
0x15c1   :  { %2479 = vrot.lane.b32.xlu0 %v6091_v0, %s5170_s17  ;;  %2477 = vrot.lane.b32.xlu1 %v6097_v46, %s5170_s17 }
0x15c5   :  { %2529 = vrot.lane.b32.xlu1 %v2292_v60, %s5166_s12 }
0x15c9   :  { %2527 = vrot.lane.b32.xlu1 %v2291_v48, %s5166_s12 }
0x15cd   :  { %2523 = vrot.lane.b32.xlu1 %v2289_v8, %s5166_s12 }
0x15e0   :  { %2449 = vadd.xlane.f32.xlu0 %v2448_v1 }
0x15f1   :  { %2446 = vadd.xlane.f32.xlu1 %v2445_v53 }
0x15f6   :  { %2531 = vrot.lane.b32.xlu0 %v2293_v24, %s5166_s12 }
0x15fa   :  { %2525 = vrot.lane.b32.xlu0 %v2290_v26, %s5166_s12 }
0x15fe   :  { %2521 = vrot.lane.b32.xlu0 %v2288_v50, %s5166_s12 }
0x162b   :  { %v2468_v4 = vpop.permute.xlu0 %2467  ;;  %v2456_v21 = vpop.permute.xlu1 %2455 }
0x162c   :  { %v2462_v49 = vsel %vm647_vm9, %v2456_v21, 0.0  ;;  %v2474_v38 = vsel %vm647_vm9, %v2468_v4, 0.0 }
0x162d   :  { %2463 = vadd.xlane.f32.xlu1 %v2462_v49 }
0x162f   :  { %v2454_v54 = vpop.permute.xlu0 %2453  ;;  %v2466_v61 = vpop.permute.xlu1 %2465 }
0x1630   :  { %v2459_v52 = vsel %vm647_vm9, %v2454_v54, 0.0  ;;  %v2471_v47 = vsel %vm647_vm9, %v2466_v61, 0.0 }
0x1631   :  { %2475 = vadd.xlane.f32.xlu1 %v2474_v38  ;;  %2460 = vadd.xlane.f32.xlu0 %v2459_v52 }
0x1633   :  { %v2480_v13 = vpop.permute.xlu0 %2479  ;;  %v2478_v41 = vpop.permute.xlu1 %2477 }
0x1634   :  { %v2486_v23 = vsel %vm647_vm9, %v2480_v13, 0.0  ;;  %v2483_v11 = vsel %vm647_vm9, %v2478_v41, 0.0 }
0x1635   :  { %2487 = vadd.xlane.f32.xlu1 %v2486_v23  ;;  %2472 = vadd.xlane.f32.xlu0 %v2471_v47 }
0x1637   :  { %v2530_v56 = vpop.permute.xlu1 %2529 }
0x1639   :  { %2484 = vadd.xlane.f32.xlu0 %v2483_v11 }
0x163b   :  { %v2528_v37 = vpop.permute.xlu1 %2527 }
0x163f   :  { %v2524_v6 = vpop.permute.xlu1 %2523 }
0x1646   :  { %2519 = vrot.lane.b32.xlu1 %v2287_v39, %s5166_s12 }
0x164a   :  { %2628 = vrot.lane.b32.xlu1 %v5948_v27, %s5165_s9 }
0x164e   :  { %2624 = vrot.lane.b32.xlu1 %v5966_v55, %s5165_s9 }
0x164f   :  { %2517 = vrot.lane.b32.xlu0 %v2286_v44, %s5166_s12 }
0x1652   :  { %2634 = vrot.lane.b32.xlu1 %v6004_v30, %s5165_s9 }
0x1653   :  { %2626 = vrot.lane.b32.xlu0 %v5960_v42, %s5165_s9 }
0x1657   :  { %2622 = vrot.lane.b32.xlu0 %v5978_v57, %s5165_s9 }
0x1669   :  { %v2450_v7 = vpop.xlane.xlu0 %2449 }
0x166a   :  { %v2490_v48 = vmul.f32 %v5496_v2, %v2450_v7 }
0x166d   :  { %v2532_v27 = vpop.permute.xlu0 %2531 }
0x166e   :  { %4840 = vmatprep.subr.mxu1 %v2532_v27 }
0x166f   :  { %4841 = vmatpush3.msra.mxu1 %v2532_v27 }
0x1670   :  { %4842 = vmatprep.subr.mxu1 %v2530_v56 }
0x1671   :  { %4843 = vmatpush3.msra.mxu1 %v2530_v56  ;;  %v2526_v55 = vpop.permute.xlu0 %2525 }
0x1672   :  { %4844 = vmatprep.subr.mxu1 %v2528_v37 }
0x1673   :  { %4845 = vmatpush3.msra.mxu1 %v2528_v37 }
0x1674   :  { %4846 = vmatprep.subr.mxu1 %v2526_v55 }
0x1675   :  { %4847 = vmatpush3.msra.mxu1 %v2526_v55  ;;  %v2522_v30 = vpop.permute.xlu0 %2521 }
0x1676   :  { %4848 = vmatprep.subr.mxu1 %v2524_v6 }
0x1677   :  { %4849 = vmatpush3.msra.mxu1 %v2524_v6 }
0x1678   :  { %4850 = vmatprep.subr.mxu1 %v2522_v30 }
0x1679   :  { %4851 = vmatpush3.msra.mxu1 %v2522_v30 }
0x167a   :  { %v2447_v42 = vpop.xlane.xlu1 %2446 }
0x167b   :  { %v2489_v50 = vmul.f32 %v5496_v2, %v2447_v42 }
0x16b6   :  { %v2464_v57 = vpop.xlane.xlu1 %2463 }
0x16b7   :  { %v2494_v29 = vmul.f32 %v5491_v63, %v2464_v57 }
0x16b9   :  { %v2496_v53 = vadd.f32 %v2494_v29, %v2490_v48 }
0x16ba   :  { %v2476_v51 = vpop.xlane.xlu1 %2475  ;;  %v2461_v60 = vpop.xlane.xlu0 %2460 }
0x16bb   :  { %v2498_v8 = vmul.f32 %v5504_v28, %v2476_v51  ;;  %v2493_v1 = vmul.f32 %v5491_v63, %v2461_v60 }
0x16bd   :  { %v2500_v49 = vadd.f32 %v2498_v8, %v2496_v53  ;;  %v2495_v54 = vadd.f32 %v2493_v1, %v2489_v50  ;;  %v6171_v1 = vrot.slane %v6000_v5, %v5627_v3 }
0x16be   :  { %v2488_v24 = vpop.xlane.xlu1 %2487  ;;  %v2473_v26 = vpop.xlane.xlu0 %2472 }
0x16bf   :  { %v2502_v4 = vmul.f32 %v5512_v40, %v2488_v24  ;;  %v2497_v21 = vmul.f32 %v5504_v28, %v2473_v26 }
0x16c1   :  { %v2504_v61 = vadd.f32 %v2502_v4, %v2500_v49  ;;  %v2499_v13 = vadd.f32 %v2497_v21, %v2495_v54 }
0x16c2   :  { %v2520_v38 = vpop.permute.xlu1 %2519  ;;  %v2485_v52 = vpop.xlane.xlu0 %2484 }
0x16c3   :  { %v2501_v47 = vmul.f32 %v5512_v40, %v2485_v52  ;;  %4852 = vmatprep.subr.mxu1 %v2520_v38  ;;  %5084 = vrcp.f32 %v2504_v61  ;;  %v4321_v61 = vld [vmem:[%s6574_s2 + $0xb8] sm:$0xff] }
0x16c4   :  { %4853 = vmatpush3.msra.mxu1 %v2520_v38  ;;  %v4319_v38 = vld [vmem:[%s6574_s2 + $0xa8] sm:$0xff]  ;;  %v4317_v52 = vld [vmem:[%s6574_s2 + $0x98] sm:$0xff] }
0x16c5   :  { %v2503_v23 = vadd.f32 %v2501_v47, %v2499_v13  ;;  %v4315_v13 = vld [vmem:[%s6574_s2 + $0x88] sm:$0xff]  ;;  %v2761_v47 = vrot.slane %v6000_v5, %v5648_v34 }
0x16c6   :  { %v2518_v41 = vpop.permute.xlu0 %2517  ;;  %v2629_v11 = vpop.permute.xlu1 %2628 }
0x16c7   :  { %5086 = vrcp.f32 %v2503_v23  ;;  %4854 = vmatprep.subr.mxu1 %v2518_v41 }
0x16c8   :  { %4855 = vmatpush3.msra.mxu1 %v2518_v41 }
0x16c9   :  { %4859 = vmatprep.subr.mxu1 %v2629_v11 }
0x16ca   :  { %v2627_v27 = vpop.permute.xlu0 %2626  ;;  %v2625_v37 = vpop.permute.xlu1 %2624 }
0x16ce   :  { %v2623_v55 = vpop.permute.xlu0 %2622 }
0x16d0   :  { %v5085_v39 = vpop.eup %5084 }
0x16d1   :  { %v2508_v7 = vmul.f32 %v5085_v39, %v6091_v0  ;;  %v2635_v0 = vpop.permute.xlu1 %2634 }
0x16d4   :  { %v5087_v44 = vpop.eup %5086 }
0x16d5   :  { %v2507_v56 = vmul.f32 %v5087_v44, %v6097_v46 }
0x16d7   :  { %4856 = vmatprep.mubr.msk.f32.mxu1 %vm793_vm2, %v2507_v56 }
0x16d8   :  { %4857 = vmatmul.mubr.msk.f32.vlgmr.msra.gmra.mxu1 %vm793_vm2, %v2508_v7 }
0x16d9   :  { %4860 = vmatpush3.msra.mxu1 %v2629_v11 }
0x16da   :  { %4861 = vmatprep.subr.mxu1 %v2627_v27 }
0x16db   :  { %4862 = vmatpush3.msra.mxu1 %v2627_v27 }
0x16dc   :  { %4863 = vmatprep.subr.mxu1 %v2625_v37 }
0x16dd   :  { %4864 = vmatpush3.msra.mxu1 %v2625_v37 }
0x16de   :  { %4865 = vmatprep.subr.mxu1 %v2623_v55 }
0x16df   :  { %4866 = vmatpush3.msra.mxu1 %v2623_v55 }
0x16e0   :  { %4870 = vmatprep.subr.mxu1 %v4321_v61 }
0x1798   :  { %v4858_v6 = vpop.f32.mrf.mxu1 }
0x179a   :  { %v2613_v30 = vpop.f32.mrf.mxu1 }
0x179b   :  { %4867 = vmatprep.mubr.msk.f32.mxu1 %vm6665_vm1, %v2613_v30  ;;  %vm6676_vm1 = vmmov %vm6674_vm0 }
0x179c   :  { %4868 = vmatmul.mubr.msk.f32.vlgmr.msra.gmra.mxu1 %vm6666_vm15, %v4858_v6  ;;  %vm6677_vm15 = vmmov %vm6674_vm0 }
0x179d   :  { %4871 = vmatpush3.msra.mxu1 %v4321_v61 }
0x179e   :  { %4872 = vmatprep.subr.mxu1 %v4319_v38 }
0x179f   :  { %4873 = vmatpush3.msra.mxu1 %v4319_v38 }
0x17a0   :  { %4874 = vmatprep.subr.mxu1 %v4317_v52 }
0x17a1   :  { %4875 = vmatpush3.msra.mxu1 %v4317_v52 }
0x17a2   :  { %4876 = vmatprep.subr.mxu1 %v4315_v13 }
0x17a3   :  { %4877 = vmatpush3.msra.mxu1 %v4315_v13 }
0x185c   :  { %v4869_v46 = vpop.f32.mrf.mxu1 }
0x185d   :  { %v2715_v42 = vadd.f32 %v4869_v46, %v2635_v0 }
0x185e   :  { %v2709_v57 = vpop.f32.mrf.mxu1 }
0x185f   :  { %v2719_v29 = vadd.f32 %v5985_v45, %v2715_v42  ;;  %v2710_v51 = vadd.f32 %v2709_v57, %v2635_v0  ;;  %v4350_v42 = vld [vmem:[%s6575_s3 + $0xb8] sm:$0xff]  ;;  %v4349_v57 = vld [vmem:[%s6575_s3 + $0xb0] sm:$0xff] }
0x1860   :  { %4881 = vmatprep.subr.mxu0 %v4350_v42 }
0x1861   :  { %v2718_v60 = vadd.f32 %v5915_v59, %v2710_v51  ;;  %v2723_v48 = vsel %vm6667_vm6, %v2719_v29, 0.0  ;;  %4882 = vmatpush3.msra.mxu0 %v4350_v42  ;;  %v4347_v51 = vld [vmem:[%s6575_s3 + $0xa0] sm:$0xff]  ;;  %vm6678_vm6 = vmmov %vm6674_vm0 }
0x1862   :  { %2724 = vadd.xlane.f32.xlu1 %v2723_v48  ;;  %4883 = vmatprep.subr.mxu0 %v4349_v57  ;;  %v4345_v48 = vld [vmem:[%s6575_s3 + $0x90] sm:$0xff] }
0x1863   :  { %v2720_v8 = vsel %vm6668_vm11, %v2718_v60, 0.0  ;;  %4884 = vmatpush3.msra.mxu0 %v4349_v57  ;;  %vm6679_vm11 = vmmov %vm6674_vm0 }
0x1864   :  { %2721 = vadd.xlane.f32.xlu0 %v2720_v8  ;;  %v4344_v8 = vld [vmem:[%s6575_s3 + $0x88] sm:$0xff] }
0x1873   :  { %2753 = vrot.lane.b32.xlu1 %v6171_v1, %s5166_s12 }
0x18eb   :  { %v2725_v53 = vpop.xlane.xlu1 %2724 }
0x18ec   :  { %v2727_v24 = vmul.f32 0.03125, %v2725_v53  ;;  %v4343_v53 = vld [vmem:[%s6575_s3 + $0x80] sm:$0xff] }
0x18ed   :  { %v2722_v26 = vpop.xlane.xlu0 %2721 }
0x18ee   :  { %v2726_v45 = vmul.f32 0.03125, %v2722_v26  ;;  %v2729_v50 = vsub.f32 %v2719_v29, %v2727_v24  ;;  %v4348_v29 = vld [vmem:[%s6575_s3 + $0xa8] sm:$0xff] }
0x18ef   :  { %v2754_v37 = vpop.permute.xlu1 %2753  ;;  %4885 = vmatprep.subr.mxu0 %v4348_v29 }
0x18f0   :  { %v2728_v4 = vsub.f32 %v2718_v60, %v2726_v45  ;;  %v2731_v49 = vmul.f32 %v2729_v50, %v2729_v50  ;;  %4886 = vmatpush3.msra.mxu0 %v4348_v29  ;;  %v4346_v60 = vld [vmem:[%s6575_s3 + $0x98] sm:$0xff] }
0x18f1   :  { %4887 = vmatprep.subr.mxu0 %v4347_v51 }
0x18f2   :  { %v2730_v59 = vmul.f32 %v2728_v4, %v2728_v4  ;;  %v2735_v54 = vsel %vm6670_vm7, %v2731_v49, 0.0  ;;  %4888 = vmatpush3.msra.mxu0 %v4347_v51  ;;  %vm6681_vm7 = vmmov %vm6674_vm0 }
0x18f3   :  { %4889 = vmatprep.subr.mxu0 %v4346_v60 }
0x18f4   :  { %v2732_v21 = vsel %vm6669_vm3, %v2730_v59, 0.0  ;;  %4890 = vmatpush3.msra.mxu0 %v4346_v60  ;;  %v6229_v60 = vld [vmem:[%s6574_s2 + $0xf0] sm:$0xff]  ;;  %vm6680_vm3 = vmmov %vm6674_vm0 }
0x18f5   :  { %2733 = vadd.xlane.f32.xlu0 %v2732_v21  ;;  %4891 = vmatprep.subr.mxu0 %v4345_v48 }
0x18f6   :  { %4892 = vmatpush3.msra.mxu0 %v4345_v48  ;;  %4900 = vmatprep.subr.mxu1 %v6229_v60  ;;  %v6249_v48 = vld [vmem:[%s6574_s2 + $0xc0] sm:$0xff] }
0x18f7   :  { %4893 = vmatprep.subr.mxu0 %v4344_v8 }
0x18f8   :  { %4894 = vmatpush3.msra.mxu0 %v4344_v8 }
0x18f9   :  { %2736 = vadd.xlane.f32.xlu0 %v2735_v54  ;;  %4895 = vmatprep.subr.mxu0 %v4343_v53 }
0x18fa   :  { %4896 = vmatpush3.msra.mxu0 %v4343_v53 }
0x190f   :  { %2871 = vrot.lane.b32.xlu0 %v2761_v47, %s5168_s15 }
0x197e   :  { %v2734_v23 = vpop.xlane.xlu0 %2733 }
0x197f   :  { %v2738_v41 = vmul.f32 0.03125, %v2734_v23 }
0x1981   :  { %v2740_v11 = vadd.f32 1e-05, %v2738_v41 }
0x1982   :  { %v2737_v39 = vpop.xlane.xlu0 %2736 }
0x1983   :  { %5088 = vrsqrt.f32 %v2740_v11  ;;  %v2739_v44 = vmul.f32 0.03125, %v2737_v39 }
0x1985   :  { %v2741_v56 = vadd.f32 1e-05, %v2739_v44 }
0x1987   :  { %5090 = vrsqrt.f32 %v2741_v56 }
0x1990   :  { %v5089_v7 = vpop.eup %5088 }
0x1991   :  { %v2744_v27 = vmul.f32 %v5089_v7, %v2728_v4 }
0x1993   :  { %v2750_v55 = vmul.f32 %v6171_v1, %v2744_v27 }
0x1994   :  { %v5091_v6 = vpop.eup %5090 }
0x1995   :  { %v2745_v30 = vmul.f32 %v5091_v6, %v2729_v50  ;;  %v2756_v0 = vadd.f32 %v2754_v37, %v2750_v55 }
0x1997   :  { %v2751_v5 = vmul.f32 %v6171_v1, %v2745_v30  ;;  %4878 = vmatprep.mubr.msk.f32.mxu1 %vm6671_vm13, %v2756_v0  ;;  %vm6682_vm13 = vmmov %vm6674_vm0 }
0x1999   :  { %v2757_v46 = vadd.f32 %v2754_v37, %v2751_v5 }
0x199b   :  { %4879 = vmatmul.mubr.msk.f32.vlgmr.msra.gmra.mxu1 %vm6672_vm4, %v2757_v46  ;;  %vm6683_vm4 = vmmov %vm6674_vm0 }
0x199c   :  { %4901 = vmatpush3.msra.mxu1 %v6229_v60 }
0x1a5b   :  { %v4880_v24 = vpop.f32.mrf.mxu1 }
0x1a5c   :  { %v2840_v26 = vadd.f32 %v4880_v24, %v2761_v47 }
0x1a5d   :  { %v2834_v45 = vpop.f32.mrf.mxu1 }
0x1a5e   :  { %v2846_v50 = vmul.f32 0.044715, %v2840_v26  ;;  %v2835_v4 = vadd.f32 %v2834_v45, %v2761_v47  ;;  %v2844_v7 = vmul.f32 0.5, %v2840_v26  ;;  %v2872_v47 = vpop.permute.xlu0 %2871 }
0x1a60   :  { %v2848_v59 = vmul.f32 %v2846_v50, %v2840_v26  ;;  %v2845_v21 = vmul.f32 0.044715, %v2835_v4  ;;  %v2843_v44 = vmul.f32 0.5, %v2835_v4 }
0x1a62   :  { %v2850_v49 = vmul.f32 %v2848_v59, %v2840_v26  ;;  %v2847_v54 = vmul.f32 %v2845_v21, %v2835_v4 }
0x1a64   :  { %v2852_v61 = vadd.f32 %v2850_v49, %v2840_v26  ;;  %v2849_v38 = vmul.f32 %v2847_v54, %v2835_v4  ;;  %v6269_v54 = vld [vmem:[%s6576_s4 + $0xc] sm:$0xf] }
0x1a66   :  { %v2854_v52 = vmul.f32 0.7978846, %v2852_v61  ;;  %v2851_v13 = vadd.f32 %v2849_v38, %v2835_v4  ;;  %v6273_v61 = vrot.slane %v6269_v54, %v5319_v17 }
0x1a68   :  { %5092 = vtanh.f32 %v2854_v52  ;;  %v2853_v23 = vmul.f32 0.7978846, %v2851_v13 }
0x1a6a   :  { %5094 = vtanh.f32 %v2853_v23 }
0x1a75   :  { %v5093_v41 = vpop.eup %5092 }
0x1a76   :  { %v2858_v39 = vadd.f32 1.0, %v5093_v41 }
0x1a77   :  { %v5095_v11 = vpop.eup %5094 }
0x1a78   :  { %v2857_v56 = vadd.f32 1.0, %v5095_v11  ;;  %v2860_v37 = vmul.f32 %v2858_v39, %v2844_v7 }
0x1a7a   :  { %v2859_v27 = vmul.f32 %v2857_v56, %v2843_v44 }
0x1a7c   :  { %4897 = vmatprep.mubr.msk.f32.mxu0 %vm793_vm2, %v2859_v27 }
0x1a7d   :  { %4898 = vmatmul.mubr.msk.f32.vlgmr.msra.gmra.mxu0 %vm793_vm2, %v2860_v37 }
0x1b3d   :  { %v4899_v55 = vpop.f32.mrf.mxu0 }
0x1b3e   :  { %v2952_v6 = vadd.f32 %v4899_v55, %v2872_v47 }
0x1b3f   :  { %v2946_v30 = vpop.f32.mrf.mxu0 }
0x1b40   :  { %v2947_v5 = vadd.f32 %v2946_v30, %v2872_v47  ;;  %v2956_v42 = vadd.f32 %v2952_v6, %v2757_v46  ;;  %v6242_v46 = vld [vmem:[%s6574_s2 + $0xd0] sm:$0xff] }
0x1b42   :  { %v2955_v57 = vadd.f32 %v2947_v5, %v2756_v0  ;;  %v2960_v29 = vsel %vm6673_vm12, %v2956_v42, 0.0  ;;  %v6235_v0 = vld [vmem:[%s6574_s2 + $0xe0] sm:$0xff]  ;;  %vm6684_vm12 = vmmov %vm6674_vm0 }
0x1b43   :  { %2961 = vadd.xlane.f32.xlu0 %v2960_v29  ;;  %4902 = vmatprep.subr.mxu1 %v6235_v0 }
0x1b44   :  { %v2957_v51 = vsel %vm6674_vm0, %v2955_v57, 0.0  ;;  %4903 = vmatpush3.msra.mxu1 %v6235_v0 }
0x1b45   :  { %2958 = vadd.xlane.f32.xlu1 %v2957_v51  ;;  %4904 = vmatprep.subr.mxu1 %v6242_v46 }
0x1b46   :  { %4905 = vmatpush3.msra.mxu1 %v6242_v46 }
0x1b47   :  { %4906 = vmatprep.subr.mxu1 %v6249_v48 }
0x1b48   :  { %4907 = vmatpush3.msra.mxu1 %v6249_v48 }
0x1b56   :  { %2983 = vrot.lane.b32.xlu1 %v6171_v1, %s5168_s15 }
0x1bcc   :  { %v2962_v8 = vpop.xlane.xlu0 %2961 }
0x1bcd   :  { %v2964_v53 = vmul.f32 0.03125, %v2962_v8 }
0x1bce   :  { %v2959_v24 = vpop.xlane.xlu1 %2958 }
0x1bcf   :  { %v2966_v26 = vsub.f32 %v2956_v42, %v2964_v53  ;;  %v2963_v45 = vmul.f32 0.03125, %v2959_v24 }
0x1bd1   :  { %v2965_v50 = vsub.f32 %v2955_v57, %v2963_v45  ;;  %v2968_v4 = vmul.f32 %v2966_v26, %v2966_v26 }
0x1bd3   :  { %v2972_v59 = vsel %vm6675_vm14, %v2968_v4, 0.0  ;;  %v2967_v21 = vmul.f32 %v2965_v50, %v2965_v50  ;;  %vm6685_vm14 = vmmov %vm6674_vm0 }
0x1bd4   :  { %2973 = vadd.xlane.f32.xlu0 %v2972_v59 }
0x1bd5   :  { %v2969_v49 = vsel %vm6676_vm1, %v2967_v21, 0.0  ;;  %vm6686_vm1 = vmmov %vm6674_vm0 }
0x1bd6   :  { %2970 = vadd.xlane.f32.xlu1 %v2969_v49 }
0x1be7   :  { %3099 = vrot.lane.b32.xlu1 %v6229_v60, %s5166_s12 }
0x1bea   :  { %2988 = vrot.lane.b32.xlu0 %v6171_v1, %s5165_s9  ;;  %v2984_v1 = vpop.permute.xlu1 %2983 }
0x1beb   :  { %3097 = vrot.lane.b32.xlu1 %v6235_v0, %s5166_s12 }
0x1bee   :  { %3095 = vrot.lane.b32.xlu0 %v6242_v46, %s5166_s12 }
0x1bef   :  { %3093 = vrot.lane.b32.xlu1 %v6249_v48, %s5166_s12 }
0x1bf2   :  { %3106 = vrot.lane.b32.xlu0 %v6273_v61, %s5166_s12 }
0x1c5d   :  { %v2974_v38 = vpop.xlane.xlu0 %2973 }
0x1c5e   :  { %v2976_v52 = vmul.f32 0.03125, %v2974_v38 }
0x1c5f   :  { %v2971_v13 = vpop.xlane.xlu1 %2970 }
0x1c60   :  { %v2978_v23 = vadd.f32 1e-05, %v2976_v52  ;;  %v2975_v41 = vmul.f32 0.03125, %v2971_v13 }
0x1c61   :  { %v2989_v37 = vpop.permute.xlu0 %2988 }
0x1c62   :  { %5096 = vrsqrt.f32 %v2978_v23  ;;  %v2977_v11 = vadd.f32 1e-05, %v2975_v41 }
0x1c63   :  { %v3100_v39 = vpop.permute.xlu1 %3099 }
0x1c64   :  { %5098 = vrsqrt.f32 %v2977_v11  ;;  %4911 = vmatprep.subr.mxu1 %v3100_v39 }
0x1c65   :  { %v3096_v5 = vpop.permute.xlu0 %3095 }
0x1c67   :  { %v3098_v6 = vpop.permute.xlu1 %3097 }
0x1c69   :  { %v3107_v53 = vpop.permute.xlu0 %3106 }
0x1c6b   :  { %v3094_v42 = vpop.permute.xlu1 %3093 }
0x1c6f   :  { %v5097_v44 = vpop.eup %5096 }
0x1c70   :  { %v2982_v56 = vmul.f32 %v5097_v44, %v2966_v26 }
0x1c71   :  { %v5099_v7 = vpop.eup %5098 }
0x1c72   :  { %v2981_v27 = vmul.f32 %v5099_v7, %v2965_v50  ;;  %v2987_v17 = vmul.f32 %v2984_v1, %v2982_v56 }
0x1c74   :  { %v2986_v47 = vmul.f32 %v2984_v1, %v2981_v27  ;;  %v6279_v30 = vadd.f32 %v2989_v37, %v2987_v17 }
0x1c76   :  { %v6277_v55 = vadd.f32 %v2989_v37, %v2986_v47 }
0x1c78   :  { %4908 = vmatprep.mubr.msk.f32.mxu1 %vm6677_vm15, %v6277_v55  ;;  %vm6687_vm15 = vmmov %vm6674_vm0 }
0x1c79   :  { %4909 = vmatmul.mubr.msk.f32.vlgmr.msra.gmra.mxu1 %vm6678_vm6, %v6279_v30  ;;  %vm6688_vm6 = vmmov %vm6674_vm0 }
0x1c7a   :  { %4912 = vmatpush3.msra.mxu1 %v3100_v39  ;;  %4919 = vmatprep.mubr.msk.f32.mxu1 %vm6679_vm11, %v6010_v19  ;;  %vm6689_vm11 = vmmov %vm6674_vm0 }
0x1c7b   :  { %4913 = vmatprep.subr.mxu1 %v3098_v6 }
0x1c7c   :  { %4914 = vmatpush3.msra.mxu1 %v3098_v6 }
0x1c7d   :  { %4915 = vmatprep.subr.mxu1 %v3096_v5 }
0x1c7e   :  { %4916 = vmatpush3.msra.mxu1 %v3096_v5 }
0x1c7f   :  { %4917 = vmatprep.subr.mxu1 %v3094_v42 }
0x1c80   :  { %4918 = vmatpush3.msra.mxu1 %v3094_v42 }
0x1c81   :  { %4920 = vmatmul.mubr.msk.f32.vlgmr.msra.gmra.mxu1 %vm6680_vm3, %v6012_v62  ;;  %vm6690_vm3 = vmmov %vm6674_vm0 }
0x1d39   :  { %v4910_v57 = vpop.f32.mrf.mxu1 }
0x1d3a   :  { %v3086_v52 = vadd.f32 %v4910_v57, %v6273_v61 }
0x1d3b   :  { %v3080_v29 = vpop.f32.mrf.mxu1 }
0x1d3c   :  { %v3081_v51 = vadd.f32 %v3080_v29, %v6273_v61 }
0x1d3e   :  { %v3184_v8 = vmul.f32 0.35355338, %v3081_v51 }
0x1d40   :  { %4938 = vmatprep.mubr.msk.f32.mxu0 %vm6681_vm7, %v3184_v8  ;;  %vm6691_vm7 = vmmov %vm6674_vm0 }
0x1d41   :  { %v4921_v24 = vpop.f32.mrf.mxu1 }
0x1d42   :  { %v6291_v26 = vadd.f32 %v4921_v24, %v3107_v53 }
0x1d43   :  { %v3175_v45 = vpop.f32.mrf.mxu1 }
0x1d44   :  { %v6293_v50 = vadd.f32 %v3175_v45, %v3107_v53  ;;  %v3193_v4 = vmul.f32 %v5262_v10, %v6291_v26  ;;  %v3191_v21 = vmul.f32 %v5279_v12, %v6291_v26 }
0x1d46   :  { %4922 = vmatprep.subr.msk.mxu0 %vm6682_vm13, %v3193_v4  ;;  %v3192_v59 = vmul.f32 %v5262_v10, %v6293_v50  ;;  %v3190_v49 = vmul.f32 %v5279_v12, %v6293_v50  ;;  %v3189_v10 = vmul.f32 %v5298_v14, %v6291_v26  ;;  %v3188_v1 = vmul.f32 %v5298_v14, %v6293_v50  ;;  %vm6692_vm13 = vmmov %vm6674_vm0 }
0x1d47   :  { %4923 = vmatpush3.xpose.msk.msra.mxu0 %vm6683_vm4, %v3193_v4  ;;  %v3187_v12 = vmul.f32 %v5308_v15, %v6291_v26  ;;  %vm6693_vm4 = vmmov %vm6674_vm0  ;;  %v3186_v38 = vmul.f32 %v5308_v15, %v6293_v50  ;;  %v3185_v14 = vmul.f32 0.35355338, %v3086_v52 }
0x1d48   :  { %4924 = vmatprep.subr.msk.mxu0 %vm6684_vm12, %v3192_v59  ;;  %vm6694_vm12 = vmmov %vm6674_vm0 }
0x1d4b   :  { %4925 = vmatpush3.xpose.msk.msra.mxu0 %vm6674_vm0, %v3192_v59 }
0x1d4c   :  { %4926 = vmatprep.subr.msk.mxu0 %vm6685_vm14, %v3191_v21  ;;  %vm6695_vm14 = vmmov %vm6674_vm0 }
0x1d4f   :  { %4927 = vmatpush3.xpose.msk.msra.mxu0 %vm6686_vm1, %v3191_v21  ;;  %vm6696_vm1 = vmmov %vm6674_vm0 }
0x1d50   :  { %4928 = vmatprep.subr.msk.mxu0 %vm6687_vm15, %v3190_v49  ;;  %vm6700_vm15 = vmmov %vm6674_vm0 }
0x1d53   :  { %4929 = vmatpush3.xpose.msk.msra.mxu0 %vm6688_vm6, %v3190_v49  ;;  %vm6701_vm6 = vmmov %vm6674_vm0 }
0x1d54   :  { %4930 = vmatprep.subr.msk.mxu0 %vm6689_vm11, %v3189_v10  ;;  %vm6702_vm11 = vmmov %vm6674_vm0 }
0x1d57   :  { %4931 = vmatpush3.xpose.msk.msra.mxu0 %vm6690_vm3, %v3189_v10  ;;  %vm6703_vm3 = vmmov %vm6674_vm0 }
0x1d58   :  { %4932 = vmatprep.subr.msk.mxu0 %vm6691_vm7, %v3188_v1  ;;  %vm6704_vm7 = vmmov %vm6674_vm0 }
0x1d5b   :  { %4933 = vmatpush3.xpose.msk.msra.mxu0 %vm6692_vm13, %v3188_v1  ;;  %vm6705_vm13 = vmmov %vm6674_vm0 }
0x1d5c   :  { %4934 = vmatprep.subr.msk.mxu0 %vm6693_vm4, %v3187_v12  ;;  %vm6706_vm4 = vmmov %vm6674_vm0 }
0x1d5f   :  { %4935 = vmatpush3.xpose.msk.msra.mxu0 %vm6694_vm12, %v3187_v12  ;;  %vm6708_vm12 = vmmov %vm6674_vm0 }
0x1d60   :  { %4936 = vmatprep.subr.msk.mxu0 %vm6674_vm0, %v3186_v38 }
0x1d63   :  { %4937 = vmatpush3.xpose.msk.msra.mxu0 %vm6695_vm14, %v3186_v38  ;;  %vm6709_vm14 = vmmov %vm6696_vm1 }
0x1d66   :  { %4939 = vmatmul.mubr.msk.f32.vlgmr.msra.gmra.mxu0 %vm6696_vm1, %v3185_v14 }
0x1e26   :  { %v4940_v13 = vpop.f32.mrf.mxu0 }
0x1e27   :  { %v3304_v23 = vadd.f32 %v4940_v13, %v6068_v35 }
0x1e28   :  { %v3298_v41 = vpop.f32.mrf.mxu0 }
0x1e29   :  { %v3299_v11 = vadd.f32 %v3298_v41, %v6071_v58  ;;  %v3316_v39 = vsel %vm654_vm8, %v3304_v23, -inf  ;;  %v3310_v15 = vsel %vm647_vm9, %v3304_v23, -inf  ;;  %v3322_v27 = vsel %vm661_vm5, %v3304_v23, -inf }
0x1e2a   :  { %3317 = vmax.xlane.f32.xlu1 %v3316_v39  ;;  %3311 = vmax.xlane.f32.xlu0 %v3310_v15  ;;  %v3328_v58 = vsel %vm668_vm10, %v3304_v23, -inf }
0x1e2b   :  { %v3313_v44 = vsel %vm654_vm8, %v3299_v11, -inf  ;;  %v3307_v56 = vsel %vm647_vm9, %v3299_v11, -inf  ;;  %v3319_v7 = vsel %vm661_vm5, %v3299_v11, -inf  ;;  %v3325_v35 = vsel %vm668_vm10, %v3299_v11, -inf  ;;  %vm6697_vm8 = vmmov %vm6674_vm0 }
0x1e2c   :  { %vm6698_vm5 = vmmov %vm6674_vm0 }
0x1e2d   :  { %vm6699_vm10 = vmmov %vm6674_vm0 }
0x1e2e   :  { %3314 = vmax.xlane.f32.xlu0 %v3313_v44  ;;  %3308 = vmax.xlane.f32.xlu1 %v3307_v56  ;;  %v3197_v56 = vmul.f32 %v6291_v26, %v5350_v31  ;;  %v3196_v31 = vmul.f32 %v6293_v50, %v5356_v33 }
0x1e32   :  { %3320 = vmax.xlane.f32.xlu0 %v3319_v7  ;;  %3323 = vmax.xlane.f32.xlu1 %v3322_v27 }
0x1e36   :  { %3326 = vmax.xlane.f32.xlu0 %v3325_v35  ;;  %3329 = vmax.xlane.f32.xlu1 %v3328_v58 }
0x1eb3   :  { %v3318_v17 = vpop.xlane.xlu1 %3317  ;;  %v3312_v37 = vpop.xlane.xlu0 %3311 }
0x1eb4   :  { %v3336_v5 = vmul.f32 %v5491_v63, %v3318_v17  ;;  %v3332_v42 = vmul.f32 %v5496_v2, %v3312_v37 }
0x1eb6   :  { %v3338_v45 = vadd.f32 %v3336_v5, %v3332_v42 }
0x1eb7   :  { %v3315_v47 = vpop.xlane.xlu0 %3314  ;;  %v3309_v6 = vpop.xlane.xlu1 %3308 }
0x1eb8   :  { %v3335_v57 = vmul.f32 %v5491_v63, %v3315_v47  ;;  %v3331_v29 = vmul.f32 %v5496_v2, %v3309_v6 }
0x1eba   :  { %v3337_v4 = vadd.f32 %v3335_v57, %v3331_v29  ;;  %v3195_v29 = vmul.f32 %v6291_v26, %v5364_v36 }
0x1ebb   :  { %v3321_v51 = vpop.xlane.xlu0 %3320  ;;  %v3324_v8 = vpop.xlane.xlu1 %3323 }
0x1ebc   :  { %v3339_v53 = vmul.f32 %v5504_v28, %v3321_v51  ;;  %v3340_v24 = vmul.f32 %v5504_v28, %v3324_v8  ;;  %v3194_v51 = vmul.f32 %v6293_v50, %v6664_v43 }
0x1ebe   :  { %v3341_v49 = vadd.f32 %v3339_v53, %v3337_v4  ;;  %v3342_v10 = vadd.f32 %v3340_v24, %v3338_v45 }
0x1ebf   :  { %v3327_v59 = vpop.xlane.xlu0 %3326  ;;  %v3330_v21 = vpop.xlane.xlu1 %3329 }
0x1ec0   :  { %v3343_v1 = vmul.f32 %v5512_v40, %v3327_v59  ;;  %v3344_v12 = vmul.f32 %v5512_v40, %v3330_v21 }
0x1ec2   :  { %v3345_v38 = vadd.f32 %v3343_v1, %v3341_v49  ;;  %v3346_v52 = vadd.f32 %v3344_v12, %v3342_v10 }
0x1ec4   :  { %v3348_v14 = vsub.f32 %v3304_v23, %v3346_v52  ;;  %v3347_v13 = vsub.f32 %v3299_v11, %v3345_v38  ;;  %v3200_v23 = vmul.f32 %v6293_v50, %v5334_v22  ;;  %v3199_v11 = vmul.f32 %v6291_v26, %v5328_v20 }
0x1ec5   :  { %v3201_v22 = vmul.f32 %v6291_v26, %v5321_v18  ;;  %v3198_v20 = vmul.f32 %v6293_v50, %v5339_v25 }
0x1ec6   :  { %v3351_v41 = vmul.f32 1.442695, %v3348_v14  ;;  %v3349_v39 = vmul.f32 1.442695, %v3347_v13 }
0x1ec8   :  { %5100 = vpow2.f32 %v3351_v41 }
0x1ec9   :  { %5102 = vpow2.f32 %v3349_v39 }
0x1ed5   :  { %v6347_v15 = vpop.eup %5100 }
0x1ed6   :  { %3375 = vrot.lane.b32.xlu0 %v6347_v15, %s5166_s12  ;;  %3363 = vrot.lane.b32.xlu1 %v6347_v15, %s5169_s16  ;;  %v6353_v44 = vpop.eup %5102  ;;  %v3356_v7 = vsel %vm647_vm9, %v6347_v15, 0.0 }
0x1ed7   :  { %v3353_v27 = vsel %vm647_vm9, %v6353_v44, 0.0 }
0x1eda   :  { %3361 = vrot.lane.b32.xlu0 %v6353_v44, %s5169_s16  ;;  %3373 = vrot.lane.b32.xlu1 %v6353_v44, %s5166_s12 }
0x1ede   :  { %3387 = vrot.lane.b32.xlu0 %v6347_v15, %s5170_s17  ;;  %3385 = vrot.lane.b32.xlu1 %v6353_v44, %s5170_s17 }
0x1ee2   :  { %3437 = vrot.lane.b32.xlu1 %v3200_v23, %s5166_s12 }
0x1ee6   :  { %3435 = vrot.lane.b32.xlu1 %v3199_v11, %s5166_s12 }
0x1eea   :  { %3431 = vrot.lane.b32.xlu1 %v3197_v56, %s5166_s12 }
0x1efd   :  { %3357 = vadd.xlane.f32.xlu0 %v3356_v7 }
0x1f0e   :  { %3354 = vadd.xlane.f32.xlu1 %v3353_v27 }
0x1f13   :  { %3439 = vrot.lane.b32.xlu0 %v3201_v22, %s5166_s12 }
0x1f17   :  { %3433 = vrot.lane.b32.xlu0 %v3198_v20, %s5166_s12 }
0x1f1b   :  { %3429 = vrot.lane.b32.xlu0 %v3196_v31, %s5166_s12 }
0x1f48   :  { %v3376_v35 = vpop.permute.xlu0 %3375  ;;  %v3364_v58 = vpop.permute.xlu1 %3363 }
0x1f49   :  { %v3370_v17 = vsel %vm647_vm9, %v3364_v58, 0.0  ;;  %v3382_v18 = vsel %vm647_vm9, %v3376_v35, 0.0 }
0x1f4a   :  { %3371 = vadd.xlane.f32.xlu1 %v3370_v17 }
0x1f4c   :  { %v3362_v37 = vpop.permute.xlu0 %3361  ;;  %v3374_v47 = vpop.permute.xlu1 %3373 }
0x1f4d   :  { %v3367_v6 = vsel %vm647_vm9, %v3362_v37, 0.0  ;;  %v3379_v5 = vsel %vm647_vm9, %v3374_v47, 0.0 }
0x1f4e   :  { %3383 = vadd.xlane.f32.xlu1 %v3382_v18  ;;  %3368 = vadd.xlane.f32.xlu0 %v3367_v6 }
0x1f50   :  { %v3388_v25 = vpop.permute.xlu0 %3387  ;;  %v3386_v42 = vpop.permute.xlu1 %3385 }
0x1f51   :  { %v3394_v33 = vsel %vm647_vm9, %v3388_v25, 0.0  ;;  %v3391_v57 = vsel %vm647_vm9, %v3386_v42, 0.0 }
0x1f52   :  { %3395 = vadd.xlane.f32.xlu1 %v3394_v33  ;;  %3380 = vadd.xlane.f32.xlu0 %v3379_v5  ;;  %v6427_v33 = vrot.slane %v6269_v54, %v5627_v3  ;;  %v4360_v3 = vld [vmem:[%s6574_s2 + $0xf8] sm:$0xff] }
0x1f54   :  { %v3438_v36 = vpop.permute.xlu1 %3437 }
0x1f56   :  { %3392 = vadd.xlane.f32.xlu0 %v3391_v57 }
0x1f58   :  { %v3436_v8 = vpop.permute.xlu1 %3435 }
0x1f63   :  { %3427 = vrot.lane.b32.xlu1 %v3195_v29, %s5166_s12 }
0x1f67   :  { %3536 = vrot.lane.b32.xlu1 %v6229_v60, %s5165_s9 }
0x1f6b   :  { %3532 = vrot.lane.b32.xlu1 %v6242_v46, %s5165_s9  ;;  %v3432_v46 = vpop.permute.xlu1 %3431 }
0x1f6c   :  { %3425 = vrot.lane.b32.xlu0 %v3194_v51, %s5166_s12 }
0x1f6f   :  { %3542 = vrot.lane.b32.xlu1 %v6273_v61, %s5165_s9 }
0x1f70   :  { %3534 = vrot.lane.b32.xlu0 %v6235_v0, %s5165_s9 }
0x1f74   :  { %3530 = vrot.lane.b32.xlu0 %v6249_v48, %s5165_s9 }
0x1f86   :  { %v3358_v26 = vpop.xlane.xlu0 %3357 }
0x1f87   :  { %v3398_v45 = vmul.f32 %v5496_v2, %v3358_v26 }
0x1f8a   :  { %v3440_v60 = vpop.permute.xlu0 %3439 }
0x1f8b   :  { %4941 = vmatprep.subr.mxu1 %v3440_v60 }
0x1f8c   :  { %4942 = vmatpush3.msra.mxu1 %v3440_v60 }
0x1f8d   :  { %4943 = vmatprep.subr.mxu1 %v3438_v36 }
0x1f8e   :  { %4944 = vmatpush3.msra.mxu1 %v3438_v36  ;;  %v3434_v43 = vpop.permute.xlu0 %3433 }
0x1f8f   :  { %4945 = vmatprep.subr.mxu1 %v3436_v8 }
0x1f90   :  { %4946 = vmatpush3.msra.mxu1 %v3436_v8 }
0x1f91   :  { %4947 = vmatprep.subr.mxu1 %v3434_v43 }
0x1f92   :  { %4948 = vmatpush3.msra.mxu1 %v3434_v43  ;;  %v3430_v61 = vpop.permute.xlu0 %3429  ;;  %v4358_v43 = vld [vmem:[%s6574_s2 + $0xe8] sm:$0xff] }
0x1f93   :  { %4949 = vmatprep.subr.mxu1 %v3432_v46 }
0x1f94   :  { %4950 = vmatpush3.msra.mxu1 %v3432_v46  ;;  %v4356_v46 = vld [vmem:[%s6574_s2 + $0xd8] sm:$0xff] }
0x1f95   :  { %4951 = vmatprep.subr.mxu1 %v3430_v61 }
0x1f96   :  { %4952 = vmatpush3.msra.mxu1 %v3430_v61  ;;  %v4354_v61 = vld [vmem:[%s6574_s2 + $0xc8] sm:$0xff] }
0x1f97   :  { %v3355_v0 = vpop.xlane.xlu1 %3354 }
0x1f98   :  { %v3397_v1 = vmul.f32 %v5496_v2, %v3355_v0  ;;  %v3669_v0 = vrot.slane %v6269_v54, %v5648_v34 }
0x1fd3   :  { %v3372_v48 = vpop.xlane.xlu1 %3371 }
0x1fd4   :  { %v3402_v50 = vmul.f32 %v5491_v63, %v3372_v48 }
0x1fd6   :  { %v3404_v21 = vadd.f32 %v3402_v50, %v3398_v45 }
0x1fd7   :  { %v3384_v53 = vpop.xlane.xlu1 %3383  ;;  %v3369_v24 = vpop.xlane.xlu0 %3368 }
0x1fd8   :  { %v3406_v4 = vmul.f32 %v5504_v28, %v3384_v53  ;;  %v3401_v59 = vmul.f32 %v5491_v63, %v3369_v24 }
0x1fda   :  { %v3408_v52 = vadd.f32 %v3406_v4, %v3404_v21  ;;  %v3403_v14 = vadd.f32 %v3401_v59, %v3397_v1 }
0x1fdb   :  { %v3396_v49 = vpop.xlane.xlu1 %3395  ;;  %v3381_v10 = vpop.xlane.xlu0 %3380 }
0x1fdc   :  { %v3410_v12 = vmul.f32 %v5512_v40, %v3396_v49  ;;  %v3405_v38 = vmul.f32 %v5504_v28, %v3381_v10 }
0x1fde   :  { %v3412_v13 = vadd.f32 %v3410_v12, %v3408_v52  ;;  %v3407_v23 = vadd.f32 %v3405_v38, %v3403_v14  ;;  %v4389_v52 = vld [vmem:[%s6575_s3 + $0xf8] sm:$0xff]  ;;  %v4388_v14 = vld [vmem:[%s6575_s3 + $0xf0] sm:$0xff] }
0x1fdf   :  { %v3428_v41 = vpop.permute.xlu1 %3427  ;;  %v3393_v39 = vpop.xlane.xlu0 %3392  ;;  %4982 = vmatprep.subr.mxu0 %v4389_v52 }
0x1fe0   :  { %v3409_v11 = vmul.f32 %v5512_v40, %v3393_v39  ;;  %4953 = vmatprep.subr.mxu1 %v3428_v41  ;;  %5104 = vrcp.f32 %v3412_v13  ;;  %4983 = vmatpush3.msra.mxu0 %v4389_v52  ;;  %v4387_v13 = vld [vmem:[%s6575_s3 + $0xe8] sm:$0xff]  ;;  %v4385_v39 = vld [vmem:[%s6575_s3 + $0xd8] sm:$0xff] }
0x1fe1   :  { %4954 = vmatpush3.msra.mxu1 %v3428_v41  ;;  %4984 = vmatprep.subr.mxu0 %v4388_v14  ;;  %v4386_v41 = vld [vmem:[%s6575_s3 + $0xe0] sm:$0xff] }
0x1fe2   :  { %v3411_v63 = vadd.f32 %v3409_v11, %v3407_v23  ;;  %4985 = vmatpush3.msra.mxu0 %v4388_v14  ;;  %v4384_v23 = vld [vmem:[%s6575_s3 + $0xd0] sm:$0xff]  ;;  %v4383_v11 = vld [vmem:[%s6575_s3 + $0xc8] sm:$0xff] }
0x1fe3   :  { %v3426_v56 = vpop.permute.xlu0 %3425  ;;  %v3537_v7 = vpop.permute.xlu1 %3536  ;;  %4986 = vmatprep.subr.mxu0 %v4387_v13 }
0x1fe4   :  { %5106 = vrcp.f32 %v3411_v63  ;;  %4955 = vmatprep.subr.mxu1 %v3426_v56  ;;  %4987 = vmatpush3.msra.mxu0 %v4387_v13  ;;  %v4382_v63 = vld [vmem:[%s6575_s3 + $0xc0] sm:$0xff] }
0x1fe5   :  { %4956 = vmatpush3.msra.mxu1 %v3426_v56  ;;  %4988 = vmatprep.subr.mxu0 %v4386_v41 }
0x1fe6   :  { %4960 = vmatprep.subr.mxu1 %v3537_v7  ;;  %4989 = vmatpush3.msra.mxu0 %v4386_v41 }
0x1fe7   :  { %v3535_v20 = vpop.permute.xlu0 %3534  ;;  %v3533_v40 = vpop.permute.xlu1 %3532  ;;  %4990 = vmatprep.subr.mxu0 %v4385_v39 }
0x1fe8   :  { %4991 = vmatpush3.msra.mxu0 %v4385_v39 }
0x1fe9   :  { %4992 = vmatprep.subr.mxu0 %v4384_v23 }
0x1fea   :  { %4993 = vmatpush3.msra.mxu0 %v4384_v23 }
0x1feb   :  { %v3531_v31 = vpop.permute.xlu0 %3530  ;;  %4994 = vmatprep.subr.mxu0 %v4383_v11 }
0x1fec   :  { %4995 = vmatpush3.msra.mxu0 %v4383_v11 }
0x1fed   :  { %v5105_v2 = vpop.eup %5104  ;;  %4996 = vmatprep.subr.mxu0 %v4382_v63 }
0x1fee   :  { %v3416_v22 = vmul.f32 %v5105_v2, %v6347_v15  ;;  %v3543_v15 = vpop.permute.xlu1 %3542  ;;  %4997 = vmatpush3.msra.mxu0 %v4382_v63 }
0x1fef   :  { %5015 = vmatprep.subr.mxu0 %v6663_v9 }
0x1ff1   :  { %v5107_v28 = vpop.eup %5106 }
0x1ff2   :  { %v3415_v27 = vmul.f32 %v5107_v28, %v6353_v44 }
0x1ff4   :  { %4957 = vmatprep.mubr.msk.f32.mxu1 %vm793_vm2, %v3415_v27 }
0x1ff5   :  { %4958 = vmatmul.mubr.msk.f32.vlgmr.msra.gmra.mxu1 %vm793_vm2, %v3416_v22 }
0x1ff6   :  { %4961 = vmatpush3.msra.mxu1 %v3537_v7 }
0x1ff7   :  { %4962 = vmatprep.subr.mxu1 %v3535_v20 }
0x1ff8   :  { %4963 = vmatpush3.msra.mxu1 %v3535_v20 }
0x1ff9   :  { %4964 = vmatprep.subr.mxu1 %v3533_v40 }
0x1ffa   :  { %4965 = vmatpush3.msra.mxu1 %v3533_v40 }
0x1ffb   :  { %4966 = vmatprep.subr.mxu1 %v3531_v31 }
0x1ffc   :  { %4967 = vmatpush3.msra.mxu1 %v3531_v31 }
0x1ffd   :  { %4971 = vmatprep.subr.mxu1 %v4360_v3 }
0x20b5   :  { %v4959_v35 = vpop.f32.mrf.mxu1 }
0x20b7   :  { %v3521_v58 = vpop.f32.mrf.mxu1 }
0x20b8   :  { %4968 = vmatprep.mubr.msk.f32.mxu1 %vm6697_vm8, %v3521_v58  ;;  %vm6710_vm8 = vmmov %vm6696_vm1 }
0x20b9   :  { %4969 = vmatmul.mubr.msk.f32.vlgmr.msra.gmra.mxu1 %vm6698_vm5, %v4959_v35  ;;  %vm6711_vm5 = vmmov %vm6696_vm1 }
0x20ba   :  { %4972 = vmatpush3.msra.mxu1 %v4360_v3 }
0x20bb   :  { %4973 = vmatprep.subr.mxu1 %v4358_v43 }
0x20bc   :  { %4974 = vmatpush3.msra.mxu1 %v4358_v43 }
0x20bd   :  { %4975 = vmatprep.subr.mxu1 %v4356_v46 }
0x20be   :  { %4976 = vmatpush3.msra.mxu1 %v4356_v46 }
0x20bf   :  { %4977 = vmatprep.subr.mxu1 %v4354_v61 }
0x20c0   :  { %4978 = vmatpush3.msra.mxu1 %v4354_v61 }
0x20c1   :  { %5001 = vmatprep.subr.mxu1 %v6663_v9 }
0x2179   :  { %v4970_v44 = vpop.f32.mrf.mxu1 }
0x217a   :  { %v3623_v17 = vadd.f32 %v4970_v44, %v3543_v15 }
0x217b   :  { %v3617_v37 = vpop.f32.mrf.mxu1 }
0x217c   :  { %v3627_v47 = vadd.f32 %v3623_v17, %v6279_v30  ;;  %v3618_v18 = vadd.f32 %v3617_v37, %v3543_v15 }
0x217e   :  { %v3626_v6 = vadd.f32 %v3618_v18, %v6277_v55  ;;  %v3631_v25 = vsel %vm6699_vm10, %v3627_v47, 0.0 }
0x217f   :  { %3632 = vadd.xlane.f32.xlu1 %v3631_v25 }
0x2180   :  { %v3628_v5 = vsel %vm6700_vm15, %v3626_v6, 0.0 }
0x2181   :  { %3629 = vadd.xlane.f32.xlu0 %v3628_v5 }
0x2190   :  { %3661 = vrot.lane.b32.xlu1 %v6427_v33, %s5166_s12 }
0x2208   :  { %v3633_v42 = vpop.xlane.xlu1 %3632 }
0x2209   :  { %v3635_v57 = vmul.f32 0.03125, %v3633_v42 }
0x220a   :  { %v3630_v29 = vpop.xlane.xlu0 %3629 }
0x220b   :  { %v3634_v30 = vmul.f32 0.03125, %v3630_v29  ;;  %v3637_v51 = vsub.f32 %v3627_v47, %v3635_v57 }
0x220c   :  { %v3662_v49 = vpop.permute.xlu1 %3661 }
0x220d   :  { %v3636_v36 = vsub.f32 %v3626_v6, %v3634_v30  ;;  %v3639_v60 = vmul.f32 %v3637_v51, %v3637_v51 }
0x220f   :  { %v3638_v55 = vmul.f32 %v3636_v36, %v3636_v36  ;;  %v3643_v8 = vsel %vm6702_vm11, %v3639_v60, 0.0 }
0x2211   :  { %v3640_v26 = vsel %vm6701_vm6, %v3638_v55, 0.0  ;;  %vm6713_vm6 = vmmov %vm6696_vm1 }
0x2212   :  { %3641 = vadd.xlane.f32.xlu0 %v3640_v26 }
0x2216   :  { %3644 = vadd.xlane.f32.xlu0 %v3643_v8 }
0x222c   :  { %3779 = vrot.lane.b32.xlu0 %v3669_v0, %s5168_s15 }
0x229b   :  { %v3642_v48 = vpop.xlane.xlu0 %3641 }
0x229c   :  { %v3646_v50 = vmul.f32 0.03125, %v3642_v48 }
0x229e   :  { %v3648_v53 = vadd.f32 1e-05, %v3646_v50 }
0x229f   :  { %v3645_v24 = vpop.xlane.xlu0 %3644 }
0x22a0   :  { %5108 = vrsqrt.f32 %v3648_v53  ;;  %v3647_v45 = vmul.f32 0.03125, %v3645_v24 }
0x22a2   :  { %v3649_v4 = vadd.f32 1e-05, %v3647_v45 }
0x22a3   :  { %v3780_v29 = vpop.permute.xlu0 %3779 }
0x22a4   :  { %5110 = vrsqrt.f32 %v3649_v4 }
0x22ad   :  { %v5109_v59 = vpop.eup %5108 }
0x22ae   :  { %v3652_v21 = vmul.f32 %v5109_v59, %v3636_v36  ;;  %v5126_v59 = vld [vmem:[%s6576_s4] sm:$0xf]  ;;  %s5173_s4 = smov [#allocation4]  }
0x22b0   :  { %v3658_v10 = vmul.f32 %v6427_v33, %v3652_v21  ;;  %v3902_v21 = vrot.slane %v5126_v59, 3 }
0x22b1   :  { %v5111_v1 = vpop.eup %5110 }
0x22b2   :  { %v3653_v34 = vmul.f32 %v5111_v1, %v3637_v51  ;;  %v3664_v54 = vadd.f32 %v3662_v49, %v3658_v10 }
0x22b4   :  { %v3659_v12 = vmul.f32 %v6427_v33, %v3653_v34  ;;  %4979 = vmatprep.mubr.msk.f32.mxu1 %vm6703_vm3, %v3664_v54  ;;  %vm6714_vm3 = vmmov %vm6696_vm1 }
0x22b6   :  { %v3665_v38 = vadd.f32 %v3662_v49, %v3659_v12 }
0x22b8   :  { %4980 = vmatmul.mubr.msk.f32.vlgmr.msra.gmra.mxu1 %vm6704_vm7, %v3665_v38 }
0x2378   :  { %v4981_v56 = vpop.f32.mrf.mxu1 }
0x2379   :  { %v3748_v7 = vadd.f32 %v4981_v56, %v3669_v0  ;;  %v252_v56 = vmul.u32 8, %v6057_v32 }
0x237a   :  { %v3742_v2 = vpop.f32.mrf.mxu1 }
0x237b   :  { %v3754_v28 = vmul.f32 0.044715, %v3748_v7  ;;  %v3743_v27 = vadd.f32 %v3742_v2, %v3669_v0  ;;  %v3752_v5 = vmul.f32 0.5, %v3748_v7  ;;  %v6712_v2 = vld [vmem:[#allocation8_spill] sm:$0xff] }
0x237c   :  { %vm254_vm10 = vcmp.ge.s32.totalorder %v6712_v2, %v252_v56 }
0x237d   :  { %v3756_v22 = vmul.f32 %v3754_v28, %v3748_v7  ;;  %v3753_v20 = vmul.f32 0.044715, %v3743_v27  ;;  %v3751_v6 = vmul.f32 0.5, %v3743_v27 }
0x237f   :  { %v3758_v40 = vmul.f32 %v3756_v22, %v3748_v7  ;;  %v3755_v31 = vmul.f32 %v3753_v20, %v3743_v27 }
0x2381   :  { %v3760_v35 = vadd.f32 %v3758_v40, %v3748_v7  ;;  %v3757_v58 = vmul.f32 %v3755_v31, %v3743_v27  ;;  %v256_v7 = vadd.s32 8, %v252_v56 }
0x2383   :  { %v3762_v15 = vmul.f32 0.7978846, %v3760_v35  ;;  %v3759_v44 = vadd.f32 %v3757_v58, %v3743_v27  ;;  %vm258_vm15 = vcmp.lt.s32.totalorder %v6712_v2, %v256_v7  ;;  %v5172_v27 = vmov 1.0  }
0x2384   :  { %vm260_vm11 = vmand %vm254_vm10, %vm258_vm15  ;;  %v6715_v7 = vmov 0  }
0x2385   :  { %5112 = vtanh.f32 %v3762_v15  ;;  %v3761_v17 = vmul.f32 0.7978846, %v3759_v44  ;;  %v287_v44 = vadd.s32 16, %v5316_v16 }
0x2387   :  { %5114 = vtanh.f32 %v3761_v17  ;;  %v251_v17 = vmul.u32 8, %v5316_v16 }
0x2392   :  { %v5113_v37 = vpop.eup %5112 }
0x2393   :  { %v3766_v18 = vadd.f32 1.0, %v5113_v37 }
0x2394   :  { %v5115_v47 = vpop.eup %5114 }
0x2395   :  { %v3765_v25 = vadd.f32 1.0, %v5115_v47  ;;  %v3768_v57 = vmul.f32 %v3766_v18, %v3752_v5  ;;  %v255_v5 = vadd.s32 8, %v251_v17 }
0x2397   :  { %v3767_v42 = vmul.f32 %v3765_v25, %v3751_v6  ;;  %v297_v25 = vadd.s32 24, %v5316_v16  ;;  %vm257_vm10 = vcmp.lt.s32.totalorder %v6712_v2, %v255_v5 }
0x2399   :  { %4998 = vmatprep.mubr.msk.f32.mxu0 %vm793_vm2, %v3767_v42 }
0x239a   :  { %4999 = vmatmul.mubr.msk.f32.vlgmr.msra.gmra.mxu0 %vm793_vm2, %v3768_v57  ;;  %vm6707_vm2 = vmmov %vm6674_vm0  ;;  %vm5171_vm0 = vmmov 0  }
0x239b   :  { %5005 = vmatprep.mubr.msk.f32.mxu1 %vm5171_vm0, %v6663_v9  ;;  %5019 = vmatprep.mubr.msk.f32.mxu0 %vm5171_vm0, %v6663_v9 }
0x245a   :  { %v5000_v30 = vpop.f32.mrf.mxu0 }
0x245b   :  { %v3860_v51 = vadd.f32 %v5000_v30, %v3780_v29 }
0x245c   :  { %v3854_v36 = vpop.f32.mrf.mxu0 }
0x245d   :  { %v3855_v55 = vadd.f32 %v3854_v36, %v3780_v29  ;;  %v3864_v26 = vadd.f32 %v3860_v51, %v3665_v38 }
0x245f   :  { %v3863_v60 = vadd.f32 %v3855_v55, %v3664_v54  ;;  %v3868_v8 = vsel %vm6705_vm13, %v3864_v26, 0.0 }
0x2460   :  { %3869 = vadd.xlane.f32.xlu1 %v3868_v8 }
0x2461   :  { %v3865_v3 = vsel %vm6706_vm4, %v3863_v60, 0.0 }
0x2462   :  { %3866 = vadd.xlane.f32.xlu0 %v3865_v3 }
0x24e9   :  { %v3870_v43 = vpop.xlane.xlu1 %3869 }
0x24ea   :  { %v3872_v46 = vmul.f32 0.03125, %v3870_v43  ;;  %v307_v43 = vadd.s32 32, %v5316_v16 }
0x24eb   :  { %v3867_v61 = vpop.xlane.xlu0 %3866 }
0x24ec   :  { %v3874_v0 = vsub.f32 %v3864_v26, %v3872_v46  ;;  %v3871_v48 = vmul.f32 0.03125, %v3867_v61  ;;  %v317_v46 = vadd.s32 40, %v5316_v16 }
0x24ee   :  { %v3873_v50 = vsub.f32 %v3863_v60, %v3871_v48  ;;  %v3876_v53 = vmul.f32 %v3874_v0, %v3874_v0  ;;  %v337_v48 = vadd.s32 56, %v5316_v16 }
0x24f0   :  { %v3880_v24 = vsel %vm6707_vm2, %v3876_v53, 0.0  ;;  %v3875_v45 = vmul.f32 %v3873_v50, %v3873_v50  ;;  %vm269_vm2 = vcmp.eq.s32.totalorder %v6712_v2, %v5316_v16 }
0x24f1   :  { %3881 = vadd.xlane.f32.xlu1 %v3880_v24  ;;  %v4240_v15 = vsel %vm269_vm2, 1.0, %v6663_v9  ;;  %vm339_vm2 = vcmp.eq.s32.totalorder %v6712_v2, %v337_v48 }
0x24f2   :  { %v3877_v4 = vsel %vm6708_vm12, %v3875_v45, 0.0  ;;  %vm279_vm12 = vcmp.eq.s32.totalorder %v6712_v2, %v6057_v32 }
0x24f3   :  { %3878 = vadd.xlane.f32.xlu0 %v3877_v4  ;;  %v4242_v6 = vsel %vm279_vm12, 1.0, %v6663_v9  ;;  %vm350_vm12 = vcmp.ge.s32.totalorder %v6712_v2, 64 }
0x24f4   :  { %v285_v29 = vadd.f32 %v4242_v6, %v4240_v15 }
0x2502   :  { %3891 = vrot.lane.b32.xlu1 %v6427_v33, %s5168_s15 }
0x2506   :  { %3981 = vrot.lane.b32.xlu1 %v3902_v21, %s5166_s12 }
0x2509   :  { %3896 = vrot.lane.b32.xlu0 %v6427_v33, %s5165_s9  ;;  %s4216_s9 = sshll.u32 %s5173_s4, 4  ;;  %s4217_s9 = int_to_ptr.vmem [resolvable:$true] %s4216_s9 }
0x250a   :  { %s5139_s12 = scalar_lea.vmem %s4217_s9, 16  ;;  %s5143_s15 = scalar_lea.vmem %s4217_s9, 32 }
0x250b   :  { %p5140_p5 = scmp.ne.s32.totalorder %s4217_s9, %s5139_s12  ;;  %p5144_p6 = scmp.lt.s32.totalorder %s4217_s9, %s4217_s9 }
0x250c   :  { %p5145_p7 = scmp.lt.s32.totalorder %s5143_s15, %s5139_s12 }
0x250e   :  { %p5146_p8 = por %p5145_p7, %p5144_p6 }
0x2510   :  { %p5147_p9 = pnand %p5146_p8, %p5140_p5 }
0x257a   :  { %v3882_v49 = vpop.xlane.xlu1 %3881 }
0x257b   :  { %v3884_v10 = vmul.f32 0.03125, %v3882_v49 }
0x257c   :  { %v3879_v1 = vpop.xlane.xlu0 %3878 }
0x257d   :  { %v3886_v34 = vadd.f32 1e-05, %v3884_v10  ;;  %v3883_v54 = vmul.f32 0.03125, %v3879_v1  ;;  %v4254_v10 = vsel %vm339_vm2, 1.0, %v6663_v9 }
0x257e   :  { %v3892_v52 = vpop.permute.xlu1 %3891 }
0x257f   :  { %5116 = vrsqrt.f32 %v3886_v34  ;;  %v3885_v12 = vadd.f32 1e-05, %v3883_v54 }
0x2580   :  { %v3897_v33 = vpop.permute.xlu0 %3896 }
0x2581   :  { %5118 = vrsqrt.f32 %v3885_v12 }
0x2582   :  { %v3982_v28 = vpop.permute.xlu1 %3981 }
0x258c   :  { %v5117_v38 = vpop.eup %5116 }
0x258d   :  { %v3890_v14 = vmul.f32 %v5117_v38, %v3874_v0  ;;  %v327_v0 = vadd.s32 48, %v5316_v16 }
0x258e   :  { %v5119_v13 = vpop.eup %5118 }
0x258f   :  { %v3889_v41 = vmul.f32 %v5119_v13, %v3873_v50  ;;  %v3895_v39 = vmul.f32 %v3892_v52, %v3890_v14 }
0x2591   :  { %v3894_v23 = vmul.f32 %v3892_v52, %v3889_v41  ;;  %v3900_v11 = vadd.f32 %v3897_v33, %v3895_v39 }
0x2593   :  { %5002 = vmatpush3.xpose.msk.msra.mxu1 %vm6709_vm14, %v3900_v11  ;;  %v3899_v63 = vadd.f32 %v3897_v33, %v3894_v23  ;;  %vm289_vm14 = vcmp.eq.s32.totalorder %v6712_v2, %v287_v44 }
0x2594   :  { %5003 = vmatprep.subr.mxu1 %v6663_v9  ;;  %v4244_v30 = vsel %vm289_vm14, 1.0, %v6663_v9  ;;  %vm6716_vm14 = vcmp.lt.s32.totalorder %v6712_v2, 8 }
0x2595   :  { %v295_v26 = vadd.f32 %v4244_v30, %v285_v29 }
0x2597   :  { %5004 = vmatpush3.xpose.msk.msra.mxu1 %vm6696_vm1, %v3899_v63 }
0x2598   :  { %5008 = vmatprep.subr.mxu1 %v6663_v9 }
0x259a   :  { %5006 = vmatmul.mubr.msk.f32.vlgmr.msra.gmra.mxu1 %vm6710_vm8, %v3902_v21  ;;  %vm299_vm8 = vcmp.eq.s32.totalorder %v6712_v2, %v297_v25 }
0x259b   :  { %5009 = vmatpush3.xpose.msk.msra.mxu1 %vm6711_vm5, %v6012_v62  ;;  %5012 = vmatprep.mubr.msk.f32.mxu1 %vm5171_vm0, %v6663_v9  ;;  %v268_v62 = vadd.s32 56, %v6057_v32  ;;  %vm253_vm5 = vcmp.ge.s32.totalorder %v6712_v2, %v251_v17  ;;  %v4246_v60 = vsel %vm299_vm8, 1.0, %v6663_v9 }
0x259c   :  { %5010 = vmatprep.subr.mxu1 %v6663_v9  ;;  %v305_v61 = vadd.f32 %v4246_v60, %v295_v26 }
0x259d   :  { %v278_v22 = vadd.s32 8, %v268_v62  ;;  %vm270_vm7 = vcmp.eq.s32.totalorder %v6712_v2, %v268_v62  ;;  %v298_v35 = vadd.s32 24, %v268_v62  ;;  %v308_v47 = vadd.s32 32, %v268_v62 }
0x259e   :  { %v4241_v20 = vsel %vm270_vm7, 1.0, %v6663_v9  ;;  %v318_v32 = vadd.s32 40, %v268_v62  ;;  %v328_v55 = vadd.s32 48, %v268_v62  ;;  %v338_v3 = vadd.s32 56, %v268_v62 }
0x259f   :  { %5011 = vmatpush3.xpose.msk.msra.mxu1 %vm6713_vm6, %v6010_v19  ;;  %vm280_vm13 = vcmp.eq.s32.totalorder %v6712_v2, %v278_v22  ;;  %v288_v19 = vadd.s32 16, %v268_v62  ;;  %vm310_vm1 = vcmp.eq.s32.totalorder %v6712_v2, %v308_v47  ;;  %vm259_vm6 = vmand %vm253_vm5, %vm257_vm10  ;;  %vm309_vm7 = vcmp.eq.s32.totalorder %v6712_v2, %v307_v43 }
0x25a0   :  { %5022 = vmatprep.subr.mxu1 %v6663_v9  ;;  %v4243_v40 = vsel %vm280_vm13, 1.0, %v6663_v9  ;;  %v4249_v57 = vsel %vm310_vm1, 1.0, %v6663_v9  ;;  %vm320_vm15 = vcmp.eq.s32.totalorder %v6712_v2, %v318_v32  ;;  %vm319_vm13 = vcmp.eq.s32.totalorder %v6712_v2, %v317_v46 }
0x25a1   :  { %v286_v31 = vadd.f32 %v4243_v40, %v4241_v20  ;;  %vm290_vm4 = vcmp.eq.s32.totalorder %v6712_v2, %v288_v19  ;;  %v4251_v36 = vsel %vm320_vm15, 1.0, %v6663_v9  ;;  %v4248_v45 = vsel %vm309_vm7, 1.0, %v6663_v9 }
0x25a2   :  { %5013 = vmatmul.mubr.msk.f32.vlgmr.msra.gmra.mxu1 %vm6714_vm3, %v3982_v28  ;;  %v4245_v58 = vsel %vm290_vm4, 1.0, %v6663_v9  ;;  %vm340_vm3 = vcmp.eq.s32.totalorder %v6712_v2, %v338_v3  ;;  %v4250_v4 = vsel %vm319_vm13, 1.0, %v6663_v9  ;;  %v315_v59 = vadd.f32 %v4248_v45, %v305_v61 }
0x25a3   :  { %5023 = vmatpush3.msk.msra.mxu1 %vm260_vm11, %v5172_v27  ;;  %5026 = vmatprep.mubr.msk.f32.mxu1 %vm5171_vm0, %v6663_v9  ;;  %v296_v37 = vadd.f32 %v4245_v58, %v286_v31  ;;  %vm300_vm0 = vcmp.eq.s32.totalorder %v6712_v2, %v298_v35  ;;  %vm330_vm11 = vcmp.eq.s32.totalorder %v6712_v2, %v328_v55  ;;  %v4255_v24 = vsel %vm340_vm3, 1.0, %v6663_v9 }
0x25a4   :  { %5024 = vmatprep.subr.mxu1 %v6663_v9  ;;  %v4247_v18 = vsel %vm300_vm0, 1.0, %v6663_v9  ;;  %v4253_v50 = vsel %vm330_vm11, 1.0, %v6663_v9  ;;  %vm329_vm4 = vcmp.eq.s32.totalorder %v6712_v2, %v327_v0  ;;  %v325_v49 = vadd.f32 %v4250_v4, %v315_v59 }
0x25a5   :  { %v306_v42 = vadd.f32 %v4247_v18, %v296_v37  ;;  %5025 = vmatpush3.msk.msra.mxu1 %vm259_vm6, %v5172_v27  ;;  %v4252_v21 = vsel %vm329_vm4, 1.0, %v6663_v9  ;;  %vm351_vm0 = vcmp.lt.s32.totalorder %v6712_v2, 72  ;;  %v349_v28 = vsel %vm6716_vm14, 1, %v6715_v7 }
0x25a6   :  { %v335_v1 = vadd.f32 %v4252_v21, %v325_v49 }
0x25a7   :  { %v316_v51 = vadd.f32 %v4249_v57, %v306_v42 }
0x25a8   :  { %v345_v34 = vadd.f32 %v4254_v10, %v335_v1 }
0x25a9   :  { %v326_v8 = vadd.f32 %v4251_v36, %v316_v51 }
0x25ab   :  { %v336_v53 = vadd.f32 %v4253_v50, %v326_v8 }
0x25ad   :  { %v346_v16 = vadd.f32 %v4255_v24, %v336_v53 }
0x25af   :  { %5016 = vmatpush3.msra.mxu0 %v346_v16 }
0x25b0   :  { %5017 = vmatprep.subr.mxu0 %v6663_v9 }
0x25b1   :  { %5018 = vmatpush3.msra.mxu0 %v345_v34 }
0x265a   :  { %v3977_v54 = vpop.f32.mrf.mxu1 }
0x265b   :  { %5027 = vmatmul.mubr.msk.f32.vlgmr.msra.gmra.mxu1 %vm647_vm9, %v3977_v54 }
0x265c   :  { %v5007_v12 = vpop.f32.mrf.mxu1 }
0x2662   :  { %v4051_v38 = vpop.f32.mrf.mxu1 }
0x2663   :  { %5020 = vmatmul.mubr.msk.f32.vlgmr.msra.gmra.mxu0 %vm647_vm9, %v4051_v38  ;;  %vm352_vm9 = vmand %vm350_vm12, %vm351_vm0 }
0x2664   :  { %v5014_v52 = vpop.f32.mrf.mxu1  ;;  %v353_v27 = vsel %vm352_vm9, 1, %v349_v28 }
0x2665   :  { %vm354_vm1 = vcmp.eq.s32.totalorder %v353_v27, 0 }
0x2666   :  { %v4256_v62 = vsel %vm354_vm1, 1.0, %v6663_v9 }
0x271b   :  { %v4197_v14 = vpop.f32.mrf.mxu1 }
0x271d   :  { %v5028_v13 = vpop.f32.mrf.mxu1 }
0x2723   :  { %v4124_v33 = vpop.f32.mrf.mxu0 }
0x2724   :  { %v4198_v41 = vadd.f32 %v4197_v14, %v4124_v33 }
0x2725   :  { %v5021_v39 = vpop.f32.mrf.mxu0 }
0x2726   :  { %v4402_v23 = vmul.f32 -0.17677669, %v4198_v41 }
0x2728   :  { %v4203_v11 = vmul.f32 1.442695, %v4402_v23 }
0x272a   :  { %5120 = vpow2.f32 %v4203_v11 }
0x2737   :  { %v5121_v63 = vpop.eup %5120 }
0x2738   :  { %v4205_v56 = vadd.f32 1.0, %v5121_v63 }
0x273a   :  { %5122 = vrcp.f32 %v4205_v56 }
0x2747   :  { %v5123_v22 = vpop.eup %5122 }
0x2748   :  { %v4208_v19 = vmul.f32 %v5123_v22, %v4256_v62 }
0x274a   :  { %4209 = vst [vmem:[#allocation4] sm:$0x1] %v4208_v19 }
0x274b   :  { %5150 = shalt.err (!%p5147_p9)
}
0x274c   :  { %4219 = dma.vmem_to_hbm [thread:$0]  %s4217_s9, 16, %s6577_s5, [#allocation5]  }
0x274d   :  { %5161 = dma.done.wait [#allocation5], 16  }
0x274e   :  { %5162 = vsyncadd [#allocation5], 4294967280 }
0x274f   :  { %4223 = vsyncpa [#allocation5], 1 }

</bundles_post_ra>
